<compile_context>
chip_gen: v6e
topology: v6e:2x2x1
jax: 0.10.0
libtpu: 0.0.40
codegen_flags: <defaults>
</compile_context>

<pallas_src>
import functools

import jax
import jax.numpy as jnp
from jax.experimental import pallas as pl
from jax.experimental.pallas import tpu as pltpu

INPUT_DIM = 3
OUTPUT_DIM = 3
LATENT_DIM = 128
NUM_LAYERS = 8                 # => 1 input layer, 7 hidden layers, 1 output layer
NUM_HIDDEN = NUM_LAYERS - 1

MAX_TILE_N = 4096              # amortizes pipeline overhead + MXU weight pushes
MIN_TILE_N = 256
TARGET_GRID_STEPS = 8          # >= ~4 steps per TensorCore on v7x megacore


def _mlp_kernel(x_ref, w0_ref, b0_ref, wh_ref, bh_ref, wo_ref, bo_ref, o_ref,
                *, compute_dtype):
    x = x_ref[...]                           # (TILE_N, 3)    f32
    w0 = w0_ref[...]                         # (3, 128)       f32

    # Input layer on the VPU: K=3 contraction as 3 broadcast FMAs instead of a
    # lane-sparse padded-K MXU matmul.  VPU slots are idle while the MXU is
    # busy on the hidden layers, so this is essentially free.
    h = b0_ref[...] + x[:, 0:1] * w0[0:1, :]
    for d in range(1, INPUT_DIM):
        h = h + x[:, d:d + 1] * w0[d:d + 1, :]
    # Fused ReLU + downcast: h lives in VMEM between layers in compute_dtype.
    h = jnp.maximum(h, 0.0).astype(compute_dtype)          # (TILE_N, 128)

    # Hidden layers (statically unrolled): (TILE_N,128) @ (128,128) on the MXU.
    # Weights already arrive in compute_dtype (pre-cast in the wrapper); f32
    # accumulation, f32 bias add, then ReLU fused with the downcast.
    for i in range(NUM_HIDDEN):
        acc = jnp.dot(h, wh_ref[i], preferred_element_type=jnp.float32)
        h = jnp.maximum(acc + bh_ref[i], 0.0).astype(compute_dtype)

    # Output layer: (TILE_N, 128) @ (128, 3) + (1, 3), f32 accumulation.
    y = jnp.dot(h, wo_ref[...], preferred_element_type=jnp.float32)
    o_ref[...] = (y + bo_ref[...]).astype(o_ref.dtype)


def _pick_tile_n(n):
    # Largest power-of-two tile in [MIN_TILE_N, MAX_TILE_N] that still gives
    # roughly TARGET_GRID_STEPS grid steps (keeps both v7x TensorCores busy on
    # small/medium point clouds while amortizing per-step overhead on big ones).
    tile = pl.next_power_of_2(max(1, pl.cdiv(n, TARGET_GRID_STEPS)))
    return int(min(MAX_TILE_N, max(MIN_TILE_N, tile)))


@functools.partial(jax.jit, static_argnames=("use_bf16",))
def nsfp_raw_mlp_forward(x, w0, b0, wh, bh, wo, bo, *, use_bf16=True):
    n = x.shape[0]
    tile_n = _pick_tile_n(n)
    n_pad = pl.cdiv(n, tile_n) * tile_n
    if n_pad != n:
        # Pad with zero rows; padded outputs are discarded below.
        x = jnp.pad(x, ((0, n_pad - n), (0, 0)))
    grid = (n_pad // tile_n,)

    compute_dtype = jnp.bfloat16 if use_bf16 else jnp.float32
    # Pre-cast MXU weight operands ONCE in the wrapper (not per grid step in
    # the kernel): halves weight VMEM and removes per-layer cast filler.
    wh_c = wh.astype(compute_dtype)
    wo_c = wo.astype(compute_dtype)

    flops = 2 * n_pad * (INPUT_DIM * LATENT_DIM
                         + NUM_HIDDEN * LATENT_DIM * LATENT_DIM
                         + LATENT_DIM * OUTPUT_DIM)

    def _nbytes(a):
        return a.size * a.dtype.itemsize

    bytes_accessed = (4 * n_pad * (INPUT_DIM + OUTPUT_DIM)
                      + _nbytes(w0) + _nbytes(b0) + _nbytes(wh_c) + _nbytes(bh)
                      + _nbytes(wo_c) + _nbytes(bo))

    out = pl.pallas_call(
        functools.partial(_mlp_kernel, compute_dtype=compute_dtype),
        out_shape=jax.ShapeDtypeStruct((n_pad, OUTPUT_DIM), x.dtype),
        grid_spec=pltpu.PrefetchScalarGridSpec(
            num_scalar_prefetch=0,
            grid=grid,
            in_specs=[
                # x: tiled along N, full feature dim.
                pl.BlockSpec((tile_n, INPUT_DIM), lambda i: (i, 0)),
                # Parameters: whole arrays, VMEM-resident for every tile.
                pl.BlockSpec((INPUT_DIM, LATENT_DIM), lambda i: (0, 0)),
                pl.BlockSpec((1, LATENT_DIM), lambda i: (0, 0)),
                pl.BlockSpec((NUM_HIDDEN, LATENT_DIM, LATENT_DIM),
                             lambda i: (0, 0, 0)),
                pl.BlockSpec((NUM_HIDDEN, 1, LATENT_DIM), lambda i: (0, 0, 0)),
                pl.BlockSpec((LATENT_DIM, OUTPUT_DIM), lambda i: (0, 0)),
                pl.BlockSpec((1, OUTPUT_DIM), lambda i: (0, 0)),
            ],
            out_specs=pl.BlockSpec((tile_n, OUTPUT_DIM), lambda i: (i, 0)),
        ),
        compiler_params=pltpu.CompilerParams(
            # Row tiles are independent -> megacore sharding on v7x.
            dimension_semantics=("parallel",),
            # Explicit limit keeps v5e (16 MiB default scoped VMEM) from
            # hitting the default ceiling at large tiles; 32 MiB is safe on
            # v5e/v6e/v7x.  At tile_n=4096 the lane-padded x/out tiles
            # dominate (~8 MiB total with double-buffering).
            vmem_limit_bytes=32 * 1024 * 1024,
        ),
        cost_estimate=pl.CostEstimate(flops=flops, transcendentals=0,
                                      bytes_accessed=bytes_accessed),
    )(x, w0, b0, wh_c, bh, wo_c, bo)

    return out[:n] if n_pad != n else out


def _torch_linear_init(key, fan_in, shape):
    # torch.nn.Linear default: U(-1/sqrt(fan_in), 1/sqrt(fan_in))
    bound = 1.0 / jnp.sqrt(jnp.float32(fan_in))
    return jax.random.uniform(key, shape, jnp.float32, -bound, bound)


def make_params(key):
    ks = jax.random.split(key, 6)
    w0 = _torch_linear_init(ks[0], INPUT_DIM, (INPUT_DIM, LATENT_DIM))
    b0 = _torch_linear_init(ks[1], INPUT_DIM, (1, LATENT_DIM))
    wh = _torch_linear_init(ks[2], LATENT_DIM,
                            (NUM_HIDDEN, LATENT_DIM, LATENT_DIM))
    bh = _torch_linear_init(ks[3], LATENT_DIM, (NUM_HIDDEN, 1, LATENT_DIM))
    wo = _torch_linear_init(ks[4], LATENT_DIM, (LATENT_DIM, OUTPUT_DIM))
    bo = _torch_linear_init(ks[5], LATENT_DIM, (1, OUTPUT_DIM))
    return w0, b0, wh, bh, wo, bo


def reference_forward(x, w0, b0, wh, bh, wo, bo, compute_dtype=jnp.float32):
    # Pure-JAX reference matching the kernel's numerics for a given operand
    # dtype (f32 bias add + accumulation in both cases).
    h = jnp.maximum(x @ w0 + b0, 0.0)
    for i in range(NUM_HIDDEN):
        acc = jnp.dot(h.astype(compute_dtype), wh[i].astype(compute_dtype),
                      preferred_element_type=jnp.float32)
        h = jnp.maximum(acc + bh[i], 0.0)
    y = jnp.dot(h.astype(compute_dtype), wo.astype(compute_dtype),
                preferred_element_type=jnp.float32)
    return y + bo


if __name__ == "__main__":
    key = jax.random.PRNGKey(0)
    k_x, k_p = jax.random.split(key)

    # Small, non-tile-aligned point count to exercise padding + multi-tile grid.
    N = 2500
    x = jax.random.normal(k_x, (N, INPUT_DIM), dtype=jnp.float32)
    params = make_params(k_p)

    # Default path: bf16 MXU operands, f32 accumulation.
    out = jax.block_until_ready(nsfp_raw_mlp_forward(x, *params))
    assert out.shape == (N, OUTPUT_DIM)

    ref_f32 = reference_forward(x, *params, compute_dtype=jnp.float32)
    ref_bf16 = reference_forward(x, *params, compute_dtype=jnp.bfloat16)
    assert jnp.allclose(out, ref_bf16, atol=2e-3, rtol=2e-3), \
        "bf16 path mismatch vs bf16 reference"
    assert jnp.allclose(out, ref_f32, atol=5e-2, rtol=5e-2), \
        "bf16 path drifted too far from f32 reference"

    # Optional f32-operand path for precision-critical optimization loops.
    out_f32 = jax.block_until_ready(
        nsfp_raw_mlp_forward(x, *params, use_bf16=False))
    assert jnp.allclose(out_f32, ref_f32, atol=1e-4, rtol=1e-4), \
        "f32 path mismatch vs reference"

    print("KERNEL_OK")
</pallas_src>

<mosaic_0001>
module attributes {stable_mosaic.version = 11 : i64} {
  func.func @_mlp_kernel(%arg0: i32, %arg1: memref<512x3xf32, #tpu.memory_space<vmem>>, %arg2: memref<3x128xf32, #tpu.memory_space<vmem>>, %arg3: memref<1x128xf32, #tpu.memory_space<vmem>>, %arg4: memref<7x128x128xbf16, #tpu.memory_space<vmem>>, %arg5: memref<7x1x128xf32, #tpu.memory_space<vmem>>, %arg6: memref<128x3xbf16, #tpu.memory_space<vmem>>, %arg7: memref<1x3xf32, #tpu.memory_space<vmem>>, %arg8: memref<512x3xf32, #tpu.memory_space<vmem>>) attributes {dimension_semantics = [#tpu.dimension_semantics<parallel>], iteration_bounds = array<i64: 5>, scalar_prefetch = 0 : i64, scratch_operands = 0 : i64, tpu.core_type = #tpu.core_type<tc>, window_params = [{transform_indices = @transform_0, window_bounds = array<i64: 512, 3>}, {pipeline_mode = #tpu.pipeline_mode<synchronous>, transform_indices = @transform_1, window_bounds = array<i64: 3, 128>}, {pipeline_mode = #tpu.pipeline_mode<synchronous>, transform_indices = @transform_2, window_bounds = array<i64: 1, 128>}, {pipeline_mode = #tpu.pipeline_mode<synchronous>, transform_indices = @transform_3, window_bounds = array<i64: 7, 128, 128>}, {pipeline_mode = #tpu.pipeline_mode<synchronous>, transform_indices = @transform_4, window_bounds = array<i64: 7, 1, 128>}, {pipeline_mode = #tpu.pipeline_mode<synchronous>, transform_indices = @transform_5, window_bounds = array<i64: 128, 3>}, {pipeline_mode = #tpu.pipeline_mode<synchronous>, transform_indices = @transform_6, window_bounds = array<i64: 1, 3>}, {transform_indices = @transform_7, window_bounds = array<i64: 512, 3>}]} {
    %c0 = arith.constant 0 : index
    %c0_0 = arith.constant 0 : index
    %0 = vector.load %arg1[%c0, %c0_0] : memref<512x3xf32, #tpu.memory_space<vmem>>, vector<512x3xf32>
    %c0_1 = arith.constant 0 : index
    %c0_2 = arith.constant 0 : index
    %1 = vector.load %arg2[%c0_1, %c0_2] : memref<3x128xf32, #tpu.memory_space<vmem>>, vector<3x128xf32>
    %c0_3 = arith.constant 0 : index
    %c0_4 = arith.constant 0 : index
    %2 = vector.load %arg3[%c0_3, %c0_4] : memref<1x128xf32, #tpu.memory_space<vmem>>, vector<1x128xf32>
    %3 = vector.extract_strided_slice %0 {offsets = [0, 0], sizes = [512, 1], strides = [1, 1]} : vector<512x3xf32> to vector<512x1xf32>
    %4 = vector.extract_strided_slice %1 {offsets = [0, 0], sizes = [1, 128], strides = [1, 1]} : vector<3x128xf32> to vector<1x128xf32>
    %5 = vector.broadcast %3 : vector<512x1xf32> to vector<512x128xf32>
    %6 = vector.broadcast %4 : vector<1x128xf32> to vector<512x128xf32>
    %7 = arith.mulf %5, %6 : vector<512x128xf32>
    %8 = vector.broadcast %2 : vector<1x128xf32> to vector<512x128xf32>
    %9 = arith.addf %8, %7 : vector<512x128xf32>
    %10 = vector.extract_strided_slice %0 {offsets = [0, 1], sizes = [512, 1], strides = [1, 1]} : vector<512x3xf32> to vector<512x1xf32>
    %11 = vector.extract_strided_slice %1 {offsets = [1, 0], sizes = [1, 128], strides = [1, 1]} : vector<3x128xf32> to vector<1x128xf32>
    %12 = vector.broadcast %10 : vector<512x1xf32> to vector<512x128xf32>
    %13 = vector.broadcast %11 : vector<1x128xf32> to vector<512x128xf32>
    %14 = arith.mulf %12, %13 : vector<512x128xf32>
    %15 = arith.addf %9, %14 : vector<512x128xf32>
    %16 = vector.extract_strided_slice %0 {offsets = [0, 2], sizes = [512, 1], strides = [1, 1]} : vector<512x3xf32> to vector<512x1xf32>
    %17 = vector.extract_strided_slice %1 {offsets = [2, 0], sizes = [1, 128], strides = [1, 1]} : vector<3x128xf32> to vector<1x128xf32>
    %18 = vector.broadcast %16 : vector<512x1xf32> to vector<512x128xf32>
    %19 = vector.broadcast %17 : vector<1x128xf32> to vector<512x128xf32>
    %20 = arith.mulf %18, %19 : vector<512x128xf32>
    %21 = arith.addf %15, %20 : vector<512x128xf32>
    %cst = arith.constant 0.000000e+00 : f32
    %22 = vector.broadcast %cst : f32 to vector<512x128xf32>
    %23 = arith.maximumf %21, %22 : vector<512x128xf32>
    %24 = arith.truncf %23 : vector<512x128xf32> to vector<512x128xbf16>
    %c0_5 = arith.constant 0 : index
    %c0_6 = arith.constant 0 : index
    %c0_7 = arith.constant 0 : index
    %25 = vector.load %arg4[%c0_5, %c0_6, %c0_7] : memref<7x128x128xbf16, #tpu.memory_space<vmem>>, vector<1x128x128xbf16>
    %26 = vector.shape_cast %25 : vector<1x128x128xbf16> to vector<128x128xbf16>
    %cst_8 = arith.constant dense<0.000000e+00> : vector<512x128xf32>
    %27 = tpu.matmul %24, %26, %cst_8 {dimension_numbers = #tpu.dot_dimension_numbers<[1], [0], [0], [1], [0, 0, 1, 1], [], []>} : vector<512x128xbf16>, vector<128x128xbf16>, vector<512x128xf32> -> vector<512x128xf32>
    %c0_9 = arith.constant 0 : index
    %c0_10 = arith.constant 0 : index
    %c0_11 = arith.constant 0 : index
    %28 = vector.load %arg5[%c0_9, %c0_10, %c0_11] : memref<7x1x128xf32, #tpu.memory_space<vmem>>, vector<1x1x128xf32>
    %29 = vector.shape_cast %28 : vector<1x1x128xf32> to vector<1x128xf32>
    %30 = vector.broadcast %29 : vector<1x128xf32> to vector<512x128xf32>
    %31 = arith.addf %27, %30 : vector<512x128xf32>
    %cst_12 = arith.constant 0.000000e+00 : f32
    %32 = vector.broadcast %cst_12 : f32 to vector<512x128xf32>
    %33 = arith.maximumf %31, %32 : vector<512x128xf32>
    %34 = arith.truncf %33 : vector<512x128xf32> to vector<512x128xbf16>
    %c1 = arith.constant 1 : index
    %c0_13 = arith.constant 0 : index
    %c0_14 = arith.constant 0 : index
    %35 = vector.load %arg4[%c1, %c0_13, %c0_14] : memref<7x128x128xbf16, #tpu.memory_space<vmem>>, vector<1x128x128xbf16>
    %36 = vector.shape_cast %35 : vector<1x128x128xbf16> to vector<128x128xbf16>
    %cst_15 = arith.constant dense<0.000000e+00> : vector<512x128xf32>
    %37 = tpu.matmul %34, %36, %cst_15 {dimension_numbers = #tpu.dot_dimension_numbers<[1], [0], [0], [1], [0, 0, 1, 1], [], []>} : vector<512x128xbf16>, vector<128x128xbf16>, vector<512x128xf32> -> vector<512x128xf32>
    %c1_16 = arith.constant 1 : index
    %c0_17 = arith.constant 0 : index
    %c0_18 = arith.constant 0 : index
    %38 = vector.load %arg5[%c1_16, %c0_17, %c0_18] : memref<7x1x128xf32, #tpu.memory_space<vmem>>, vector<1x1x128xf32>
    %39 = vector.shape_cast %38 : vector<1x1x128xf32> to vector<1x128xf32>
    %40 = vector.broadcast %39 : vector<1x128xf32> to vector<512x128xf32>
    %41 = arith.addf %37, %40 : vector<512x128xf32>
    %cst_19 = arith.constant 0.000000e+00 : f32
    %42 = vector.broadcast %cst_19 : f32 to vector<512x128xf32>
    %43 = arith.maximumf %41, %42 : vector<512x128xf32>
    %44 = arith.truncf %43 : vector<512x128xf32> to vector<512x128xbf16>
    %c2 = arith.constant 2 : index
    %c0_20 = arith.constant 0 : index
    %c0_21 = arith.constant 0 : index
    %45 = vector.load %arg4[%c2, %c0_20, %c0_21] : memref<7x128x128xbf16, #tpu.memory_space<vmem>>, vector<1x128x128xbf16>
    %46 = vector.shape_cast %45 : vector<1x128x128xbf16> to vector<128x128xbf16>
    %cst_22 = arith.constant dense<0.000000e+00> : vector<512x128xf32>
    %47 = tpu.matmul %44, %46, %cst_22 {dimension_numbers = #tpu.dot_dimension_numbers<[1], [0], [0], [1], [0, 0, 1, 1], [], []>} : vector<512x128xbf16>, vector<128x128xbf16>, vector<512x128xf32> -> vector<512x128xf32>
    %c2_23 = arith.constant 2 : index
    %c0_24 = arith.constant 0 : index
    %c0_25 = arith.constant 0 : index
    %48 = vector.load %arg5[%c2_23, %c0_24, %c0_25] : memref<7x1x128xf32, #tpu.memory_space<vmem>>, vector<1x1x128xf32>
    %49 = vector.shape_cast %48 : vector<1x1x128xf32> to vector<1x128xf32>
    %50 = vector.broadcast %49 : vector<1x128xf32> to vector<512x128xf32>
    %51 = arith.addf %47, %50 : vector<512x128xf32>
    %cst_26 = arith.constant 0.000000e+00 : f32
    %52 = vector.broadcast %cst_26 : f32 to vector<512x128xf32>
    %53 = arith.maximumf %51, %52 : vector<512x128xf32>
    %54 = arith.truncf %53 : vector<512x128xf32> to vector<512x128xbf16>
    %c3 = arith.constant 3 : index
    %c0_27 = arith.constant 0 : index
    %c0_28 = arith.constant 0 : index
    %55 = vector.load %arg4[%c3, %c0_27, %c0_28] : memref<7x128x128xbf16, #tpu.memory_space<vmem>>, vector<1x128x128xbf16>
    %56 = vector.shape_cast %55 : vector<1x128x128xbf16> to vector<128x128xbf16>
    %cst_29 = arith.constant dense<0.000000e+00> : vector<512x128xf32>
    %57 = tpu.matmul %54, %56, %cst_29 {dimension_numbers = #tpu.dot_dimension_numbers<[1], [0], [0], [1], [0, 0, 1, 1], [], []>} : vector<512x128xbf16>, vector<128x128xbf16>, vector<512x128xf32> -> vector<512x128xf32>
    %c3_30 = arith.constant 3 : index
    %c0_31 = arith.constant 0 : index
    %c0_32 = arith.constant 0 : index
    %58 = vector.load %arg5[%c3_30, %c0_31, %c0_32] : memref<7x1x128xf32, #tpu.memory_space<vmem>>, vector<1x1x128xf32>
    %59 = vector.shape_cast %58 : vector<1x1x128xf32> to vector<1x128xf32>
    %60 = vector.broadcast %59 : vector<1x128xf32> to vector<512x128xf32>
    %61 = arith.addf %57, %60 : vector<512x128xf32>
    %cst_33 = arith.constant 0.000000e+00 : f32
    %62 = vector.broadcast %cst_33 : f32 to vector<512x128xf32>
    %63 = arith.maximumf %61, %62 : vector<512x128xf32>
    %64 = arith.truncf %63 : vector<512x128xf32> to vector<512x128xbf16>
    %c4 = arith.constant 4 : index
    %c0_34 = arith.constant 0 : index
    %c0_35 = arith.constant 0 : index
    %65 = vector.load %arg4[%c4, %c0_34, %c0_35] : memref<7x128x128xbf16, #tpu.memory_space<vmem>>, vector<1x128x128xbf16>
    %66 = vector.shape_cast %65 : vector<1x128x128xbf16> to vector<128x128xbf16>
    %cst_36 = arith.constant dense<0.000000e+00> : vector<512x128xf32>
    %67 = tpu.matmul %64, %66, %cst_36 {dimension_numbers = #tpu.dot_dimension_numbers<[1], [0], [0], [1], [0, 0, 1, 1], [], []>} : vector<512x128xbf16>, vector<128x128xbf16>, vector<512x128xf32> -> vector<512x128xf32>
    %c4_37 = arith.constant 4 : index
    %c0_38 = arith.constant 0 : index
    %c0_39 = arith.constant 0 : index
    %68 = vector.load %arg5[%c4_37, %c0_38, %c0_39] : memref<7x1x128xf32, #tpu.memory_space<vmem>>, vector<1x1x128xf32>
    %69 = vector.shape_cast %68 : vector<1x1x128xf32> to vector<1x128xf32>
    %70 = vector.broadcast %69 : vector<1x128xf32> to vector<512x128xf32>
    %71 = arith.addf %67, %70 : vector<512x128xf32>
    %cst_40 = arith.constant 0.000000e+00 : f32
    %72 = vector.broadcast %cst_40 : f32 to vector<512x128xf32>
    %73 = arith.maximumf %71, %72 : vector<512x128xf32>
    %74 = arith.truncf %73 : vector<512x128xf32> to vector<512x128xbf16>
    %c5 = arith.constant 5 : index
    %c0_41 = arith.constant 0 : index
    %c0_42 = arith.constant 0 : index
    %75 = vector.load %arg4[%c5, %c0_41, %c0_42] : memref<7x128x128xbf16, #tpu.memory_space<vmem>>, vector<1x128x128xbf16>
    %76 = vector.shape_cast %75 : vector<1x128x128xbf16> to vector<128x128xbf16>
    %cst_43 = arith.constant dense<0.000000e+00> : vector<512x128xf32>
    %77 = tpu.matmul %74, %76, %cst_43 {dimension_numbers = #tpu.dot_dimension_numbers<[1], [0], [0], [1], [0, 0, 1, 1], [], []>} : vector<512x128xbf16>, vector<128x128xbf16>, vector<512x128xf32> -> vector<512x128xf32>
    %c5_44 = arith.constant 5 : index
    %c0_45 = arith.constant 0 : index
    %c0_46 = arith.constant 0 : index
    %78 = vector.load %arg5[%c5_44, %c0_45, %c0_46] : memref<7x1x128xf32, #tpu.memory_space<vmem>>, vector<1x1x128xf32>
    %79 = vector.shape_cast %78 : vector<1x1x128xf32> to vector<1x128xf32>
    %80 = vector.broadcast %79 : vector<1x128xf32> to vector<512x128xf32>
    %81 = arith.addf %77, %80 : vector<512x128xf32>
    %cst_47 = arith.constant 0.000000e+00 : f32
    %82 = vector.broadcast %cst_47 : f32 to vector<512x128xf32>
    %83 = arith.maximumf %81, %82 : vector<512x128xf32>
    %84 = arith.truncf %83 : vector<512x128xf32> to vector<512x128xbf16>
    %c6 = arith.constant 6 : index
    %c0_48 = arith.constant 0 : index
    %c0_49 = arith.constant 0 : index
    %85 = vector.load %arg4[%c6, %c0_48, %c0_49] : memref<7x128x128xbf16, #tpu.memory_space<vmem>>, vector<1x128x128xbf16>
    %86 = vector.shape_cast %85 : vector<1x128x128xbf16> to vector<128x128xbf16>
    %cst_50 = arith.constant dense<0.000000e+00> : vector<512x128xf32>
    %87 = tpu.matmul %84, %86, %cst_50 {dimension_numbers = #tpu.dot_dimension_numbers<[1], [0], [0], [1], [0, 0, 1, 1], [], []>} : vector<512x128xbf16>, vector<128x128xbf16>, vector<512x128xf32> -> vector<512x128xf32>
    %c6_51 = arith.constant 6 : index
    %c0_52 = arith.constant 0 : index
    %c0_53 = arith.constant 0 : index
    %88 = vector.load %arg5[%c6_51, %c0_52, %c0_53] : memref<7x1x128xf32, #tpu.memory_space<vmem>>, vector<1x1x128xf32>
    %89 = vector.shape_cast %88 : vector<1x1x128xf32> to vector<1x128xf32>
    %90 = vector.broadcast %89 : vector<1x128xf32> to vector<512x128xf32>
    %91 = arith.addf %87, %90 : vector<512x128xf32>
    %cst_54 = arith.constant 0.000000e+00 : f32
    %92 = vector.broadcast %cst_54 : f32 to vector<512x128xf32>
    %93 = arith.maximumf %91, %92 : vector<512x128xf32>
    %94 = arith.truncf %93 : vector<512x128xf32> to vector<512x128xbf16>
    %c0_55 = arith.constant 0 : index
    %c0_56 = arith.constant 0 : index
    %95 = vector.load %arg6[%c0_55, %c0_56] : memref<128x3xbf16, #tpu.memory_space<vmem>>, vector<128x3xbf16>
    %cst_57 = arith.constant dense<0.000000e+00> : vector<512x3xf32>
    %96 = tpu.matmul %94, %95, %cst_57 {dimension_numbers = #tpu.dot_dimension_numbers<[1], [0], [0], [1], [0, 0, 1, 1], [], []>} : vector<512x128xbf16>, vector<128x3xbf16>, vector<512x3xf32> -> vector<512x3xf32>
    %c0_58 = arith.constant 0 : index
    %c0_59 = arith.constant 0 : index
    %97 = vector.load %arg7[%c0_58, %c0_59] : memref<1x3xf32, #tpu.memory_space<vmem>>, vector<1x3xf32>
    %98 = vector.broadcast %97 : vector<1x3xf32> to vector<512x3xf32>
    %99 = arith.addf %96, %98 : vector<512x3xf32>
    %c0_60 = arith.constant 0 : index
    %c0_61 = arith.constant 0 : index
    %100 = vector.load %arg8[%c0_60, %c0_61] : memref<512x3xf32, #tpu.memory_space<vmem>>, vector<512x3xf32>
    tpu.vector_store %arg8[%c0_60, %c0_61], %99 {strides = array<i32>} : memref<512x3xf32, #tpu.memory_space<vmem>>, vector<512x3xf32>,
    return
  }
  func.func @transform_0(%arg0: i32) -> (i32, i32) {
    %c0_i32 = arith.constant 0 : i32
    %c0_i32_0 = arith.constant 0 : i32
    return %arg0, %c0_i32 : i32, i32
  }
  func.func @transform_1(%arg0: i32) -> (i32, i32) {
    %c0_i32 = arith.constant 0 : i32
    %c0_i32_0 = arith.constant 0 : i32
    %c0_i32_1 = arith.constant 0 : i32
    return %c0_i32, %c0_i32_0 : i32, i32
  }
  func.func @transform_2(%arg0: i32) -> (i32, i32) {
    %c0_i32 = arith.constant 0 : i32
    %c0_i32_0 = arith.constant 0 : i32
    %c0_i32_1 = arith.constant 0 : i32
    return %c0_i32, %c0_i32_0 : i32, i32
  }
  func.func @transform_3(%arg0: i32) -> (i32, i32, i32) {
    %c0_i32 = arith.constant 0 : i32
    %c0_i32_0 = arith.constant 0 : i32
    %c0_i32_1 = arith.constant 0 : i32
    %c0_i32_2 = arith.constant 0 : i32
    return %c0_i32, %c0_i32_0, %c0_i32_1 : i32, i32, i32
  }
  func.func @transform_4(%arg0: i32) -> (i32, i32, i32) {
    %c0_i32 = arith.constant 0 : i32
    %c0_i32_0 = arith.constant 0 : i32
    %c0_i32_1 = arith.constant 0 : i32
    %c0_i32_2 = arith.constant 0 : i32
    return %c0_i32, %c0_i32_0, %c0_i32_1 : i32, i32, i32
  }
  func.func @transform_5(%arg0: i32) -> (i32, i32) {
    %c0_i32 = arith.constant 0 : i32
    %c0_i32_0 = arith.constant 0 : i32
    %c0_i32_1 = arith.constant 0 : i32
    return %c0_i32, %c0_i32_0 : i32, i32
  }
  func.func @transform_6(%arg0: i32) -> (i32, i32) {
    %c0_i32 = arith.constant 0 : i32
    %c0_i32_0 = arith.constant 0 : i32
    %c0_i32_1 = arith.constant 0 : i32
    return %c0_i32, %c0_i32_0 : i32, i32
  }
  func.func @transform_7(%arg0: i32) -> (i32, i32) {
    %c0_i32 = arith.constant 0 : i32
    %c0_i32_0 = arith.constant 0 : i32
    return %arg0, %c0_i32 : i32, i32
  }
}

</mosaic_0001>

<bundles_post_ra>
// kernel: nsfp_raw_mlp_forward.1
= control target key start
LH: loop header
LB: loop body
LE: loop exit
PB: predicated region body
PF: predicated region fallthrough
CT: control target
= control target key end

     0   :  { %s6705_s24 = smov 0   ;;  %s8523_s0 = inlined_call_operand.vmem [shape: f32[2560,3], index: 0, kind: input, shape index: {}]   ;;  %s8524_s1 = inlined_call_operand.vmem [shape: f32[3,128], index: 1, kind: input, shape index: {}]   ;;  %s8525_s2 = inlined_call_operand.vmem [shape: f32[1,128], index: 2, kind: input, shape index: {}]   ;;  %s8526_s3 = inlined_call_operand.vmem [shape: bf16[7,128,128], index: 3, kind: input, shape index: {}]   ;;  %s8527_s4 = inlined_call_operand.vmem [shape: f32[7,1,128], index: 4, kind: input, shape index: {}]   ;;  %s8528_s5 = inlined_call_operand.vmem [shape: bf16[128,3], index: 5, kind: input, shape index: {}]   ;;  %s8529_s6 = inlined_call_operand.vmem [shape: f32[1,3], index: 6, kind: input, shape index: {}]   ;;  %s8530_s7 = inlined_call_operand.vmem [shape: f32[2560,3], index: 7, kind: output, shape index: {}]  }
   0x1 LB: > { %s5364_s25 = sadd.s32 4294967295, %s6660_s24   ;;  %p5368_p0 = scmp.ge.s32.totalorder %s6660_s24, 1  ;;  %s6660_s24 = sphi %s6705_s24, %s17_s24  }
   0x2   : > { %p238_p1 = scmp.lt.s32.totalorder %s6660_s24, 6 }
   0x4   : > { %p239_p2 = pnand %p5368_p0, %p238_p1 }
   0x6   : > { %242 = sbr.rel (%p239_p2) target bundleno = 2313 (0x909), region = 48 }
   0xb   : > { %s5369_s26 = sshll.u32 %s5364_s25, 6  ;;  %v8535_v0 = vmov 1   ;;  %v8533_v1 = vmov 0   ;;  %v8531_v10 = vmov 2   ;;  %v6574_v51 = vld [vmem:[%s8526_s3 + $0x38] sm:$0xff]   ;;  %v6575_v55 = vld [vmem:[%s8526_s3 + $0x30] sm:$0xff]  }
   0xc   : > { %6522 = vset.pattern.permute.xlu0 %v8535_v0  ;;  %6521 = vset.pattern.permute.xlu1 %v8533_v1  ;;  %p271_p3 = scmp.lt.s32.totalorder %s5369_s26, 319  ;;  %v6576_v59 = vld [vmem:[%s8526_s3 + $0x28] sm:$0xff]   ;;  %v6577_v63 = vld [vmem:[%s8526_s3 + $0x20] sm:$0xff]   ;;  %vm5243_vm0 = vcmask 23552  }
   0xd   : > { %5870 = vmatprep.subr.bf16.mxu0 %v6574_v51 }
   0xe   : > { %s8639_s26 = smov (!%p271_p3, %s5369_s26), 319  ;;  %5871 = vmatpush3.bf16.msra.mxu0 %v6574_v51 }
   0xf   : > { %s5370_s27 = sshll.u32 %s8639_s26, 3  ;;  %5872 = vmatprep.subr.bf16.mxu0 %v6575_v55 }
  0x10   : > { %s6723_s30 = scalar_lea.vmem %s8523_s0, %s5370_s27  ;;  %s8306_s11 = scalar_lea.vmem %s8530_s7, %s5370_s27 }
  0x11   : > { %v285_v2 = vld [vmem:[%s6723_s30 + $0x10] sm:$0xff]  ;;  %v6727_v3 = vld [vmem:[%s6723_s30] sm:$0xff]  ;;  %v286_v4 = vld [vmem:[%s6723_s30 + $0x18] sm:$0xff] }
  0x12   : > { %361 = vperm.xlu1 %6521, %v285_v2   ;;  %808 = vperm.xlu0 %6522, %v6727_v3   ;;  %v288_v5 = vld [vmem:[%s6723_s30 + $0x28] sm:$0xff]  ;;  %v291_v7 = vld [vmem:[%s6723_s30 + $0x40] sm:$0xff]  ;;  %v6739_v8 = vld [vmem:[%s6723_s30 + $0x58] sm:$0xff] }
  0x13   : > { %v6733_v6 = vld [vmem:[%s6723_s30 + $0x8] sm:$0xff]  ;;  %v6749_v11 = vld [vmem:[%s6723_s30 + $0x80] sm:$0xff]  ;;  %v6753_v12 = vld [vmem:[%s6723_s30 + $0x98] sm:$0xff]  ;;  %5873 = vmatpush3.bf16.msra.mxu0 %v6575_v55 }
  0x14   : > { %v6743_v9 = vld [vmem:[%s6723_s30 + $0x68] sm:$0xff]  ;;  %v289_v14 = vld [vmem:[%s6723_s30 + $0x30] sm:$0xff]  ;;  %v6762_v15 = vld [vmem:[%s6723_s30 + $0xc0] sm:$0xff]  ;;  %5874 = vmatprep.subr.bf16.mxu0 %v6576_v59 }
  0x15   : > { %v6756_v13 = vld [vmem:[%s6723_s30 + $0xa8] sm:$0xff]  ;;  %v6766_v16 = vld [vmem:[%s6723_s30 + $0x20] sm:$0xff]  ;;  %v6769_v17 = vld [vmem:[%s6723_s30 + $0xd8] sm:$0xff] }
  0x16   : > { %366 = vperm.xlu1 %6521, %v286_v4   ;;  %820 = vperm.xlu0 %6522, %v286_v4   ;;  %v6774_v18 = vld [vmem:[%s6723_s30 + $0xe8] sm:$0xff]  ;;  %v6779_v19 = vld [vmem:[%s6723_s30 + $0x38] sm:$0xff]  ;;  %v6782_v20 = vld [vmem:[%s6723_s30 + $0x100] sm:$0xff] }
  0x17   : > { %v6786_v21 = vld [vmem:[%s6723_s30 + $0x118] sm:$0xff]  ;;  %v6793_v22 = vld [vmem:[%s6723_s30 + $0x128] sm:$0xff]  ;;  %v6797_v23 = vld [vmem:[%s6723_s30 + $0x140] sm:$0xff]  ;;  %5875 = vmatpush3.bf16.msra.mxu0 %v6576_v59 }
  0x18   : > { %8550 = vst [vmem:[#allocation2_spill] sm:$0xff] %v6797_v23  ;;  %v6802_v24 = vld [vmem:[%s6723_s30 + $0x158] sm:$0xff]  ;;  %v293_v25 = vld [vmem:[%s6723_s30 + $0x50] sm:$0xff]  ;;  %v6810_v26 = vld [vmem:[%s6723_s30 + $0x48] sm:$0xff]  ;;  %5876 = vmatprep.subr.bf16.mxu0 %v6577_v63 }
  0x19   : > { %8551 = vst [vmem:[#allocation3_spill] sm:$0xff] %v6802_v24  ;;  %v6818_v27 = vld [vmem:[%s6723_s30 + $0x60] sm:$0xff]  ;;  %v6823_v28 = vld [vmem:[%s6723_s30 + $0x78] sm:$0xff]  ;;  %v6827_v29 = vld [vmem:[%s6723_s30 + $0x88] sm:$0xff] }
  0x1a   : > { %6523 = vset.pattern.permute.xlu1 %v8535_v0  ;;  %828 = vperm.xlu0 %6522, %v288_v5   ;;  %v6832_v30 = vld [vmem:[%s6723_s30 + $0xa0] sm:$0xff]  ;;  %v297_v31 = vld [vmem:[%s6723_s30 + $0x70] sm:$0xff]  ;;  %v6839_v32 = vld [vmem:[%s6723_s30 + $0xb8] sm:$0xff] }
  0x1b   : > { %812 = vperm.xlu1 %6523, %v6733_v6   ;;  %v6843_v33 = vld [vmem:[%s6723_s30 + $0xc8] sm:$0xff]  ;;  %v6849_v34 = vld [vmem:[%s6723_s30 + $0xe0] sm:$0xff]  ;;  %v6853_v35 = vld [vmem:[%s6723_s30 + $0xf8] sm:$0xff]  ;;  %5877 = vmatpush3.bf16.msra.mxu0 %v6577_v63 }
  0x1c   : > { %v6858_v36 = vld [vmem:[%s6723_s30 + $0x108] sm:$0xff]  ;;  %v6863_v37 = vld [vmem:[%s6723_s30 + $0x120] sm:$0xff]  ;;  %v6868_v38 = vld [vmem:[%s6723_s30 + $0x138] sm:$0xff] }
  0x1d   : > { %8552 = vst [vmem:[#allocation4_spill] sm:$0xff] %v6868_v38  ;;  %v6876_v41 = vld [vmem:[%s6723_s30 + $0x148] sm:$0xff]  ;;  %v301_v44 = vld [vmem:[%s6723_s30 + $0x90] sm:$0xff]  ;;  %v6887_v45 = vld [vmem:[%s6723_s30 + $0x160] sm:$0xff] }
  0x1e   : > { %840 = vperm.xlu0 %6522, %v291_v7   ;;  %8553 = vst [vmem:[#allocation5_spill] sm:$0xff] %v6876_v41  ;;  %v6895_v48 = vld [vmem:[%s6723_s30 + $0x178] sm:$0xff]  ;;  %v6907_v52 = vld [vmem:[%s6723_s30 + $0x188] sm:$0xff]  ;;  %v6920_v56 = vld [vmem:[%s6723_s30 + $0x1a0] sm:$0xff] }
  0x1f   : > { %816 = vperm.xlu1 %6523, %v285_v2   ;;  %v6931_v60 = vld [vmem:[%s6723_s30 + $0x1b8] sm:$0xff] }
  0x22   : > { %852 = vperm.xlu0 %6522, %v6739_v8  }
  0x23   : > { %6524 = vset.pattern.permute.xlu1 %v8531_v10 }
  0x24   : > { %1196 = vperm.xlu1 %6524, %v6727_v3  }
  0x26   : > { %860 = vperm.xlu0 %6522, %v6743_v9  }
  0x28   : > { %1204 = vperm.xlu1 %6524, %v285_v2   ;;  %v6944_v2 = vld [vmem:[%s6723_s30 + $0x1c8] sm:$0xff] }
  0x2a   : > { %872 = vperm.xlu0 %6522, %v6749_v11  }
  0x2c   : > { %1208 = vperm.xlu1 %6524, %v286_v4  }
  0x2e   : > { %884 = vperm.xlu0 %6522, %v6753_v12  }
  0x30   : > { %6525 = vset.pattern.permute.xlu1 %v8533_v1 }
  0x31   : > { %376 = vperm.xlu1 %6525, %v288_v5  }
  0x32   : > { %892 = vperm.xlu0 %6522, %v6756_v13  }
  0x35   : > { %381 = vperm.xlu1 %6525, %v289_v14  }
  0x36   : > { %904 = vperm.xlu0 %6522, %v6762_v15  }
  0x39   : > { %6526 = vset.pattern.permute.xlu1 %v8535_v0 }
  0x3a   : > { %824 = vperm.xlu1 %6526, %v6766_v16   ;;  %916 = vperm.xlu0 %6522, %v6769_v17  }
  0x3e   : > { %832 = vperm.xlu1 %6526, %v289_v14   ;;  %924 = vperm.xlu0 %6522, %v6774_v18  }
  0x42   : > { %836 = vperm.xlu1 %6526, %v6779_v19   ;;  %936 = vperm.xlu0 %6522, %v6782_v20  }
  0x46   : > { %6527 = vset.pattern.permute.xlu1 %v8531_v10  ;;  %948 = vperm.xlu0 %6522, %v6786_v21  }
  0x47   : > { %1216 = vperm.xlu1 %6527, %v288_v5   ;;  %v6578_v5 = vld [vmem:[%s8526_s3 + $0x18] sm:$0xff]  }
  0x48   : > { %5878 = vmatprep.subr.bf16.mxu0 %v6578_v5 }
  0x49   : > { %5879 = vmatpush3.bf16.msra.mxu0 %v6578_v5 }
  0x4a   : > { %956 = vperm.xlu0 %6522, %v6793_v22  }
  0x4b   : > { %1220 = vperm.xlu1 %6527, %v289_v14  }
  0x4e   : > { %968 = vperm.xlu0 %6522, %v6797_v23   ;;  %v313_v23 = vld [vmem:[%s6723_s30 + $0xf0] sm:$0xff] }
  0x4f   : > { %6528 = vset.pattern.permute.xlu1 %v8533_v1 }
  0x50   : > { %391 = vperm.xlu1 %6528, %v291_v7  }
  0x52   : > { %980 = vperm.xlu0 %6522, %v6802_v24  }
  0x54   : > { %401 = vperm.xlu1 %6528, %v293_v25  }
  0x56   : > { %6554 = vset.pattern.permute.xlu0 %v8531_v10 }
  0x57   : > { %1200 = vperm.xlu0 %6554, %v6733_v6  }
  0x58   : > { %406 = vperm.xlu1 %6528, %v6739_v8  }
  0x5b   : > { %1212 = vperm.xlu0 %6554, %v6766_v16  }
  0x5c   : > { %6529 = vset.pattern.permute.xlu1 %v8535_v0 }
  0x5d   : > { %844 = vperm.xlu1 %6529, %v6810_v26  }
  0x5f   : > { %1224 = vperm.xlu0 %6554, %v6779_v19  }
  0x61   : > { %848 = vperm.xlu1 %6529, %v293_v25  }
  0x63   : > { %1232 = vperm.xlu0 %6554, %v6810_v26  }
  0x65   : > { %6530 = vset.pattern.permute.xlu1 %v8531_v10 }
  0x66   : > { %1228 = vperm.xlu1 %6530, %v291_v7  }
  0x67   : > { %1244 = vperm.xlu0 %6554, %v6818_v27  }
  0x6a   : > { %1236 = vperm.xlu1 %6530, %v293_v25   ;;  %v6580_v25 = vld [vmem:[%s8526_s3 + $0x8] sm:$0xff]  }
  0x6b   : > { %1256 = vperm.xlu0 %6554, %v6823_v28  }
  0x6e   : > { %1240 = vperm.xlu1 %6530, %v6739_v8  }
  0x6f   : > { %1264 = vperm.xlu0 %6554, %v6827_v29  }
  0x72   : > { %6531 = vset.pattern.permute.xlu1 %v8533_v1 }
  0x73   : > { %416 = vperm.xlu1 %6531, %v6743_v9   ;;  %1276 = vperm.xlu0 %6554, %v6832_v30  }
  0x77   : > { %421 = vperm.xlu1 %6531, %v297_v31   ;;  %1288 = vperm.xlu0 %6554, %v6839_v32  }
  0x7b   : > { %6532 = vset.pattern.permute.xlu1 %v8535_v0  ;;  %1296 = vperm.xlu0 %6554, %v6843_v33  }
  0x7c   : > { %856 = vperm.xlu1 %6532, %v6818_v27  }
  0x7f   : > { %1308 = vperm.xlu0 %6554, %v6849_v34  }
  0x80   : > { %864 = vperm.xlu1 %6532, %v297_v31  }
  0x83   : > { %1320 = vperm.xlu0 %6554, %v6853_v35  }
  0x84   : > { %868 = vperm.xlu1 %6532, %v6823_v28  }
  0x87   : > { %1328 = vperm.xlu0 %6554, %v6858_v36  }
  0x88   : > { %6533 = vset.pattern.permute.xlu1 %v8531_v10 }
  0x89   : > { %1248 = vperm.xlu1 %6533, %v6743_v9   ;;  %v6579_v9 = vld [vmem:[%s8526_s3 + $0x10] sm:$0xff]  }
  0x8a   : > { %5880 = vmatprep.subr.bf16.mxu0 %v6579_v9 }
  0x8b   : > { %1340 = vperm.xlu0 %6554, %v6863_v37   ;;  %5881 = vmatpush3.bf16.msra.mxu0 %v6579_v9 }
  0x8c   : > { %5882 = vmatprep.subr.bf16.mxu0 %v6580_v25 }
  0x8d   : > { %v6870_v39 = vpop.permute.xlu1 %361  ;;  %1252 = vperm.xlu1 %6533, %v297_v31   ;;  %v6872_v40 = vpop.permute.xlu0 %808 }
  0x8f   : > { %1352 = vperm.xlu0 %6554, %v6868_v38   ;;  %5883 = vmatpush3.bf16.msra.mxu0 %v6580_v25 }
  0x91   : > { %v6878_v42 = vpop.permute.xlu1 %366  ;;  %6534 = vset.pattern.permute.xlu1 %v8533_v1  ;;  %v6881_v43 = vpop.permute.xlu0 %820 }
  0x92   : > { %431 = vperm.xlu1 %6534, %v6749_v11  }
  0x93   : > { %1360 = vperm.xlu0 %6554, %v6876_v41  }
  0x95   : > { %v6889_v46 = vpop.permute.xlu0 %828 }
  0x96   : > { %v6891_v47 = vpop.permute.xlu1 %812  ;;  %441 = vperm.xlu1 %6534, %v301_v44  }
  0x97   : > { %1372 = vperm.xlu0 %6554, %v6887_v45  }
  0x99   : > { %v6897_v49 = vpop.permute.xlu0 %840 }
  0x9a   : > { %v6899_v50 = vpop.permute.xlu1 %816  ;;  %446 = vperm.xlu1 %6534, %v6753_v12  }
  0x9b   : > { %1384 = vperm.xlu0 %6554, %v6895_v48  }
  0x9d   : > { %v6909_v53 = vpop.permute.xlu0 %852 }
  0x9e   : > { %6535 = vset.pattern.permute.xlu1 %v8535_v0 }
  0x9f   : > { %876 = vperm.xlu1 %6535, %v6827_v29   ;;  %v6913_v54 = vpop.permute.xlu1 %1196  ;;  %1392 = vperm.xlu0 %6554, %v6907_v52  }
  0xa1   : > { %v6922_v57 = vpop.permute.xlu0 %860 }
  0xa3   : > { %880 = vperm.xlu1 %6535, %v301_v44   ;;  %v6924_v58 = vpop.permute.xlu1 %1204  ;;  %1404 = vperm.xlu0 %6554, %v6920_v56  }
  0xa5   : > { %v6933_v61 = vpop.permute.xlu0 %872 }
  0xa7   : > { %6536 = vset.pattern.permute.xlu1 %v8531_v10  ;;  %v6936_v62 = vpop.permute.xlu1 %1208  ;;  %1416 = vperm.xlu0 %6554, %v6931_v60  }
  0xa8   : > { %1260 = vperm.xlu1 %6536, %v6749_v11  }
  0xa9   : > { %v6946_v4 = vpop.permute.xlu0 %884 }
  0xab   : > { %1424 = vperm.xlu0 %6554, %v6944_v2  }
  0xac   : > { %1268 = vperm.xlu1 %6536, %v301_v44   ;;  %v6952_v7 = vpop.permute.xlu1 %376  ;;  %v6581_v44 = vld [vmem:[%s8526_s3] sm:$0xff]  }
  0xad   : > { %v6954_v8 = vpop.permute.xlu0 %892  ;;  %5884 = vmatprep.subr.bf16.mxu0 %v6581_v44 }
  0xae   : > { %5885 = vmatpush3.bf16.msra.mxu0 %v6581_v44 }
  0xaf   : > { %6568 = vset.pattern.permute.xlu0 %v8533_v1 }
  0xb0   : > { %1272 = vperm.xlu1 %6536, %v6753_v12   ;;  %v6961_v11 = vpop.permute.xlu1 %381  ;;  %351 = vperm.xlu0 %6568, %v6727_v3   ;;  %v305_v3 = vld [vmem:[%s6723_s30 + $0xb0] sm:$0xff] }
  0xb1   : > { %v6964_v14 = vpop.permute.xlu0 %904 }
  0xb2   : > { %8554 = vst [vmem:[#allocation6_spill] sm:$0xff] %v6964_v14 }
  0xb4   : > { %6537 = vset.pattern.permute.xlu1 %v8533_v1  ;;  %356 = vperm.xlu0 %6568, %v6733_v6  }
  0xb5   : > { %456 = vperm.xlu1 %6537, %v6756_v13   ;;  %v6972_v31 = vpop.permute.xlu1 %824  ;;  %v6974_v12 = vpop.permute.xlu0 %916 }
  0xb6   : > { %8555 = vst [vmem:[#allocation7_spill] sm:$0xff] %v6974_v12 }
  0xb8   : > { %371 = vperm.xlu0 %6568, %v6766_v16  }
  0xb9   : > { %461 = vperm.xlu1 %6537, %v305_v3   ;;  %v6981_v51 = vpop.permute.xlu1 %832  ;;  %v6983_v55 = vpop.permute.xlu0 %924 }
  0xba   : > { %8556 = vst [vmem:[#allocation8_spill] sm:$0xff] %v6983_v55 }
  0xbc   : > { %386 = vperm.xlu0 %6568, %v6779_v19  }
  0xbd   : > { %6538 = vset.pattern.permute.xlu1 %v8535_v0  ;;  %v6987_v6 = vpop.permute.xlu1 %836  ;;  %v6989_v59 = vpop.permute.xlu0 %936 }
  0xbe   : > { %8557 = vst [vmem:[#allocation9_spill] sm:$0xff] %v6989_v59  ;;  %888 = vperm.xlu1 %6538, %v6832_v30  }
  0xc0   : > { %396 = vperm.xlu0 %6568, %v6810_v26  }
  0xc1   : > { %v6993_v16 = vpop.permute.xlu0 %948 }
  0xc2   : > { %8558 = vst [vmem:[#allocation10_spill] sm:$0xff] %v6993_v16  ;;  %896 = vperm.xlu1 %6538, %v305_v3   ;;  %v6995_v63 = vpop.permute.xlu1 %1216  ;;  %v8562_v16 = vmov 2  }
  0xc4   : > { %411 = vperm.xlu0 %6568, %v6818_v27  }
  0xc5   : > { %v6998_v5 = vpop.permute.xlu0 %956 }
  0xc6   : > { %8559 = vst [vmem:[#allocation11_spill] sm:$0xff] %v6998_v5  ;;  %900 = vperm.xlu1 %6538, %v6839_v32   ;;  %v7001_v19 = vpop.permute.xlu1 %1220 }
  0xc8   : > { %426 = vperm.xlu0 %6568, %v6823_v28  }
  0xc9   : > { %v7004_v9 = vpop.permute.xlu0 %968 }
  0xca   : > { %8560 = vst [vmem:[#allocation12_spill] sm:$0xff] %v7004_v9  ;;  %6539 = vset.pattern.permute.xlu1 %v8531_v10 }
  0xcb   : > { %1280 = vperm.xlu1 %6539, %v6756_v13   ;;  %v7008_v26 = vpop.permute.xlu1 %391  ;;  %v309_v13 = vld [vmem:[%s6723_s30 + $0xd0] sm:$0xff] }
  0xcc   : > { %436 = vperm.xlu0 %6568, %v6827_v29  }
  0xcd   : > { %v7011_v27 = vpop.permute.xlu0 %980 }
  0xce   : > { %8561 = vst [vmem:[#allocation13_spill] sm:$0xff] %v7011_v27 }
  0xcf   : > { %1284 = vperm.xlu1 %6539, %v305_v3   ;;  %v7013_v25 = vpop.permute.xlu1 %401 }
  0xd0   : > { %451 = vperm.xlu0 %6568, %v6832_v30  }
  0xd2   : > { %v7016_v44 = vpop.permute.xlu0 %1200 }
  0xd3   : > { %6540 = vset.pattern.permute.xlu1 %v8533_v1  ;;  %v7019_v28 = vpop.permute.xlu1 %406 }
  0xd4   : > { %471 = vperm.xlu1 %6540, %v6762_v15   ;;  %466 = vperm.xlu0 %6568, %v6839_v32  }
  0xd6   : > { %v7024_v10 = vpop.permute.xlu0 %1212 }
  0xd8   : > { %481 = vperm.xlu1 %6540, %v309_v13   ;;  %v7026_v29 = vpop.permute.xlu1 %844  ;;  %476 = vperm.xlu0 %6568, %v6843_v33  }
  0xda   : > { %v7029_v3 = vpop.permute.xlu0 %1224 }
  0xdc   : > { %486 = vperm.xlu1 %6540, %v6769_v17   ;;  %v7032_v30 = vpop.permute.xlu1 %848  ;;  %491 = vperm.xlu0 %6568, %v6849_v34  }
  0xde   : > { %v7035_v1 = vpop.permute.xlu0 %1232 }
  0xe0   : > { %6541 = vset.pattern.permute.xlu1 %v8535_v0  ;;  %506 = vperm.xlu0 %6568, %v6853_v35  }
  0xe1   : > { %908 = vperm.xlu1 %6541, %v6843_v33   ;;  %v7040_v32 = vpop.permute.xlu1 %1228 }
  0xe2   : > { %v7042_v27 = vpop.permute.xlu0 %1244 }
  0xe4   : > { %516 = vperm.xlu0 %6568, %v6858_v36  }
  0xe5   : > { %912 = vperm.xlu1 %6541, %v309_v13   ;;  %v7045_v9 = vpop.permute.xlu1 %1236 }
  0xe6   : > { %v7047_v5 = vpop.permute.xlu0 %1256 }
  0xe8   : > { %531 = vperm.xlu0 %6568, %v6863_v37  }
  0xe9   : > { %6542 = vset.pattern.permute.xlu1 %v8562_v16  ;;  %v7051_v0 = vpop.permute.xlu1 %1240 }
  0xea   : > { %1292 = vperm.xlu1 %6542, %v6762_v15   ;;  %v7054_v33 = vpop.permute.xlu0 %1264  ;;  %v8566_v15 = vmov 0  }
  0xeb   : > { %8563 = vst [vmem:[#allocation14_spill] sm:$0xff] %v7054_v33  ;;  %v347_v33 = vld [vmem:[%s8524_s1] sm:$0x7] }
  0xec   : > { %546 = vperm.xlu0 %6568, %v6868_v38  }
  0xee   : > { %1300 = vperm.xlu1 %6542, %v309_v13   ;;  %v7057_v59 = vpop.permute.xlu1 %416  ;;  %v7059_v55 = vpop.permute.xlu0 %1276 }
  0xef   : > { %8564 = vst [vmem:[#allocation15_spill] sm:$0xff] %v7059_v55 }
  0xf0   : > { %556 = vperm.xlu0 %6568, %v6876_v41  }
  0xf2   : > { %1304 = vperm.xlu1 %6542, %v6769_v17   ;;  %v7063_v12 = vpop.permute.xlu1 %421  ;;  %v7065_v14 = vpop.permute.xlu0 %1288 }
  0xf3   : > { %8565 = vst [vmem:[#allocation16_spill] sm:$0xff] %v7065_v14  ;;  %v8571_v14 = vmov 1  }
  0xf4   : > { %571 = vperm.xlu0 %6568, %v6887_v45  }
  0xf6   : > { %6543 = vset.pattern.permute.xlu1 %v8566_v15  ;;  %v7069_v24 = vpop.permute.xlu0 %1296 }
  0xf7   : > { %8567 = vst [vmem:[#allocation17_spill] sm:$0xff] %v7069_v24  ;;  %496 = vperm.xlu1 %6543, %v6774_v18   ;;  %v7072_v13 = vpop.permute.xlu1 %856 }
  0xf8   : > { %586 = vperm.xlu0 %6568, %v6895_v48  }
  0xfa   : > { %v7076_v41 = vpop.permute.xlu0 %1308 }
  0xfb   : > { %8568 = vst [vmem:[#allocation18_spill] sm:$0xff] %v7076_v41  ;;  %501 = vperm.xlu1 %6543, %v313_v23   ;;  %v7078_v17 = vpop.permute.xlu1 %864 }
  0xfc   : > { %8569 = vst [vmem:[#allocation19_spill] sm:$0xff] %v7078_v17  ;;  %596 = vperm.xlu0 %6568, %v6907_v52  }
  0xfe   : > { %v7081_v45 = vpop.permute.xlu0 %1320 }
  0xff   : > { %8570 = vst [vmem:[#allocation20_spill] sm:$0xff] %v7081_v45  ;;  %6544 = vset.pattern.permute.xlu1 %v8571_v14  ;;  %v7084_v24 = vpop.permute.xlu1 %868 }
 0x100   : > { %920 = vperm.xlu1 %6544, %v6849_v34   ;;  %611 = vperm.xlu0 %6568, %v6920_v56   ;;  %v7100_v34 = vld [vmem:[%s6723_s30 + $0x1e0] sm:$0xff] }
 0x101   : > { %8575 = vst [vmem:[#allocation24_spill] sm:$0xff] %v7100_v34 }
 0x102   : > { %v7088_v48 = vpop.permute.xlu0 %1328 }
 0x103   : > { %8572 = vst [vmem:[#allocation21_spill] sm:$0xff] %v7088_v48  ;;  %v669_v48 = vlaneseq }
 0x104   : > { %928 = vperm.xlu1 %6544, %v313_v23   ;;  %v7090_v41 = vpop.permute.xlu1 %1248  ;;  %626 = vperm.xlu0 %6568, %v6931_v60   ;;  %v7110_v60 = vld [vmem:[%s6723_s30 + $0x1f8] sm:$0xff] }
 0x105   : > { %8577 = vst [vmem:[#allocation26_spill] sm:$0xff] %v7110_v60 }
 0x106   : > { %v7093_v55 = vpop.permute.xlu0 %1340 }
 0x107   : > { %8573 = vst [vmem:[#allocation22_spill] sm:$0xff] %v7093_v55  ;;  %v7120_v55 = vld [vmem:[%s6723_s30 + $0x168] sm:$0xff] }
 0x108   : > { %932 = vperm.xlu1 %6544, %v6853_v35   ;;  %v7096_v52 = vpop.permute.xlu1 %1252  ;;  %636 = vperm.xlu0 %6568, %v6944_v2   ;;  %8581 = vst [vmem:[#allocation30_spill] sm:$0xff] %v7120_v55 }
 0x109   : > { %8574 = vst [vmem:[#allocation23_spill] sm:$0xff] %v7096_v52 }
 0x10a   : > { %v7102_v45 = vpop.permute.xlu0 %1352 }
 0x10b   : > { %8576 = vst [vmem:[#allocation25_spill] sm:$0xff] %v7102_v45 }
 0x10c   : > { %6545 = vset.pattern.permute.xlu1 %v8562_v16  ;;  %651 = vperm.xlu0 %6568, %v7100_v34   ;;  %v7136_v34 = vld [vmem:[%s6723_s30 + $0x180] sm:$0xff] }
 0x10d   : > { %1312 = vperm.xlu1 %6545, %v6774_v18   ;;  %v7107_v56 = vpop.permute.xlu1 %431  ;;  %8586 = vst [vmem:[#allocation35_spill] sm:$0xff] %v7136_v34 }
 0x10e   : > { %v7112_v35 = vpop.permute.xlu0 %1360 }
 0x10f   : > { %8578 = vst [vmem:[#allocation27_spill] sm:$0xff] %v7112_v35 }
 0x110   : > { %666 = vperm.xlu0 %6568, %v7110_v60  }
 0x111   : > { %1316 = vperm.xlu1 %6545, %v313_v23   ;;  %v7115_v2 = vpop.permute.xlu1 %441  ;;  %v317_v23 = vld [vmem:[%s6723_s30 + $0x110] sm:$0xff] }
 0x112   : > { %8579 = vst [vmem:[#allocation28_spill] sm:$0xff] %v7115_v2  ;;  %v7117_v45 = vpop.permute.xlu0 %1372  ;;  %v670_v2 = vshrl.u32 %v669_v48, 7 }
 0x113   : > { %8580 = vst [vmem:[#allocation29_spill] sm:$0xff] %v7117_v45 }
 0x114   : > { %6570 = vset.pattern.permute.xlu0 %v8571_v14  ;;  %v1453_v17 = vsub.s32 2, %v670_v2 }
 0x115   : > { %6546 = vset.pattern.permute.xlu1 %v8566_v15  ;;  %v7124_v18 = vpop.permute.xlu1 %446  ;;  %988 = vperm.xlu0 %6570, %v7120_v55  }
 0x116   : > { %8582 = vst [vmem:[#allocation31_spill] sm:$0xff] %v7124_v18  ;;  %511 = vperm.xlu1 %6546, %v6782_v20   ;;  %v7128_v35 = vpop.permute.xlu0 %1384  ;;  %v1065_v18 = vsub.s32 1, %v670_v2 }
 0x117   : > { %8583 = vst [vmem:[#allocation32_spill] sm:$0xff] %v7128_v35  ;;  %v671_v35 = vsub.s32 0, %v670_v2 }
 0x119   : > { %1000 = vperm.xlu0 %6570, %v7136_v34   ;;  %v7157_v34 = vrot.slane %v347_v33, %v671_v35 }
 0x11a   : > { %521 = vperm.xlu1 %6546, %v317_v23   ;;  %v7131_v60 = vpop.permute.xlu1 %876  ;;  %v7133_v45 = vpop.permute.xlu0 %1392 }
 0x11b   : > { %8584 = vst [vmem:[#allocation33_spill] sm:$0xff] %v7131_v60  ;;  %8585 = vst [vmem:[#allocation34_spill] sm:$0xff] %v7133_v45  ;;  %v7151_v45 = vld [vmem:[%s6723_s30 + $0x198] sm:$0xff]  ;;  %v676_v52 = vmul.f32 %v7157_v34, %v6878_v42  ;;  %v675_v35 = vmul.f32 %v7157_v34, %v6870_v39 }
 0x11c   : > { %8590 = vst [vmem:[#allocation39_spill] sm:$0xff] %v7151_v45 }
 0x11d   : > { %1012 = vperm.xlu0 %6570, %v7151_v45  }
 0x11e   : > { %526 = vperm.xlu1 %6546, %v6786_v21   ;;  %v7140_v55 = vpop.permute.xlu1 %880  ;;  %v7142_v38 = vpop.permute.xlu0 %1404 }
 0x11f   : > { %8587 = vst [vmem:[#allocation36_spill] sm:$0xff] %v7140_v55  ;;  %8588 = vst [vmem:[#allocation37_spill] sm:$0xff] %v7142_v38  ;;  %v7161_v55 = vrot.slane %v347_v33, %v1065_v18 }
 0x121   : > { %v1070_v18 = vmul.f32 %v7161_v55, %v6881_v43 }
 0x122   : > { %6547 = vset.pattern.permute.xlu1 %v8571_v14  ;;  %v7148_v60 = vpop.permute.xlu0 %1416 }
 0x123   : > { %8589 = vst [vmem:[#allocation38_spill] sm:$0xff] %v7148_v60  ;;  %940 = vperm.xlu1 %6547, %v6858_v36   ;;  %v7154_v48 = vpop.permute.xlu1 %1260  ;;  %v7170_v36 = vld [vmem:[%s8525_s2] ss:$0 sm:$0xff] }
 0x124   : > { %8591 = vst [vmem:[#allocation40_spill] sm:$0xff] %v7154_v48  ;;  %v746_v45 = vadd.f32 %v7170_v36, %v676_v52  ;;  %v1069_v48 = vmul.f32 %v7161_v55, %v6899_v50  ;;  %v1072_v50 = vmul.f32 %v7161_v55, %v6889_v46 }
 0x126   : > { %v7159_v38 = vpop.permute.xlu0 %1424 }
 0x127   : > { %8592 = vst [vmem:[#allocation41_spill] sm:$0xff] %v7159_v38  ;;  %944 = vperm.xlu1 %6547, %v317_v23   ;;  %v7165_v60 = vpop.permute.xlu1 %1268  ;;  %v7177_v38 = vrot.slane %v347_v33, %v1453_v17  ;;  %v678_v33 = vmul.f32 %v7157_v34, %v6952_v7  ;;  %v745_v17 = vadd.f32 %v7170_v36, %v675_v35 }
 0x128   : > { %8593 = vst [vmem:[#allocation42_spill] sm:$0xff] %v7165_v60  ;;  %v1067_v60 = vmul.f32 %v7161_v55, %v6872_v40  ;;  %v1068_v40 = vmul.f32 %v7161_v55, %v6891_v47  ;;  %v7207_v47 = vmul.f32 %v7161_v55, %v6909_v53 }
 0x129   : > { %v1458_v43 = vmul.f32 %v7177_v38, %v6936_v62  ;;  %v1075_v62 = vmul.f32 %v7161_v55, %v6897_v49  ;;  %v748_v46 = vadd.f32 %v7170_v36, %v678_v33  ;;  %v7216_v49 = vmul.f32 %v7161_v55, %v6922_v57 }
 0x12a   : > { %v7229_v57 = vmul.f32 %v7161_v55, %v6933_v61  ;;  %v1459_v61 = vmul.f32 %v7177_v38, %v7024_v10  ;;  %v1074_v10 = vmul.f32 %v7161_v55, %v6987_v6  ;;  %v683_v6 = vmul.f32 %v7157_v34, %v7013_v25 }
 0x12b   : > { %6548 = vset.pattern.permute.xlu1 %v8562_v16  ;;  %v7180_v42 = vpop.permute.xlu1 %1272  ;;  %v352_v2 = vpop.permute.xlu0 %351  ;;  %v1133_v16 = vadd.f32 %v1069_v48, %v745_v17  ;;  %v1455_v48 = vmul.f32 %v7177_v38, %v6913_v54  ;;  %v1076_v25 = vmul.f32 %v7161_v55, %v7026_v29 }
 0x12c   : > { %8594 = vst [vmem:[#allocation43_spill] sm:$0xff] %v7180_v42  ;;  %v673_v39 = vmul.f32 %v7157_v34, %v352_v2  ;;  %1324 = vperm.xlu1 %6548, %v6782_v20   ;;  %v1134_v42 = vadd.f32 %v1070_v18, %v746_v45  ;;  %v1457_v20 = vmul.f32 %v7177_v38, %v6924_v58 }
 0x12d   : > { %v679_v58 = vmul.f32 %v7157_v34, %v6961_v11  ;;  %v681_v11 = vmul.f32 %v7157_v34, %v7008_v26  ;;  %v1461_v26 = vmul.f32 %v7177_v38, %v7001_v19  ;;  %v753_v29 = vadd.f32 %v7170_v36, %v683_v6 }
 0x12e   : > { %v743_v52 = vadd.f32 %v7170_v36, %v673_v39  ;;  %v1522_v18 = vadd.f32 %v1458_v43, %v1134_v42  ;;  %v1521_v53 = vadd.f32 %v1457_v20, %v1133_v16  ;;  %v1073_v42 = vmul.f32 %v7161_v55, %v6981_v51 }
 0x12f   : > { %v357_v2 = vpop.permute.xlu0 %356  ;;  %v1460_v39 = vmul.f32 %v7177_v38, %v6995_v63  ;;  %v749_v17 = vadd.f32 %v7170_v36, %v679_v58  ;;  %v1136_v63 = vadd.f32 %v1072_v50, %v748_v46 }
 0x130   : > { %v674_v7 = vmul.f32 %v7157_v34, %v357_v2  ;;  %1332 = vperm.xlu1 %6548, %v317_v23   ;;  %v7203_v35 = vpop.permute.xlu1 %456  ;;  %v1131_v45 = vadd.f32 %v1067_v60, %v743_v52  ;;  %v1456_v60 = vmul.f32 %v7177_v38, %v7016_v44  ;;  %v1586_v51 = vmax.f32 %v1522_v18, 0.0 }
 0x131   : > { %v1071_v52 = vmul.f32 %v7161_v55, %v6972_v31  ;;  %v1585_v2 = vmax.f32 %v1521_v53, 0.0  ;;  %v1462_v53 = vmul.f32 %v7177_v38, %v7029_v3 }
 0x132   : > { %v744_v23 = vadd.f32 %v7170_v36, %v674_v7  ;;  %v1519_v33 = vadd.f32 %v1455_v48, %v1131_v45  ;;  %v1137_v7 = vadd.f32 %v1073_v42, %v749_v17  ;;  %v751_v45 = vadd.f32 %v7170_v36, %v681_v11  ;;  %v7257_v11 = vld [vmem:[%s6723_s30 + $0x130] sm:$0xff] }
 0x133   : > { %v372_v54 = vpop.permute.xlu0 %371  ;;  %v684_v48 = vmul.f32 %v7157_v34, %v7019_v28 }
 0x134   : > { %v677_v43 = vmul.f32 %v7157_v34, %v372_v54  ;;  %1336 = vperm.xlu1 %6548, %v6786_v21   ;;  %v7233_v44 = vpop.permute.xlu1 %461  ;;  %v1132_v16 = vadd.f32 %v1068_v40, %v744_v23  ;;  %v1524_v40 = vadd.f32 %v1460_v39, %v1136_v63  ;;  %v1583_v19 = vmax.f32 %v1519_v33, 0.0 }
 0x135   : > { %v1525_v58 = vadd.f32 %v1461_v26, %v1137_v7  ;;  %v1648_v23 = vpack.c.bf16 %v1586_v51, %v1585_v2  ;;  %v1139_v28 = vadd.f32 %v1075_v62, %v751_v45  ;;  %v686_v51 = vmul.f32 %v7157_v34, %v7057_v59  ;;  %v7275_v59 = vld [vmem:[%s6723_s30 + $0x1a8] sm:$0xff] }
 0x136   : > { %v747_v20 = vadd.f32 %v7170_v36, %v677_v43  ;;  %v1520_v21 = vadd.f32 %v1456_v60, %v1132_v16  ;;  %v1588_v43 = vmax.f32 %v1524_v40, 0.0  ;;  %v1463_v16 = vmul.f32 %v7177_v38, %v7040_v32  ;;  %1020 = vperm.xlu0 %6570, %v7275_v59  }
 0x137   : > { %v387_v18 = vpop.permute.xlu0 %386  ;;  %v1589_v26 = vmax.f32 %v1525_v58, 0.0  ;;  %v1077_v62 = vmul.f32 %v7161_v55, %v7032_v30  ;;  %v1465_v30 = vmul.f32 %v7177_v38, %v7045_v9  ;;  %v1466_v40 = vmul.f32 %v7177_v38, %v7051_v0 }
 0x138   : > { %v1135_v50 = vadd.f32 %v1071_v52, %v747_v20  ;;  %v680_v46 = vmul.f32 %v7157_v34, %v387_v18  ;;  %6549 = vset.pattern.permute.xlu1 %v8566_v15  ;;  %v1584_v31 = vmax.f32 %v1520_v21, 0.0  ;;  %v754_v52 = vadd.f32 %v7170_v36, %v684_v48 }
 0x139   : > { %536 = vperm.xlu1 %6549, %v6793_v22   ;;  %v7251_v60 = vpop.permute.xlu1 %888  ;;  %v1527_v7 = vadd.f32 %v1463_v16, %v1139_v28  ;;  %v756_v18 = vadd.f32 %v7170_v36, %v686_v51  ;;  %v1079_v9 = vmul.f32 %v7161_v55, %v7072_v13  ;;  %v1468_v58 = vmul.f32 %v7177_v38, %v7090_v41 }
 0x13a   : > { %v750_v42 = vadd.f32 %v7170_v36, %v680_v46  ;;  %v1647_v39 = vpack.c.bf16 %v1584_v31, %v1583_v19  ;;  %v1523_v54 = vadd.f32 %v1459_v61, %v1135_v50  ;;  %v1464_v61 = vmul.f32 %v7177_v38, %v7035_v1 }
 0x13b   : > { %v397_v33 = vpop.permute.xlu0 %396  ;;  %v1141_v19 = vadd.f32 %v1077_v62, %v753_v29  ;;  %v1467_v31 = vmul.f32 %v7177_v38, %v7042_v27  ;;  %v7306_v41 = vmul.f32 %v7161_v55, %v6946_v4  ;;  %v687_v16 = vmul.f32 %v7157_v34, %v7063_v12  ;;  %v8597_v29 = vld [vmem:[#allocation31_spill] sm:$0xff] }
 0x13c   : > { %v1138_v3 = vadd.f32 %v1074_v10, %v750_v42  ;;  %v682_v17 = vmul.f32 %v7157_v34, %v397_v33  ;;  %5886 = vmatprep.mubr.bf16.mxu0 %v1647_v39  ;;  %v1587_v63 = vmax.f32 %v1523_v54, 0.0  ;;  %v1142_v10 = vadd.f32 %v7207_v47, %v754_v52 }
 0x13d   : > { %541 = vperm.xlu1 %6549, %v7257_v11   ;;  %v7272_v32 = vpop.permute.xlu1 %896  ;;  %5887 = vmatmul.mubr.bf16.vlgmr.msra.gmra.mxu0 %v1648_v23  ;;  %v1591_v42 = vmax.f32 %v1527_v7, 0.0  ;;  %v1529_v27 = vadd.f32 %v1465_v30, %v1141_v19  ;;  %v689_v47 = vmul.f32 %v7157_v34, %v7107_v56  ;;  %v1144_v54 = vadd.f32 %v7216_v49, %v756_v18  ;;  %v8598_v7 = vld [vmem:[#allocation40_spill] sm:$0xff] }
 0x13e   : > { %v752_v20 = vadd.f32 %v7170_v36, %v682_v17  ;;  %v1649_v21 = vpack.c.bf16 %v1588_v43, %v1587_v63  ;;  %v1526_v2 = vadd.f32 %v1462_v53, %v1138_v3  ;;  %v1530_v39 = vadd.f32 %v1466_v40, %v1142_v10  ;;  %v8595_v63 = vld [vmem:[#allocation19_spill] sm:$0xff]  ;;  %v8599_v40 = vld [vmem:[#allocation14_spill] sm:$0xff]  ;;  %v8601_v19 = vld [vmem:[#allocation4_spill] sm:$0xff] }
 0x13f   : > { %v412_v45 = vpop.permute.xlu0 %411  ;;  %v1082_v56 = vmul.f32 %v7161_v55, %v7084_v24  ;;  %v1532_v49 = vadd.f32 %v1468_v58, %v1144_v54  ;;  %v1470_v17 = vmul.f32 %v7177_v38, %v7047_v5  ;;  %v759_v12 = vadd.f32 %v7170_v36, %v689_v47 }
 0x140   : > { %v1140_v50 = vadd.f32 %v1076_v25, %v752_v20  ;;  %v685_v1 = vmul.f32 %v7157_v34, %v412_v45  ;;  %5890 = vmatprep.mubr.bf16.mxu0 %v1649_v21  ;;  %v1590_v46 = vmax.f32 %v1526_v2, 0.0  ;;  %v1593_v24 = vmax.f32 %v1529_v27, 0.0  ;;  %v8596_v21 = vld [vmem:[#allocation23_spill] sm:$0xff] }
 0x141   : > { %6550 = vset.pattern.permute.xlu1 %v8571_v14  ;;  %v7294_v0 = vpop.permute.xlu1 %900  ;;  %v757_v20 = vadd.f32 %v7170_v36, %v687_v16  ;;  %v1469_v2 = vmul.f32 %v7177_v38, %v8596_v21  ;;  %v692_v5 = vmul.f32 %v7157_v34, %v8597_v29  ;;  %v1471_v30 = vmul.f32 %v7177_v38, %v8598_v7 }
 0x142   : > { %v755_v48 = vadd.f32 %v7170_v36, %v685_v1  ;;  %952 = vperm.xlu1 %6550, %v6863_v37   ;;  %v1650_v23 = vpack.c.bf16 %v1590_v46, %v1589_v26  ;;  %v1528_v53 = vadd.f32 %v1464_v61, %v1140_v50  ;;  %v7310_v37 = vmul.f32 %v7161_v55, %v6954_v8  ;;  %v8600_v50 = vld [vmem:[#allocation33_spill] sm:$0xff] }
 0x143   : > { %v427_v13 = vpop.permute.xlu0 %426  ;;  %v1594_v8 = vmax.f32 %v1530_v39, 0.0  ;;  %v1081_v26 = vmul.f32 %v7161_v55, %v8595_v63  ;;  %v1472_v45 = vmul.f32 %v7177_v38, %v8599_v40  ;;  %v1596_v18 = vmax.f32 %v1532_v49, 0.0 }
 0x144   : > { %v1143_v43 = vadd.f32 %v1079_v9, %v755_v48  ;;  %v688_v6 = vmul.f32 %v7157_v34, %v427_v13  ;;  %v1592_v28 = vmax.f32 %v1528_v53, 0.0  ;;  %v1084_v1 = vmul.f32 %v7161_v55, %v8600_v50  ;;  %v8602_v13 = vld [vmem:[#allocation28_spill] sm:$0xff] }
 0x145   : > { %5891 = vmatmul.mubr.bf16.gmra.mxu0 %v1650_v23  ;;  %v1145_v10 = vadd.f32 %v1081_v26, %v757_v20  ;;  %v1147_v9 = vadd.f32 %v7229_v57, %v759_v12  ;;  %v1652_v48 = vpack.c.bf16 %v1594_v8, %v1593_v24  ;;  %v694_v53 = vmul.f32 %v7157_v34, %v7203_v35 }
 0x146   : > { %v758_v33 = vadd.f32 %v7170_v36, %v688_v6  ;;  %960 = vperm.xlu1 %6550, %v7257_v11   ;;  %v1281_v51 = vpop.permute.xlu1 %1280  ;;  %v1651_v3 = vpack.c.bf16 %v1592_v28, %v1591_v42  ;;  %v1531_v4 = vadd.f32 %v1467_v31, %v1143_v43  ;;  %v691_v54 = vmul.f32 %v7157_v34, %v8602_v13 }
 0x147   : > { %v437_v52 = vpop.permute.xlu0 %436  ;;  %v1533_v47 = vadd.f32 %v1469_v2, %v1145_v10  ;;  %v762_v43 = vadd.f32 %v7170_v36, %v692_v5  ;;  %v1535_v6 = vadd.f32 %v1471_v30, %v1147_v9  ;;  %v1087_v57 = vmul.f32 %v7161_v55, %v7251_v60 }
 0x148   : > { %v1146_v25 = vadd.f32 %v1082_v56, %v758_v33  ;;  %v690_v62 = vmul.f32 %v7157_v34, %v437_v52  ;;  %5894 = vmatprep.mubr.bf16.mxu0 %v1651_v3  ;;  %v1595_v61 = vmax.f32 %v1531_v4, 0.0  ;;  %v8603_v16 = vmov 2   ;;  %v8604_v56 = vld [vmem:[#allocation15_spill] sm:$0xff]  ;;  %v8605_v33 = vld [vmem:[#allocation36_spill] sm:$0xff] }
 0x149   : > { %v1475_v49 = vmul.f32 %v7177_v38, %v8604_v56  ;;  %v1085_v3 = vmul.f32 %v7161_v55, %v8605_v33  ;;  %v8606_v4 = vld [vmem:[#allocation43_spill] sm:$0xff]  ;;  %v764_v26 = vadd.f32 %v7170_v36, %v694_v53  ;;  %v1150_v21 = vadd.f32 %v7306_v41, %v762_v43 }
 0x14a   : > { %v760_v46 = vadd.f32 %v7170_v36, %v690_v62  ;;  %964 = vperm.xlu1 %6550, %v8601_v19   ;;  %v7337_v31 = vpop.permute.xlu1 %1284  ;;  %v1534_v23 = vadd.f32 %v1470_v17, %v1146_v25  ;;  %v1653_v39 = vpack.c.bf16 %v1596_v18, %v1595_v61  ;;  %v1474_v17 = vmul.f32 %v7177_v38, %v8606_v4  ;;  %v8607_v61 = vld [vmem:[#allocation42_spill] sm:$0xff]  ;;  %v8608_v19 = vld [vmem:[#allocation16_spill] sm:$0xff]  ;;  %v8610_v33 = vld [vmem:[#allocation3_spill] sm:$0xff] }
 0x14b   : > { %v452_v58 = vpop.permute.xlu0 %451  ;;  %v1597_v25 = vmax.f32 %v1533_v47, 0.0  ;;  %v761_v62 = vadd.f32 %v7170_v36, %v691_v54  ;;  %v1473_v20 = vmul.f32 %v7177_v38, %v8607_v61  ;;  %v1599_v2 = vmax.f32 %v1535_v6, 0.0  ;;  %v7402_v61 = vld [vmem:[%s6723_s30 + $0x1d8] sm:$0xff] }
 0x14c   : > { %v1148_v42 = vadd.f32 %v1084_v1, %v760_v46  ;;  %v693_v27 = vmul.f32 %v7157_v34, %v452_v58  ;;  %v1598_v60 = vmax.f32 %v1534_v23, 0.0  ;;  %v1538_v5 = vadd.f32 %v1474_v17, %v1150_v21  ;;  %v8611_v17 = vld [vmem:[#allocation6_spill] sm:$0xff] }
 0x14d   : > { %5895 = vmatmul.mubr.bf16.gmra.mxu0 %v1652_v48  ;;  %v1149_v29 = vadd.f32 %v1085_v3, %v761_v62  ;;  %v695_v46 = vmul.f32 %v7157_v34, %v7233_v44  ;;  %v1090_v41 = vmul.f32 %v7161_v55, %v7294_v0  ;;  %v8609_v48 = vld [vmem:[#allocation2_spill] sm:$0xff] }
 0x14e   : > { %v763_v28 = vadd.f32 %v7170_v36, %v693_v27  ;;  %6551 = vset.pattern.permute.xlu1 %v8603_v16  ;;  %5898 = vmatprep.mubr.bf16.mxu0 %v1653_v39  ;;  %v1536_v35 = vadd.f32 %v1472_v45, %v1148_v42  ;;  %v1654_v40 = vpack.c.bf16 %v1598_v60, %v1597_v25  ;;  %v1602_v10 = vmax.f32 %v1538_v5, 0.0  ;;  %v7381_v27 = vld [vmem:[%s6723_s30 + $0x150] sm:$0xff]  ;;  %v8612_v60 = vld [vmem:[#allocation17_spill] sm:$0xff] }
 0x14f   : > { %1344 = vperm.xlu1 %6551, %v6793_v22   ;;  %v472_v8 = vpop.permute.xlu1 %471  ;;  %v467_v63 = vpop.permute.xlu0 %466  ;;  %v1476_v22 = vmul.f32 %v7177_v38, %v1281_v51  ;;  %v1152_v45 = vadd.f32 %v7310_v37, %v764_v26  ;;  %v1537_v1 = vadd.f32 %v1473_v20, %v1149_v29  ;;  %v1089_v37 = vmul.f32 %v7161_v55, %v7272_v32  ;;  %v8613_v25 = vld [vmem:[#allocation5_spill] sm:$0xff] }
 0x150   : > { %v1151_v12 = vadd.f32 %v1087_v57, %v763_v28  ;;  %v696_v52 = vmul.f32 %v7157_v34, %v467_v63  ;;  %v1600_v24 = vmax.f32 %v1536_v35, 0.0  ;;  %v765_v53 = vadd.f32 %v7170_v36, %v695_v46  ;;  %v7386_v57 = vld [vmem:[%s6723_s30 + $0x1c0] sm:$0xff] }
 0x151   : > { %v1540_v51 = vadd.f32 %v1476_v22, %v1152_v45  ;;  %v1601_v23 = vmax.f32 %v1537_v1, 0.0  ;;  %v1477_v42 = vmul.f32 %v7177_v38, %v7337_v31  ;;  %1032 = vperm.xlu0 %6570, %v7386_v57   ;;  %v697_v31 = vmul.f32 %v7157_v34, %v472_v8 }
 0x152   : > { %v766_v7 = vadd.f32 %v7170_v36, %v696_v52  ;;  %v1655_v18 = vpack.c.bf16 %v1600_v24, %v1599_v2  ;;  %v1539_v50 = vadd.f32 %v1475_v49, %v1151_v12  ;;  %v1153_v47 = vadd.f32 %v1089_v37, %v765_v53 }
 0x153   : > { %1348 = vperm.xlu1 %6551, %v7257_v11   ;;  %v482_v30 = vpop.permute.xlu1 %481  ;;  %v1478_v11 = vmul.f32 %v7177_v38, %v8608_v19  ;;  %v477_v44 = vpop.permute.xlu0 %476  ;;  %v1604_v39 = vmax.f32 %v1540_v51, 0.0  ;;  %v1656_v13 = vpack.c.bf16 %v1602_v10, %v1601_v23  ;;  %v1091_v63 = vmul.f32 %v7161_v55, %v8611_v17 }
 0x154   : > { %v1154_v9 = vadd.f32 %v1090_v41, %v766_v7  ;;  %v1603_v0 = vmax.f32 %v1539_v50, 0.0  ;;  %v698_v32 = vmul.f32 %v7157_v34, %v477_v44  ;;  %v1541_v28 = vadd.f32 %v1477_v42, %v1153_v47  ;;  %v8614_v7 = vld [vmem:[#allocation7_spill] sm:$0xff]  ;;  %v6582_v41 = vld [vmem:[%s8526_s3 + $0x78] sm:$0xff]   ;;  %v6583_v44 = vld [vmem:[%s8526_s3 + $0x70] sm:$0xff]  }
 0x155   : > { %5899 = vmatmul.mubr.bf16.gmra.mxu0 %v1654_v40  ;;  %v1480_v26 = vmul.f32 %v7177_v38, %v8612_v60  ;;  %v767_v12 = vadd.f32 %v7170_v36, %v697_v31  ;;  %v699_v24 = vmul.f32 %v7157_v34, %v482_v30  ;;  %1044 = vperm.xlu0 %6570, %v7402_v61   ;;  %v6584_v42 = vld [vmem:[%s8526_s3 + $0x68] sm:$0xff]   ;;  %v329_v31 = vld [vmem:[%s6723_s30 + $0x170] sm:$0xff] }
 0x156   : > { %5902 = vmatprep.mubr.bf16.mxu0 %v1655_v18  ;;  %v1542_v54 = vadd.f32 %v1478_v11, %v1154_v9  ;;  %v1657_v6 = vpack.c.bf16 %v1604_v39, %v1603_v0  ;;  %v768_v35 = vadd.f32 %v7170_v36, %v698_v32  ;;  %v1605_v4 = vmax.f32 %v1541_v28, 0.0  ;;  %5950 = vmatprep.subr.bf16.mxu1 %v6582_v41  ;;  %v6639_v32 = vld [vmem:[%s6723_s30 + $0x158] sm:$0xff] }
 0x157   : > { %6552 = vset.pattern.permute.xlu1 %v8566_v15  ;;  %v487_v58 = vpop.permute.xlu1 %486  ;;  %v1155_v2 = vadd.f32 %v1091_v63, %v767_v12  ;;  %v1094_v30 = vmul.f32 %v7161_v55, %v8614_v7  ;;  %v769_v40 = vadd.f32 %v7170_v36, %v699_v24  ;;  %5951 = vmatpush3.bf16.msra.mxu1 %v6582_v41  ;;  %v6588_v12 = vld [vmem:[%s8526_s3 + $0x48] sm:$0xff]  }
 0x158   : > { %551 = vperm.xlu1 %6552, %v8609_v48   ;;  %v1606_v49 = vmax.f32 %v1542_v54, 0.0  ;;  %v700_v20 = vmul.f32 %v7157_v34, %v487_v58  ;;  %v6638_v58 = vld [vmem:[%s6723_s30 + $0x140] sm:$0xff]  ;;  %5952 = vmatprep.subr.bf16.mxu1 %v6583_v44 }
 0x159   : > { %v6585_v54 = vld [vmem:[%s8526_s3 + $0x60] sm:$0xff]  }
 0x15a   : > { %v1658_v52 = vpack.c.bf16 %v1606_v49, %v1605_v4  ;;  %v770_v18 = vadd.f32 %v7170_v36, %v700_v20  ;;  %v8617_v4 = vld [vmem:[#allocation26_spill] sm:$0xff] }
 0x15b   : > { %5953 = vmatpush3.bf16.msra.mxu1 %v6583_v44 }
 0x15c   : > { %561 = vperm.xlu1 %6552, %v7381_v27   ;;  %v909_v43 = vpop.permute.xlu1 %908  ;;  %v1158_v37 = vadd.f32 %v1094_v30, %v770_v18  ;;  %5954 = vmatprep.subr.bf16.mxu1 %v6584_v42  ;;  %v8620_v30 = vld [vmem:[#allocation20_spill] sm:$0xff] }
 0x15d   : > { %5903 = vmatmul.mubr.bf16.gmra.mxu0 %v1656_v13  ;;  %v1092_v56 = vmul.f32 %v7161_v55, %v909_v43  ;;  %v7429_v13 = vld [vmem:[%s6723_s30 + $0x1e8] sm:$0xff]  ;;  %v6586_v43 = vld [vmem:[%s8526_s3 + $0x58] sm:$0xff]  }
 0x15e   : > { %5906 = vmatprep.mubr.bf16.mxu0 %v1657_v6  ;;  %1052 = vperm.xlu0 %6570, %v7429_v13   ;;  %v8615_v6 = vld [vmem:[#allocation30_spill] sm:$0xff] }
 0x15f   : > { %v1156_v8 = vadd.f32 %v1092_v56, %v768_v35  ;;  %5955 = vmatpush3.bf16.msra.mxu1 %v6584_v42  ;;  %v8616_v35 = vld [vmem:[#allocation24_spill] sm:$0xff] }
 0x160   : > { %566 = vperm.xlu1 %6552, %v8610_v33   ;;  %v913_v3 = vpop.permute.xlu1 %912  ;;  %5956 = vmatprep.subr.bf16.mxu1 %v6585_v54  ;;  %v6587_v33 = vld [vmem:[%s8526_s3 + $0x50] sm:$0xff]  }
 0x161   : > { %v1544_v21 = vadd.f32 %v1480_v26, %v1156_v8  ;;  %v1093_v29 = vmul.f32 %v7161_v55, %v913_v3 }
 0x162   : > { %6572 = vset.pattern.permute.xlu0 %v8603_v16 }
 0x163   : > { %v1608_v46 = vmax.f32 %v1544_v21, 0.0  ;;  %v1157_v51 = vadd.f32 %v1093_v29, %v769_v40  ;;  %5957 = vmatpush3.bf16.msra.mxu1 %v6585_v54  ;;  %1436 = vperm.xlu0 %6572, %v8616_v35   ;;  %v6589_v29 = vld [vmem:[%s8526_s3 + $0x40] sm:$0xff]   ;;  %v1486_v40 = vmul.f32 %v7177_v38, %v8620_v30 }
 0x164   : > { %6553 = vset.pattern.permute.xlu1 %v8571_v14  ;;  %5958 = vmatprep.subr.bf16.mxu1 %v6586_v43 }
 0x165   : > { %972 = vperm.xlu1 %6553, %v8613_v25   ;;  %v1293_v62 = vpop.permute.xlu1 %1292  ;;  %5907 = vmatmul.mubr.bf16.gmra.mxu0 %v1658_v52  ;;  %v8618_v52 = vld [vmem:[#allocation18_spill] sm:$0xff] }
 0x166   : > { %v1479_v22 = vmul.f32 %v7177_v38, %v1293_v62  ;;  %v1483_v24 = vmul.f32 %v7177_v38, %v8618_v52  ;;  %v6640_v25 = vld [vmem:[%s6723_s30 + $0x160] sm:$0xff]  ;;  %v6642_v52 = vld [vmem:[%s6723_s30 + $0x188] sm:$0xff] }
 0x167   : > { %5959 = vmatpush3.bf16.msra.mxu1 %v6586_v43  ;;  %1448 = vperm.xlu0 %6572, %v8617_v4   ;;  %v8621_v43 = vld [vmem:[#allocation35_spill] sm:$0xff]  ;;  %v8623_v4 = vld [vmem:[#allocation21_spill] sm:$0xff] }
 0x168   : > { %v1543_v5 = vadd.f32 %v1479_v22, %v1155_v2  ;;  %5960 = vmatprep.subr.bf16.mxu1 %v6587_v33 }
 0x169   : > { %976 = vperm.xlu1 %6553, %v7381_v27   ;;  %v1301_v45 = vpop.permute.xlu1 %1300 }
 0x16a   : > { %v1607_v50 = vmax.f32 %v1543_v5, 0.0  ;;  %v1481_v1 = vmul.f32 %v7177_v38, %v1301_v45  ;;  %v8619_v5 = vld [vmem:[#allocation8_spill] sm:$0xff] }
 0x16b   : > { %5961 = vmatpush3.bf16.msra.mxu1 %v6587_v33  ;;  %v1096_v7 = vmul.f32 %v7161_v55, %v8619_v5  ;;  %v8622_v33 = vld [vmem:[#allocation39_spill] sm:$0xff] }
 0x16c   : > { %v1659_v19 = vpack.c.bf16 %v1608_v46, %v1607_v50  ;;  %v1545_v10 = vadd.f32 %v1481_v1, %v1157_v51  ;;  %5962 = vmatprep.subr.bf16.mxu1 %v6588_v12 }
 0x16d   : > { %6555 = vset.pattern.permute.xlu1 %v8603_v16  ;;  %v1305_v11 = vpop.permute.xlu1 %1304 }
 0x16e   : > { %v1482_v9 = vmul.f32 %v7177_v38, %v1305_v11  ;;  %1356 = vperm.xlu1 %6555, %v6638_v58   ;;  %5910 = vmatprep.mubr.bf16.mxu0 %v1659_v19  ;;  %v1609_v0 = vmax.f32 %v1545_v10, 0.0  ;;  %v6641_v10 = vld [vmem:[%s6723_s30 + $0x178] sm:$0xff] }
 0x16f   : > { %5963 = vmatpush3.bf16.msra.mxu1 %v6588_v12 }
 0x170   : > { %v1546_v48 = vadd.f32 %v1482_v9, %v1158_v37  ;;  %5964 = vmatprep.subr.bf16.mxu1 %v6589_v29 }
 0x172   : > { %v1610_v23 = vmax.f32 %v1546_v48, 0.0  ;;  %1364 = vperm.xlu1 %6555, %v7381_v27   ;;  %v497_v53 = vpop.permute.xlu1 %496  ;;  %v492_v27 = vpop.permute.xlu0 %491 }
 0x173   : > { %v701_v56 = vmul.f32 %v7157_v34, %v492_v27  ;;  %v702_v17 = vmul.f32 %v7157_v34, %v497_v53  ;;  %5965 = vmatpush3.bf16.msra.mxu1 %v6589_v29 }
 0x174   : > { %v1660_v39 = vpack.c.bf16 %v1610_v23, %v1609_v0 }
 0x175   : > { %v771_v63 = vadd.f32 %v7170_v36, %v701_v56  ;;  %v772_v62 = vadd.f32 %v7170_v36, %v702_v17  ;;  %v1488_v17 = vmul.f32 %v7177_v38, %v8623_v4 }
 0x176   : > { %1368 = vperm.xlu1 %6555, %v6639_v32   ;;  %v502_v47 = vpop.permute.xlu1 %501  ;;  %5911 = vmatmul.mubr.bf16.gmra.mxu0 %v1660_v39  ;;  %v507_v49 = vpop.permute.xlu0 %506 }
 0x177   : > { %v704_v26 = vmul.f32 %v7157_v34, %v507_v49  ;;  %v703_v22 = vmul.f32 %v7157_v34, %v502_v47  ;;  %v1160_v46 = vadd.f32 %v1096_v7, %v772_v62 }
 0x179   : > { %v774_v21 = vadd.f32 %v7170_v36, %v704_v26  ;;  %v773_v51 = vadd.f32 %v7170_v36, %v703_v22  ;;  %v8624_v26 = vld [vmem:[#allocation9_spill] sm:$0xff] }
 0x17a   : > { %6556 = vset.pattern.permute.xlu1 %v8566_v15  ;;  %v517_v27 = vpop.permute.xlu0 %516  ;;  %v1099_v12 = vmul.f32 %v7161_v55, %v8624_v26 }
 0x17b   : > { %576 = vperm.xlu1 %6556, %v8615_v6   ;;  %v921_v28 = vpop.permute.xlu1 %920  ;;  %v706_v35 = vmul.f32 %v7157_v34, %v517_v27 }
 0x17c   : > { %v1095_v60 = vmul.f32 %v7161_v55, %v921_v28  ;;  %v333_v28 = vld [vmem:[%s6723_s30 + $0x190] sm:$0xff] }
 0x17d   : > { %v776_v49 = vadd.f32 %v7170_v36, %v706_v35  ;;  %v6643_v35 = vld [vmem:[%s6723_s30 + $0x1a0] sm:$0xff] }
 0x17e   : > { %v1159_v20 = vadd.f32 %v1095_v60, %v771_v63 }
 0x17f   : > { %581 = vperm.xlu1 %6556, %v329_v31   ;;  %v929_v3 = vpop.permute.xlu1 %928 }
 0x180   : > { %v1097_v45 = vmul.f32 %v7161_v55, %v929_v3  ;;  %v1547_v50 = vadd.f32 %v1483_v24, %v1159_v20 }
 0x182   : > { %v1161_v11 = vadd.f32 %v1097_v45, %v773_v51  ;;  %v1611_v48 = vmax.f32 %v1547_v50, 0.0 }
 0x183   : > { %6557 = vset.pattern.permute.xlu1 %v8571_v14  ;;  %v933_v8 = vpop.permute.xlu1 %932 }
 0x184   : > { %984 = vperm.xlu1 %6557, %v6640_v25   ;;  %v1098_v2 = vmul.f32 %v7161_v55, %v933_v8 }
 0x186   : > { %v1162_v1 = vadd.f32 %v1098_v2, %v774_v21 }
 0x188   : > { %992 = vperm.xlu1 %6557, %v329_v31   ;;  %v1313_v18 = vpop.permute.xlu1 %1312  ;;  %v1550_v9 = vadd.f32 %v1486_v40, %v1162_v1 }
 0x189   : > { %v1484_v41 = vmul.f32 %v7177_v38, %v1313_v18  ;;  %v8625_v18 = vld [vmem:[#allocation10_spill] sm:$0xff] }
 0x18a   : > { %v1614_v39 = vmax.f32 %v1550_v9, 0.0  ;;  %v1102_v50 = vmul.f32 %v7161_v55, %v8625_v18 }
 0x18b   : > { %v1548_v19 = vadd.f32 %v1484_v41, %v1160_v46 }
 0x18c   : > { %996 = vperm.xlu1 %6557, %v6641_v10   ;;  %v1317_v37 = vpop.permute.xlu1 %1316 }
 0x18d   : > { %v1612_v58 = vmax.f32 %v1548_v19, 0.0  ;;  %v1485_v44 = vmul.f32 %v7177_v38, %v1317_v37 }
 0x18f   : > { %v1549_v0 = vadd.f32 %v1485_v44, %v1161_v11  ;;  %v1661_v23 = vpack.c.bf16 %v1612_v58, %v1611_v48 }
 0x190   : > { %6558 = vset.pattern.permute.xlu1 %v8603_v16 }
 0x191   : > { %v1613_v53 = vmax.f32 %v1549_v0, 0.0  ;;  %1376 = vperm.xlu1 %6558, %v8615_v6   ;;  %v512_v42 = vpop.permute.xlu1 %511  ;;  %5914 = vmatprep.mubr.bf16.mxu0 %v1661_v23  ;;  %v532_v0 = vpop.permute.xlu0 %531 }
 0x192   : > { %v705_v6 = vmul.f32 %v7157_v34, %v512_v42  ;;  %v709_v42 = vmul.f32 %v7157_v34, %v532_v0 }
 0x193   : > { %v1662_v32 = vpack.c.bf16 %v1614_v39, %v1613_v53  ;;  %v337_v53 = vld [vmem:[%s6723_s30 + $0x1b0] sm:$0xff] }
 0x194   : > { %v775_v63 = vadd.f32 %v7170_v36, %v705_v6 }
 0x195   : > { %1380 = vperm.xlu1 %6558, %v329_v31   ;;  %v522_v47 = vpop.permute.xlu1 %521  ;;  %5915 = vmatmul.mubr.bf16.gmra.mxu0 %v1662_v32  ;;  %v547_v39 = vpop.permute.xlu0 %546 }
 0x196   : > { %v707_v8 = vmul.f32 %v7157_v34, %v522_v47  ;;  %v1163_v20 = vadd.f32 %v1099_v12, %v775_v63 }
 0x198   : > { %v777_v29 = vadd.f32 %v7170_v36, %v707_v8 }
 0x199   : > { %6559 = vset.pattern.permute.xlu1 %v8566_v15  ;;  %v527_v54 = vpop.permute.xlu1 %526 }
 0x19a   : > { %591 = vperm.xlu1 %6559, %v8621_v43   ;;  %v708_v25 = vmul.f32 %v7157_v34, %v527_v54  ;;  %v779_v54 = vadd.f32 %v7170_v36, %v709_v42 }
 0x19c   : > { %v778_v7 = vadd.f32 %v7170_v36, %v708_v25 }
 0x19e   : > { %601 = vperm.xlu1 %6559, %v333_v28   ;;  %v941_v56 = vpop.permute.xlu1 %940  ;;  %v1166_v19 = vadd.f32 %v1102_v50, %v778_v7 }
 0x19f   : > { %v1100_v31 = vmul.f32 %v7161_v55, %v941_v56 }
 0x1a1   : > { %v1164_v60 = vadd.f32 %v1100_v31, %v776_v49 }
 0x1a2   : > { %606 = vperm.xlu1 %6559, %v8622_v33   ;;  %v945_v3 = vpop.permute.xlu1 %944 }
 0x1a3   : > { %v1552_v62 = vadd.f32 %v1488_v17, %v1164_v60  ;;  %v1101_v2 = vmul.f32 %v7161_v55, %v945_v3  ;;  %v8626_v3 = vld [vmem:[#allocation11_spill] sm:$0xff]  ;;  %v8627_v17 = vld [vmem:[#allocation22_spill] sm:$0xff] }
 0x1a4   : > { %v1104_v4 = vmul.f32 %v7161_v55, %v8626_v3  ;;  %v1491_v63 = vmul.f32 %v7177_v38, %v8627_v17 }
 0x1a5   : > { %v1616_v45 = vmax.f32 %v1552_v62, 0.0  ;;  %v1165_v1 = vadd.f32 %v1101_v2, %v777_v29  ;;  %v8628_v62 = vld [vmem:[#allocation25_spill] sm:$0xff] }
 0x1a6   : > { %6560 = vset.pattern.permute.xlu1 %v8571_v14 }
 0x1a7   : > { %1004 = vperm.xlu1 %6560, %v6642_v52   ;;  %v1325_v24 = vpop.permute.xlu1 %1324 }
 0x1a8   : > { %v1487_v21 = vmul.f32 %v7177_v38, %v1325_v24 }
 0x1aa   : > { %v1551_v22 = vadd.f32 %v1487_v21, %v1163_v20  ;;  %v1494_v20 = vmul.f32 %v7177_v38, %v8628_v62 }
 0x1ab   : > { %1008 = vperm.xlu1 %6560, %v333_v28   ;;  %v1333_v5 = vpop.permute.xlu1 %1332 }
 0x1ac   : > { %v1615_v30 = vmax.f32 %v1551_v22, 0.0  ;;  %v1489_v40 = vmul.f32 %v7177_v38, %v1333_v5  ;;  %v6644_v22 = vld [vmem:[%s6723_s30 + $0x1b8] sm:$0xff] }
 0x1ae   : > { %v1663_v46 = vpack.c.bf16 %v1616_v45, %v1615_v30  ;;  %v1553_v51 = vadd.f32 %v1489_v40, %v1165_v1  ;;  %v557_v45 = vpop.permute.xlu0 %556 }
 0x1af   : > { %6561 = vset.pattern.permute.xlu1 %v8603_v16  ;;  %v1337_v41 = vpop.permute.xlu1 %1336 }
 0x1b0   : > { %v1490_v11 = vmul.f32 %v7177_v38, %v1337_v41  ;;  %1388 = vperm.xlu1 %6561, %v8621_v43   ;;  %5918 = vmatprep.mubr.bf16.mxu0 %v1663_v46  ;;  %v1617_v37 = vmax.f32 %v1553_v51, 0.0  ;;  %v712_v43 = vmul.f32 %v7157_v34, %v547_v39 }
 0x1b2   : > { %v1554_v10 = vadd.f32 %v1490_v11, %v1166_v19  ;;  %v782_v49 = vadd.f32 %v7170_v36, %v712_v43  ;;  %v7532_v19 = vpop.permute.xlu0 %571 }
 0x1b4   : > { %v1618_v9 = vmax.f32 %v1554_v10, 0.0  ;;  %1396 = vperm.xlu1 %6561, %v333_v28   ;;  %v537_v58 = vpop.permute.xlu1 %536 }
 0x1b5   : > { %v710_v47 = vmul.f32 %v7157_v34, %v537_v58  ;;  %v714_v58 = vmul.f32 %v7157_v34, %v557_v45 }
 0x1b6   : > { %v1664_v44 = vpack.c.bf16 %v1618_v9, %v1617_v37  ;;  %v7536_v37 = vpop.permute.xlu0 %586  ;;  %v341_v9 = vld [vmem:[%s6723_s30 + $0x1d0] sm:$0xff] }
 0x1b7   : > { %v780_v56 = vadd.f32 %v7170_v36, %v710_v47 }
 0x1b8   : > { %1400 = vperm.xlu1 %6561, %v8622_v33   ;;  %v542_v48 = vpop.permute.xlu1 %541  ;;  %5919 = vmatmul.mubr.bf16.gmra.mxu0 %v1664_v44 }
 0x1b9   : > { %v711_v33 = vmul.f32 %v7157_v34, %v542_v48  ;;  %v1168_v52 = vadd.f32 %v1104_v4, %v780_v56  ;;  %v784_v48 = vadd.f32 %v7170_v36, %v714_v58 }
 0x1bb   : > { %v781_v25 = vadd.f32 %v7170_v36, %v711_v33 }
 0x1bc   : > { %6562 = vset.pattern.permute.xlu1 %v8566_v15 }
 0x1bd   : > { %616 = vperm.xlu1 %6562, %v7275_v59   ;;  %v953_v23 = vpop.permute.xlu1 %952 }
 0x1be   : > { %v1103_v27 = vmul.f32 %v7161_v55, %v953_v23  ;;  %v7543_v23 = vpop.permute.xlu0 %596 }
 0x1c0   : > { %v1167_v6 = vadd.f32 %v1103_v27, %v779_v54  ;;  %v8630_v54 = vld [vmem:[#allocation27_spill] sm:$0xff] }
 0x1c1   : > { %621 = vperm.xlu1 %6562, %v337_v53   ;;  %v961_v32 = vpop.permute.xlu1 %960  ;;  %v1496_v27 = vmul.f32 %v7177_v38, %v8630_v54 }
 0x1c2   : > { %v1105_v60 = vmul.f32 %v7161_v55, %v961_v32  ;;  %v1555_v12 = vadd.f32 %v1491_v63, %v1167_v6  ;;  %v8629_v32 = vld [vmem:[#allocation12_spill] sm:$0xff]  ;;  %v7551_v43 = vpop.permute.xlu0 %611 }
 0x1c3   : > { %v1107_v47 = vmul.f32 %v7161_v55, %v8629_v32 }
 0x1c4   : > { %v1169_v2 = vadd.f32 %v1105_v60, %v781_v25  ;;  %v1619_v40 = vmax.f32 %v1555_v12, 0.0 }
 0x1c5   : > { %6563 = vset.pattern.permute.xlu1 %v8571_v14  ;;  %v965_v28 = vpop.permute.xlu1 %964 }
 0x1c6   : > { %1016 = vperm.xlu1 %6563, %v6643_v35   ;;  %v1106_v31 = vmul.f32 %v7161_v55, %v965_v28  ;;  %v6645_v35 = vld [vmem:[%s6723_s30 + $0x1c8] sm:$0xff]  ;;  %v7561_v12 = vpop.permute.xlu0 %626 }
 0x1c8   : > { %v1170_v8 = vadd.f32 %v1106_v31, %v782_v49 }
 0x1ca   : > { %1024 = vperm.xlu1 %6563, %v337_v53   ;;  %v1345_v26 = vpop.permute.xlu1 %1344  ;;  %v1558_v5 = vadd.f32 %v1494_v20, %v1170_v8 }
 0x1cb   : > { %v1492_v24 = vmul.f32 %v7177_v38, %v1345_v26 }
 0x1cc   : > { %v1622_v1 = vmax.f32 %v1558_v5, 0.0 }
 0x1cd   : > { %v1556_v21 = vadd.f32 %v1492_v24, %v1168_v52  ;;  %v8631_v24 = vld [vmem:[#allocation13_spill] sm:$0xff] }
 0x1ce   : > { %1028 = vperm.xlu1 %6563, %v6644_v22   ;;  %v1349_v29 = vpop.permute.xlu1 %1348  ;;  %v1110_v25 = vmul.f32 %v7161_v55, %v8631_v24 }
 0x1cf   : > { %v1620_v7 = vmax.f32 %v1556_v21, 0.0  ;;  %v1493_v30 = vmul.f32 %v7177_v38, %v1349_v29 }
 0x1d1   : > { %v1557_v18 = vadd.f32 %v1493_v30, %v1169_v2  ;;  %v1665_v50 = vpack.c.bf16 %v1620_v7, %v1619_v40 }
 0x1d2   : > { %6564 = vset.pattern.permute.xlu1 %v8603_v16 }
 0x1d3   : > { %v1621_v46 = vmax.f32 %v1557_v18, 0.0  ;;  %1408 = vperm.xlu1 %6564, %v7275_v59   ;;  %v552_v41 = vpop.permute.xlu1 %551  ;;  %5922 = vmatprep.mubr.bf16.mxu0 %v1665_v50 }
 0x1d4   : > { %v713_v44 = vmul.f32 %v7157_v34, %v552_v41 }
 0x1d5   : > { %v1666_v51 = vpack.c.bf16 %v1622_v1, %v1621_v46 }
 0x1d6   : > { %v783_v42 = vadd.f32 %v7170_v36, %v713_v44 }
 0x1d7   : > { %1412 = vperm.xlu1 %6564, %v337_v53   ;;  %v562_v11 = vpop.permute.xlu1 %561  ;;  %5923 = vmatmul.mubr.bf16.gmra.mxu0 %v1666_v51 }
 0x1d8   : > { %v715_v28 = vmul.f32 %v7157_v34, %v562_v11  ;;  %v1171_v31 = vadd.f32 %v1107_v47, %v783_v42  ;;  %v7581_v11 = vld [vmem:[%s6723_s30 + $0x1f0] sm:$0xff] }
 0x1da   : > { %v785_v17 = vadd.f32 %v7170_v36, %v715_v28 }
 0x1db   : > { %6565 = vset.pattern.permute.xlu1 %v8566_v15  ;;  %v567_v10 = vpop.permute.xlu1 %566 }
 0x1dc   : > { %631 = vperm.xlu1 %6565, %v7386_v57   ;;  %v716_v6 = vmul.f32 %v7157_v34, %v567_v10 }
 0x1de   : > { %v786_v60 = vadd.f32 %v7170_v36, %v716_v6  ;;  %v7569_v36 = vpop.permute.xlu0 %636 }
 0x1e0   : > { %641 = vperm.xlu1 %6565, %v341_v9   ;;  %v973_v59 = vpop.permute.xlu1 %972  ;;  %v1174_v22 = vadd.f32 %v1110_v25, %v786_v60  ;;  %v8632_v60 = vld [vmem:[#allocation29_spill] sm:$0xff] }
 0x1e1   : > { %v1108_v0 = vmul.f32 %v7161_v55, %v973_v59 }
 0x1e2   : > { %v7571_v18 = vpop.permute.xlu0 %651 }
 0x1e3   : > { %v1172_v39 = vadd.f32 %v1108_v0, %v784_v48  ;;  %v720_v48 = vmul.f32 %v7157_v34, %v7536_v37 }
 0x1e4   : > { %646 = vperm.xlu1 %6565, %v7402_v61   ;;  %v977_v53 = vpop.permute.xlu1 %976 }
 0x1e5   : > { %v1560_v49 = vadd.f32 %v1496_v27, %v1172_v39  ;;  %v1109_v3 = vmul.f32 %v7161_v55, %v977_v53 }
 0x1e6   : > { %v7578_v51 = vpop.permute.xlu0 %666 }
 0x1e7   : > { %v1624_v26 = vmax.f32 %v1560_v49, 0.0  ;;  %v1173_v62 = vadd.f32 %v1109_v3, %v785_v17 }
 0x1e8   : > { %6566 = vset.pattern.permute.xlu1 %v8571_v14 }
 0x1e9   : > { %1036 = vperm.xlu1 %6566, %v6645_v35   ;;  %v1357_v56 = vpop.permute.xlu1 %1356 }
 0x1ea   : > { %v1495_v33 = vmul.f32 %v7177_v38, %v1357_v56  ;;  %v989_v47 = vpop.permute.xlu0 %988 }
 0x1eb   : > { %v1112_v3 = vmul.f32 %v7161_v55, %v989_v47 }
 0x1ec   : > { %v1559_v4 = vadd.f32 %v1495_v33, %v1171_v31  ;;  %v6647_v31 = vld [vmem:[%s6723_s30 + $0x1e0] sm:$0xff] }
 0x1ed   : > { %1040 = vperm.xlu1 %6566, %v341_v9   ;;  %v1365_v63 = vpop.permute.xlu1 %1364 }
 0x1ee   : > { %v1623_v8 = vmax.f32 %v1559_v4, 0.0  ;;  %v1497_v52 = vmul.f32 %v7177_v38, %v1365_v63 }
 0x1f0   : > { %v1667_v20 = vpack.c.bf16 %v1624_v26, %v1623_v8  ;;  %v1561_v2 = vadd.f32 %v1497_v52, %v1173_v62 }
 0x1f1   : > { %6567 = vset.pattern.permute.xlu1 %v8603_v16  ;;  %v1369_v21 = vpop.permute.xlu1 %1368 }
 0x1f2   : > { %v1498_v29 = vmul.f32 %v7177_v38, %v1369_v21  ;;  %1420 = vperm.xlu1 %6567, %v7386_v57   ;;  %5926 = vmatprep.mubr.bf16.mxu0 %v1667_v20  ;;  %v1625_v7 = vmax.f32 %v1561_v2, 0.0  ;;  %v717_v57 = vmul.f32 %v7157_v34, %v7532_v19 }
 0x1f4   : > { %v1562_v5 = vadd.f32 %v1498_v29, %v1174_v22 }
 0x1f6   : > { %v1626_v30 = vmax.f32 %v1562_v5, 0.0  ;;  %1428 = vperm.xlu1 %6567, %v341_v9   ;;  %v577_v40 = vpop.permute.xlu1 %576 }
 0x1f7   : > { %v718_v39 = vmul.f32 %v7157_v34, %v577_v40 }
 0x1f8   : > { %v1668_v45 = vpack.c.bf16 %v1626_v30, %v1625_v7 }
 0x1fa   : > { %1432 = vperm.xlu1 %6567, %v7402_v61   ;;  %v582_v50 = vpop.permute.xlu1 %581  ;;  %5927 = vmatmul.mubr.bf16.gmra.mxu0 %v1668_v45  ;;  %v7586_v61 = vld [vmem:[%s8527_s4] ss:$0 sm:$0xff] }
 0x1fb   : > { %v719_v24 = vmul.f32 %v7157_v34, %v582_v50 }
 0x1fd   : > { %v5888_v1 = vpop.f32.mrf.mxu0 }
 0x1fe   : > { %6569 = vset.pattern.permute.xlu1 %v8566_v15  ;;  %v7592_v15 = vld [vmem:[%s8525_s2] ss:$0 sm:$0xff]  ;;  %v1793_v0 = vadd.f32 %v5888_v1, %v7586_v61  ;;  %v8633_v1 = vld [vmem:[#allocation32_spill] sm:$0xff] }
 0x1ff   : > { %656 = vperm.xlu1 %6569, %v7429_v13   ;;  %v985_v46 = vpop.permute.xlu1 %984  ;;  %v1784_v41 = vpop.f32.mrf.mxu0  ;;  %v787_v19 = vadd.f32 %v7592_v15, %v717_v57  ;;  %v790_v37 = vadd.f32 %v7592_v15, %v720_v48  ;;  %v788_v33 = vadd.f32 %v7592_v15, %v718_v39  ;;  %v1502_v57 = vmul.f32 %v7177_v38, %v8633_v1 }
 0x200   : > { %v1785_v58 = vadd.f32 %v7586_v61, %v1784_v41  ;;  %v1111_v53 = vmul.f32 %v7161_v55, %v985_v46  ;;  %v2041_v6 = vmax.f32 %v1793_v0, 0.0  ;;  %v789_v46 = vadd.f32 %v7592_v15, %v719_v24 }
 0x201   : > { %v5889_v10 = vpop.f32.mrf.mxu0  ;;  %v1176_v22 = vadd.f32 %v1112_v3, %v788_v33 }
 0x202   : > { %v1796_v9 = vadd.f32 %v5889_v10, %v7586_v61  ;;  %v2039_v27 = vmax.f32 %v1785_v58, 0.0  ;;  %v1175_v49 = vadd.f32 %v1111_v53, %v787_v19  ;;  %v6648_v58 = vld [vmem:[%s6723_s30 + $0x1f8] sm:$0xff] }
 0x203   : > { %661 = vperm.xlu1 %6569, %v7581_v11   ;;  %v993_v59 = vpop.permute.xlu1 %992  ;;  %v1787_v44 = vpop.f32.mrf.mxu0 }
 0x204   : > { %v1788_v42 = vadd.f32 %v7586_v61, %v1787_v44  ;;  %v2042_v54 = vmax.f32 %v1796_v9, 0.0  ;;  %v1113_v29 = vmul.f32 %v7161_v55, %v993_v59 }
 0x205   : > { %v5892_v32 = vpop.f32.mrf.mxu0 }
 0x206   : > { %v2040_v56 = vmax.f32 %v1788_v42, 0.0  ;;  %v2104_v26 = vpack.c.bf16 %v2042_v54, %v2041_v6  ;;  %v1809_v20 = vadd.f32 %v5892_v32, %v7586_v61  ;;  %v1177_v48 = vadd.f32 %v1113_v29, %v789_v46 }
 0x207   : > { %6571 = vset.pattern.permute.xlu1 %v8571_v14  ;;  %v997_v28 = vpop.permute.xlu1 %996  ;;  %v1800_v35 = vpop.f32.mrf.mxu0  ;;  %v1499_v14 = vmul.f32 %v7177_v38, %v8632_v60 }
 0x208   : > { %1048 = vperm.xlu1 %6571, %v6647_v31   ;;  %v1114_v4 = vmul.f32 %v7161_v55, %v997_v28  ;;  %v2103_v63 = vpack.c.bf16 %v2040_v56, %v2039_v27  ;;  %v1801_v8 = vadd.f32 %v7586_v61, %v1800_v35  ;;  %v2045_v19 = vmax.f32 %v1809_v20, 0.0 }
 0x209   : > { %v5893_v17 = vpop.f32.mrf.mxu0  ;;  %v1563_v62 = vadd.f32 %v1499_v14, %v1175_v49 }
 0x20a   : > { %v1812_v52 = vadd.f32 %v5893_v17, %v7586_v61  ;;  %5966 = vmatprep.mubr.bf16.mxu1 %v2103_v63  ;;  %v1178_v5 = vadd.f32 %v1114_v4, %v790_v37  ;;  %v2043_v40 = vmax.f32 %v1801_v8, 0.0 }
 0x20b   : > { %v1803_v25 = vpop.f32.mrf.mxu0  ;;  %5967 = vmatmul.mubr.bf16.vlgmr.msra.gmra.mxu1 %v2104_v26  ;;  %v1627_v9 = vmax.f32 %v1563_v62, 0.0 }
 0x20c   : > { %v1804_v21 = vadd.f32 %v7586_v61, %v1803_v25  ;;  %1056 = vperm.xlu1 %6571, %v7581_v11   ;;  %v1377_v2 = vpop.permute.xlu1 %1376  ;;  %v2046_v45 = vmax.f32 %v1812_v52, 0.0  ;;  %v1566_v0 = vadd.f32 %v1502_v57, %v1178_v5 }
 0x20d   : > { %v1500_v7 = vmul.f32 %v7177_v38, %v1377_v2  ;;  %v5896_v30 = vpop.f32.mrf.mxu0 }
 0x20e   : > { %v2044_v50 = vmax.f32 %v1804_v21, 0.0  ;;  %v2106_v32 = vpack.c.bf16 %v2046_v45, %v2045_v19  ;;  %v1825_v56 = vadd.f32 %v5896_v30, %v7586_v61  ;;  %v1630_v6 = vmax.f32 %v1566_v0, 0.0 }
 0x20f   : > { %v1564_v41 = vadd.f32 %v1500_v7, %v1176_v22  ;;  %v1816_v10 = vpop.f32.mrf.mxu0  ;;  %v722_v45 = vmul.f32 %v7157_v34, %v7543_v23  ;;  %v6590_v23 = vld [vmem:[%s8526_s3 + $0xb8] sm:$0xff]  }
 0x210   : > { %1060 = vperm.xlu1 %6571, %v6648_v58   ;;  %v1381_v44 = vpop.permute.xlu1 %1380  ;;  %v2105_v59 = vpack.c.bf16 %v2044_v50, %v2043_v40  ;;  %v1817_v47 = vadd.f32 %v7586_v61, %v1816_v10  ;;  %v2049_v14 = vmax.f32 %v1825_v56, 0.0  ;;  %6030 = vmatprep.subr.bf16.mxu0 %v6590_v23 }
 0x211   : > { %v1628_v53 = vmax.f32 %v1564_v41, 0.0  ;;  %v1501_v42 = vmul.f32 %v7177_v38, %v1381_v44  ;;  %v5897_v39 = vpop.f32.mrf.mxu0  ;;  %6031 = vmatpush3.bf16.msra.mxu0 %v6590_v23 }
 0x212   : > { %v1828_v54 = vadd.f32 %v5897_v39, %v7586_v61  ;;  %5970 = vmatprep.mubr.bf16.mxu1 %v2105_v59  ;;  %v2047_v3 = vmax.f32 %v1817_v47, 0.0 }
 0x213   : > { %v1565_v27 = vadd.f32 %v1501_v42, %v1177_v48  ;;  %v1819_v28 = vpop.f32.mrf.mxu0  ;;  %v1669_v35 = vpack.c.bf16 %v1628_v53, %v1627_v9  ;;  %5971 = vmatmul.mubr.bf16.gmra.mxu1 %v2106_v32  ;;  %v1001_v9 = vpop.permute.xlu0 %1000  ;;  %v792_v48 = vadd.f32 %v7592_v15, %v722_v45 }
 0x214   : > { %v1820_v37 = vadd.f32 %v7586_v61, %v1819_v28  ;;  %6573 = vset.pattern.permute.xlu1 %v8603_v16  ;;  %v2050_v4 = vmax.f32 %v1828_v54, 0.0  ;;  %v1115_v32 = vmul.f32 %v7161_v55, %v1001_v9 }
 0x215   : > { %v1629_v49 = vmax.f32 %v1565_v27, 0.0  ;;  %1440 = vperm.xlu1 %6573, %v7429_v13   ;;  %v592_v31 = vpop.permute.xlu1 %591  ;;  %v5900_v33 = vpop.f32.mrf.mxu0  ;;  %5930 = vmatprep.mubr.bf16.mxu0 %v1669_v35 }
 0x216   : > { %v2048_v17 = vmax.f32 %v1820_v37, 0.0  ;;  %v2108_v16 = vpack.c.bf16 %v2050_v4, %v2049_v14  ;;  %v1841_v62 = vadd.f32 %v5900_v33, %v7586_v61  ;;  %v721_v10 = vmul.f32 %v7157_v34, %v592_v31  ;;  %v8634_v37 = vld [vmem:[#allocation34_spill] sm:$0xff] }
 0x217   : > { %v1832_v63 = vpop.f32.mrf.mxu0  ;;  %v1670_v60 = vpack.c.bf16 %v1630_v6, %v1629_v49  ;;  %v1504_v6 = vmul.f32 %v7177_v38, %v8634_v37 }
 0x218   : > { %v2107_v26 = vpack.c.bf16 %v2048_v17, %v2047_v3  ;;  %v1833_v24 = vadd.f32 %v7586_v61, %v1832_v63  ;;  %v2053_v7 = vmax.f32 %v1841_v62, 0.0  ;;  %v791_v54 = vadd.f32 %v7592_v15, %v721_v10 }
 0x219   : > { %1444 = vperm.xlu1 %6573, %v7581_v11   ;;  %v602_v8 = vpop.permute.xlu1 %601  ;;  %v5901_v52 = vpop.f32.mrf.mxu0  ;;  %5931 = vmatmul.mubr.bf16.gmra.mxu0 %v1670_v60 }
 0x21a   : > { %v1844_v13 = vadd.f32 %v5901_v52, %v7586_v61  ;;  %5974 = vmatprep.mubr.bf16.mxu1 %v2107_v26  ;;  %v2051_v22 = vmax.f32 %v1833_v24, 0.0  ;;  %v723_v3 = vmul.f32 %v7157_v34, %v602_v8  ;;  %v1179_v14 = vadd.f32 %v1115_v32, %v791_v54  ;;  %v1013_v26 = vpop.permute.xlu0 %1012  ;;  %v6591_v54 = vld [vmem:[%s8526_s3 + $0xb0] sm:$0xff]  }
 0x21b   : > { %v1835_v25 = vpop.f32.mrf.mxu0  ;;  %5975 = vmatmul.mubr.bf16.gmra.mxu1 %v2108_v16  ;;  %6032 = vmatprep.subr.bf16.mxu0 %v6591_v54 }
 0x21c   : > { %v1836_v20 = vadd.f32 %v7586_v61, %v1835_v25  ;;  %v2054_v29 = vmax.f32 %v1844_v13, 0.0  ;;  %6033 = vmatpush3.bf16.msra.mxu0 %v6591_v54 }
 0x21d   : > { %v607_v21 = vpop.permute.xlu1 %606  ;;  %v5904_v2 = vpop.f32.mrf.mxu0 }
 0x21e   : > { %v2052_v11 = vmax.f32 %v1836_v20, 0.0  ;;  %v2110_v50 = vpack.c.bf16 %v2054_v29, %v2053_v7  ;;  %v1857_v19 = vadd.f32 %v5904_v2, %v7586_v61  ;;  %v724_v4 = vmul.f32 %v7157_v34, %v607_v21 }
 0x21f   : > { %v1848_v5 = vpop.f32.mrf.mxu0  ;;  %v793_v21 = vadd.f32 %v7592_v15, %v723_v3 }
 0x220   : > { %v2109_v30 = vpack.c.bf16 %v2052_v11, %v2051_v22  ;;  %v1849_v1 = vadd.f32 %v7586_v61, %v1848_v5  ;;  %v2057_v27 = vmax.f32 %v1857_v19, 0.0  ;;  %v794_v2 = vadd.f32 %v7592_v15, %v724_v4 }
 0x221   : > { %v5905_v40 = vpop.f32.mrf.mxu0  ;;  %v1118_v22 = vmul.f32 %v7161_v55, %v1013_v26 }
 0x222   : > { %v1860_v57 = vadd.f32 %v5905_v40, %v7586_v61  ;;  %v1005_v46 = vpop.permute.xlu1 %1004  ;;  %5978 = vmatprep.mubr.bf16.mxu1 %v2109_v30  ;;  %v2055_v0 = vmax.f32 %v1849_v1, 0.0 }
 0x223   : > { %v1851_v41 = vpop.f32.mrf.mxu0  ;;  %v1116_v58 = vmul.f32 %v7161_v55, %v1005_v46  ;;  %5979 = vmatmul.mubr.bf16.gmra.mxu1 %v2110_v50  ;;  %v1182_v46 = vadd.f32 %v1118_v22, %v794_v2 }
 0x224   : > { %v1852_v44 = vadd.f32 %v7586_v61, %v1851_v41  ;;  %v2058_v53 = vmax.f32 %v1860_v57, 0.0 }
 0x225   : > { %v5908_v59 = vpop.f32.mrf.mxu0  ;;  %v1180_v28 = vadd.f32 %v1116_v58, %v792_v48 }
 0x226   : > { %v2056_v42 = vmax.f32 %v1852_v44, 0.0  ;;  %v1009_v39 = vpop.permute.xlu1 %1008  ;;  %v2112_v49 = vpack.c.bf16 %v2058_v53, %v2057_v27  ;;  %v1873_v17 = vadd.f32 %v5908_v59, %v7586_v61 }
 0x227   : > { %v1864_v47 = vpop.f32.mrf.mxu0  ;;  %v1568_v52 = vadd.f32 %v1504_v6, %v1180_v28  ;;  %v1117_v13 = vmul.f32 %v7161_v55, %v1009_v39  ;;  %v725_v28 = vmul.f32 %v7157_v34, %v7551_v43  ;;  %v6593_v43 = vld [vmem:[%s8526_s3 + $0xa0] sm:$0xff]  }
 0x228   : > { %v2111_v35 = vpack.c.bf16 %v2056_v42, %v2055_v0  ;;  %v1865_v31 = vadd.f32 %v7586_v61, %v1864_v47  ;;  %v2061_v29 = vmax.f32 %v1873_v17, 0.0 }
 0x229   : > { %v5909_v56 = vpop.f32.mrf.mxu0  ;;  %v1632_v5 = vmax.f32 %v1568_v52, 0.0  ;;  %v1181_v45 = vadd.f32 %v1117_v13, %v793_v21  ;;  %v795_v3 = vadd.f32 %v7592_v15, %v725_v28  ;;  %v728_v52 = vmul.f32 %v7157_v34, %v7561_v12  ;;  %v1021_v13 = vpop.permute.xlu0 %1020  ;;  %v8636_v12 = vld [vmem:[#allocation38_spill] sm:$0xff] }
 0x22a   : > { %v1876_v33 = vadd.f32 %v5909_v56, %v7586_v61  ;;  %5982 = vmatprep.mubr.bf16.mxu1 %v2111_v35  ;;  %v2059_v25 = vmax.f32 %v1865_v31, 0.0  ;;  %v1120_v2 = vmul.f32 %v7161_v55, %v1021_v13  ;;  %v1510_v22 = vmul.f32 %v7177_v38, %v8636_v12 }
 0x22b   : > { %v1389_v63 = vpop.permute.xlu1 %1388  ;;  %v1867_v60 = vpop.f32.mrf.mxu0  ;;  %5983 = vmatmul.mubr.bf16.gmra.mxu1 %v2112_v49  ;;  %v6592_v49 = vld [vmem:[%s8526_s3 + $0xa8] sm:$0xff]  }
 0x22c   : > { %v1503_v16 = vmul.f32 %v7177_v38, %v1389_v63  ;;  %v1868_v24 = vadd.f32 %v7586_v61, %v1867_v60  ;;  %v2062_v62 = vmax.f32 %v1876_v33, 0.0  ;;  %6034 = vmatprep.subr.bf16.mxu0 %v6592_v49  ;;  %v8635_v63 = vld [vmem:[#allocation37_spill] sm:$0xff] }
 0x22d   : > { %6035 = vmatpush3.bf16.msra.mxu0 %v6592_v49  ;;  %v1507_v60 = vmul.f32 %v7177_v38, %v8635_v63 }
 0x22e   : > { %v1567_v20 = vadd.f32 %v1503_v16, %v1179_v14  ;;  %v2060_v8 = vmax.f32 %v1868_v24, 0.0  ;;  %v2114_v50 = vpack.c.bf16 %v2062_v62, %v2061_v29  ;;  %6036 = vmatprep.subr.bf16.mxu0 %v6593_v43 }
 0x22f   : > { %v1397_v11 = vpop.permute.xlu1 %1396 }
 0x230   : > { %v1631_v7 = vmax.f32 %v1567_v20, 0.0  ;;  %v1505_v30 = vmul.f32 %v7177_v38, %v1397_v11  ;;  %v2113_v40 = vpack.c.bf16 %v2060_v8, %v2059_v25  ;;  %v6594_v25 = vld [vmem:[%s8526_s3 + $0x98] sm:$0xff]   ;;  %v798_v20 = vadd.f32 %v7592_v15, %v728_v52  ;;  %v6595_v11 = vld [vmem:[%s8526_s3 + $0x90] sm:$0xff]  }
 0x231   : > { %6037 = vmatpush3.bf16.msra.mxu0 %v6593_v43  ;;  %v8637_v52 = vld [vmem:[#allocation41_spill] sm:$0xff] }
 0x232   : > { %5986 = vmatprep.mubr.bf16.mxu1 %v2113_v40  ;;  %v1671_v1 = vpack.c.bf16 %v1632_v5, %v1631_v7  ;;  %v1569_v41 = vadd.f32 %v1505_v30, %v1181_v45  ;;  %6038 = vmatprep.subr.bf16.mxu0 %v6594_v25 }
 0x233   : > { %v1401_v57 = vpop.permute.xlu1 %1400  ;;  %5987 = vmatmul.mubr.bf16.gmra.mxu1 %v2114_v50 }
 0x234   : > { %v1506_v10 = vmul.f32 %v7177_v38, %v1401_v57  ;;  %5934 = vmatprep.mubr.bf16.mxu0 %v1671_v1  ;;  %v1633_v58 = vmax.f32 %v1569_v41, 0.0  ;;  %v6596_v1 = vld [vmem:[%s8526_s3 + $0x88] sm:$0xff]  }
 0x235   : > { %6039 = vmatpush3.bf16.msra.mxu0 %v6594_v25 }
 0x236   : > { %v1570_v9 = vadd.f32 %v1506_v10, %v1182_v46  ;;  %v5912_v19 = vpop.f32.mrf.mxu0  ;;  %6040 = vmatprep.subr.bf16.mxu0 %v6595_v11 }
 0x237   : > { %v1889_v39 = vadd.f32 %v5912_v19, %v7586_v61 }
 0x238   : > { %v1634_v44 = vmax.f32 %v1570_v9, 0.0  ;;  %v617_v59 = vpop.permute.xlu1 %616  ;;  %v1880_v23 = vpop.f32.mrf.mxu0 }
 0x239   : > { %v1881_v53 = vadd.f32 %v7586_v61, %v1880_v23  ;;  %v2065_v6 = vmax.f32 %v1889_v39, 0.0  ;;  %v726_v24 = vmul.f32 %v7157_v34, %v617_v59  ;;  %6041 = vmatpush3.bf16.msra.mxu0 %v6595_v11 }
 0x23a   : > { %v5913_v48 = vpop.f32.mrf.mxu0  ;;  %v1672_v0 = vpack.c.bf16 %v1634_v44, %v1633_v58  ;;  %6042 = vmatprep.subr.bf16.mxu0 %v6596_v1  ;;  %v6597_v44 = vld [vmem:[%s8526_s3 + $0x80] sm:$0xff]  }
 0x23b   : > { %v1892_v42 = vadd.f32 %v5913_v48, %v7586_v61  ;;  %v2063_v56 = vmax.f32 %v1881_v53, 0.0  ;;  %v796_v21 = vadd.f32 %v7592_v15, %v726_v24  ;;  %v1033_v24 = vpop.permute.xlu0 %1032 }
 0x23c   : > { %v622_v32 = vpop.permute.xlu1 %621  ;;  %v1883_v47 = vpop.f32.mrf.mxu0  ;;  %5935 = vmatmul.mubr.bf16.gmra.mxu0 %v1672_v0 }
 0x23d   : > { %v1884_v27 = vadd.f32 %v7586_v61, %v1883_v47  ;;  %v2066_v35 = vmax.f32 %v1892_v42, 0.0  ;;  %v727_v5 = vmul.f32 %v7157_v34, %v622_v32  ;;  %v1184_v40 = vadd.f32 %v1120_v2, %v796_v21  ;;  %6043 = vmatpush3.bf16.msra.mxu0 %v6596_v1 }
 0x23e   : > { %6044 = vmatprep.subr.bf16.mxu0 %v6597_v44 }
 0x23f   : > { %v2064_v37 = vmax.f32 %v1884_v27, 0.0  ;;  %v2116_v4 = vpack.c.bf16 %v2066_v35, %v2065_v6  ;;  %v797_v57 = vadd.f32 %v7592_v15, %v727_v5 }
 0x241   : > { %v1017_v31 = vpop.permute.xlu1 %1016  ;;  %v2115_v33 = vpack.c.bf16 %v2064_v37, %v2063_v56  ;;  %6045 = vmatpush3.bf16.msra.mxu0 %v6597_v44 }
 0x242   : > { %v1119_v17 = vmul.f32 %v7161_v55, %v1017_v31 }
 0x243   : > { %5990 = vmatprep.mubr.bf16.mxu1 %v2115_v33 }
 0x244   : > { %v1183_v14 = vadd.f32 %v1119_v17, %v795_v3  ;;  %5991 = vmatmul.mubr.bf16.gmra.mxu1 %v2116_v4  ;;  %v730_v17 = vmul.f32 %v7157_v34, %v7569_v36  ;;  %v1123_v36 = vmul.f32 %v7161_v55, %v1033_v24 }
 0x245   : > { %v1025_v26 = vpop.permute.xlu1 %1024 }
 0x246   : > { %v1571_v16 = vadd.f32 %v1507_v60, %v1183_v14  ;;  %v1121_v45 = vmul.f32 %v7161_v55, %v1025_v26  ;;  %v800_v60 = vadd.f32 %v7592_v15, %v730_v17  ;;  %v733_v17 = vmul.f32 %v7157_v34, %v7571_v18 }
 0x248   : > { %v1635_v10 = vmax.f32 %v1571_v16, 0.0  ;;  %v1185_v9 = vadd.f32 %v1121_v45, %v797_v57  ;;  %v1512_v16 = vmul.f32 %v7177_v38, %v8637_v52  ;;  %v736_v52 = vmul.f32 %v7157_v34, %v7578_v51 }
 0x249   : > { %v1029_v62 = vpop.permute.xlu1 %1028 }
 0x24a   : > { %v1122_v8 = vmul.f32 %v7161_v55, %v1029_v62 }
 0x24c   : > { %v1186_v29 = vadd.f32 %v1122_v8, %v798_v20 }
 0x24e   : > { %v1574_v7 = vadd.f32 %v1510_v22, %v1186_v29  ;;  %v1409_v30 = vpop.permute.xlu1 %1408  ;;  %v1045_v22 = vpop.permute.xlu0 %1044 }
 0x24f   : > { %v1508_v50 = vmul.f32 %v7177_v38, %v1409_v30  ;;  %v1126_v30 = vmul.f32 %v7161_v55, %v1045_v22 }
 0x250   : > { %v1638_v0 = vmax.f32 %v1574_v7, 0.0 }
 0x251   : > { %v1572_v46 = vadd.f32 %v1508_v50, %v1184_v40 }
 0x252   : > { %v1413_v41 = vpop.permute.xlu1 %1412 }
 0x253   : > { %v1636_v19 = vmax.f32 %v1572_v46, 0.0  ;;  %v1509_v58 = vmul.f32 %v7177_v38, %v1413_v41 }
 0x255   : > { %v1573_v59 = vadd.f32 %v1509_v58, %v1185_v9  ;;  %v5916_v23 = vpop.f32.mrf.mxu0  ;;  %v1673_v48 = vpack.c.bf16 %v1636_v19, %v1635_v10 }
 0x256   : > { %v1905_v28 = vadd.f32 %v5916_v23, %v7586_v61 }
 0x257   : > { %v1637_v53 = vmax.f32 %v1573_v59, 0.0  ;;  %v632_v42 = vpop.permute.xlu1 %631  ;;  %v1896_v39 = vpop.f32.mrf.mxu0  ;;  %5938 = vmatprep.mubr.bf16.mxu0 %v1673_v48 }
 0x258   : > { %v1897_v54 = vadd.f32 %v7586_v61, %v1896_v39  ;;  %v2069_v33 = vmax.f32 %v1905_v28, 0.0  ;;  %v729_v26 = vmul.f32 %v7157_v34, %v632_v42 }
 0x259   : > { %v5917_v32 = vpop.f32.mrf.mxu0  ;;  %v1674_v47 = vpack.c.bf16 %v1638_v0, %v1637_v53 }
 0x25a   : > { %v1908_v27 = vadd.f32 %v5917_v32, %v7586_v61  ;;  %v2067_v49 = vmax.f32 %v1897_v54, 0.0  ;;  %v799_v20 = vadd.f32 %v7592_v15, %v729_v26  ;;  %v803_v26 = vadd.f32 %v7592_v15, %v733_v17 }
 0x25b   : > { %v642_v35 = vpop.permute.xlu1 %641  ;;  %v1899_v56 = vpop.f32.mrf.mxu0  ;;  %5939 = vmatmul.mubr.bf16.gmra.mxu0 %v1674_v47 }
 0x25c   : > { %v1900_v37 = vadd.f32 %v7586_v61, %v1899_v56  ;;  %v2070_v6 = vmax.f32 %v1908_v27, 0.0  ;;  %v731_v8 = vmul.f32 %v7157_v34, %v642_v35  ;;  %v1187_v2 = vadd.f32 %v1123_v36, %v799_v20 }
 0x25d   : > { %v806_v20 = vadd.f32 %v7592_v15, %v736_v52 }
 0x25e   : > { %v2068_v31 = vmax.f32 %v1900_v37, 0.0  ;;  %v2118_v43 = vpack.c.bf16 %v2070_v6, %v2069_v33  ;;  %v801_v7 = vadd.f32 %v7592_v15, %v731_v8 }
 0x25f   : > { %v647_v3 = vpop.permute.xlu1 %646 }
 0x260   : > { %v2117_v4 = vpack.c.bf16 %v2068_v31, %v2067_v49  ;;  %v732_v12 = vmul.f32 %v7157_v34, %v647_v3 }
 0x262   : > { %5994 = vmatprep.mubr.bf16.mxu1 %v2117_v4  ;;  %v802_v45 = vadd.f32 %v7592_v15, %v732_v12  ;;  %v1053_v4 = vpop.permute.xlu0 %1052 }
 0x263   : > { %5995 = vmatmul.mubr.bf16.gmra.mxu1 %v2118_v43  ;;  %v1128_v36 = vmul.f32 %v7161_v55, %v1053_v4 }
 0x264   : > { %v1037_v63 = vpop.permute.xlu1 %1036  ;;  %v1190_v9 = vadd.f32 %v1126_v30, %v802_v45 }
 0x265   : > { %v1124_v14 = vmul.f32 %v7161_v55, %v1037_v63 }
 0x267   : > { %v1188_v13 = vadd.f32 %v1124_v14, %v800_v60  ;;  %v1437_v14 = vpop.permute.xlu0 %1436 }
 0x268   : > { %v1041_v25 = vpop.permute.xlu1 %1040 }
 0x269   : > { %v1576_v62 = vadd.f32 %v1512_v16, %v1188_v13  ;;  %v1125_v11 = vmul.f32 %v7161_v55, %v1041_v25  ;;  %v1515_v13 = vmul.f32 %v7177_v38, %v1437_v14 }
 0x26b   : > { %v1640_v50 = vmax.f32 %v1576_v62, 0.0  ;;  %v1189_v46 = vadd.f32 %v1125_v11, %v801_v7  ;;  %v1449_v62 = vpop.permute.xlu0 %1448 }
 0x26d   : > { %v1421_v21 = vpop.permute.xlu1 %1420 }
 0x26e   : > { %v1511_v29 = vmul.f32 %v7177_v38, %v1421_v21 }
 0x270   : > { %v1575_v5 = vadd.f32 %v1511_v29, %v1187_v2  ;;  %v1518_v2 = vmul.f32 %v7177_v38, %v1449_v62 }
 0x271   : > { %v1429_v40 = vpop.permute.xlu1 %1428 }
 0x272   : > { %v1639_v1 = vmax.f32 %v1575_v5, 0.0  ;;  %v1513_v57 = vmul.f32 %v7177_v38, %v1429_v40 }
 0x274   : > { %v1675_v41 = vpack.c.bf16 %v1640_v50, %v1639_v1  ;;  %v1577_v19 = vadd.f32 %v1513_v57, %v1189_v46 }
 0x275   : > { %v1433_v10 = vpop.permute.xlu1 %1432 }
 0x276   : > { %v1514_v58 = vmul.f32 %v7177_v38, %v1433_v10  ;;  %5942 = vmatprep.mubr.bf16.mxu0 %v1675_v41  ;;  %v1641_v23 = vmax.f32 %v1577_v19, 0.0 }
 0x278   : > { %v1578_v44 = vadd.f32 %v1514_v58, %v1190_v9  ;;  %v5920_v59 = vpop.f32.mrf.mxu0 }
 0x279   : > { %v1921_v54 = vadd.f32 %v5920_v59, %v7586_v61 }
 0x27a   : > { %v1642_v48 = vmax.f32 %v1578_v44, 0.0  ;;  %v657_v0 = vpop.permute.xlu1 %656  ;;  %v1912_v53 = vpop.f32.mrf.mxu0 }
 0x27b   : > { %v1913_v32 = vadd.f32 %v7586_v61, %v1912_v53  ;;  %v2073_v49 = vmax.f32 %v1921_v54, 0.0  ;;  %v734_v60 = vmul.f32 %v7157_v34, %v657_v0 }
 0x27c   : > { %v5921_v42 = vpop.f32.mrf.mxu0  ;;  %v1676_v39 = vpack.c.bf16 %v1642_v48, %v1641_v23 }
 0x27d   : > { %v1924_v47 = vadd.f32 %v5921_v42, %v7586_v61  ;;  %v2071_v37 = vmax.f32 %v1913_v32, 0.0  ;;  %v804_v25 = vadd.f32 %v7592_v15, %v734_v60  ;;  %v7764_v60 = vld [vmem:[%s8527_s4 + $0x1] ss:$0 sm:$0xff] }
 0x27e   : > { %v662_v27 = vpop.permute.xlu1 %661  ;;  %v1915_v28 = vpop.f32.mrf.mxu0  ;;  %5943 = vmatmul.mubr.bf16.gmra.mxu0 %v1676_v39 }
 0x27f   : > { %v1916_v35 = vadd.f32 %v7586_v61, %v1915_v28  ;;  %v2074_v56 = vmax.f32 %v1924_v47, 0.0  ;;  %v735_v8 = vmul.f32 %v7157_v34, %v662_v27  ;;  %v1192_v29 = vadd.f32 %v1128_v36, %v804_v25 }
 0x281   : > { %v2072_v6 = vmax.f32 %v1916_v35, 0.0  ;;  %v2120_v3 = vpack.c.bf16 %v2074_v56, %v2073_v49  ;;  %v805_v5 = vadd.f32 %v7592_v15, %v735_v8 }
 0x283   : > { %v1049_v31 = vpop.permute.xlu1 %1048  ;;  %v2119_v33 = vpack.c.bf16 %v2072_v6, %v2071_v37 }
 0x284   : > { %v1127_v63 = vmul.f32 %v7161_v55, %v1049_v31 }
 0x285   : > { %5998 = vmatprep.mubr.bf16.mxu1 %v2119_v33 }
 0x286   : > { %5999 = vmatmul.mubr.bf16.gmra.mxu1 %v2120_v3  ;;  %v1191_v24 = vadd.f32 %v1127_v63, %v803_v26 }
 0x287   : > { %v1057_v43 = vpop.permute.xlu1 %1056 }
 0x288   : > { %v1579_v21 = vadd.f32 %v1515_v13, %v1191_v24  ;;  %v1129_v51 = vmul.f32 %v7161_v55, %v1057_v43 }
 0x28a   : > { %v1643_v30 = vmax.f32 %v1579_v21, 0.0  ;;  %v1193_v45 = vadd.f32 %v1129_v51, %v805_v5 }
 0x28b   : > { %v1061_v16 = vpop.permute.xlu1 %1060 }
 0x28c   : > { %v1130_v18 = vmul.f32 %v7161_v55, %v1061_v16 }
 0x28e   : > { %v1194_v22 = vadd.f32 %v1130_v18, %v806_v20 }
 0x290   : > { %v1441_v12 = vpop.permute.xlu1 %1440  ;;  %v1582_v50 = vadd.f32 %v1518_v2, %v1194_v22 }
 0x291   : > { %v1516_v11 = vmul.f32 %v7177_v38, %v1441_v12 }
 0x292   : > { %v1646_v10 = vmax.f32 %v1582_v50, 0.0 }
 0x293   : > { %v1580_v7 = vadd.f32 %v1516_v11, %v1192_v29 }
 0x294   : > { %v1445_v40 = vpop.permute.xlu1 %1444 }
 0x295   : > { %v1644_v1 = vmax.f32 %v1580_v7, 0.0  ;;  %v1517_v34 = vmul.f32 %v7177_v38, %v1445_v40 }
 0x297   : > { %v1581_v57 = vadd.f32 %v1517_v34, %v1193_v45  ;;  %v5924_v46 = vpop.f32.mrf.mxu0  ;;  %v1677_v41 = vpack.c.bf16 %v1644_v1, %v1643_v30 }
 0x298   : > { %v1937_v59 = vadd.f32 %v5924_v46, %v7586_v61 }
 0x299   : > { %v1645_v9 = vmax.f32 %v1581_v57, 0.0  ;;  %v1928_v55 = vpop.f32.mrf.mxu0  ;;  %5946 = vmatprep.mubr.bf16.mxu0 %v1677_v41 }
 0x29a   : > { %v1929_v44 = vadd.f32 %v7586_v61, %v1928_v55  ;;  %v2077_v42 = vmax.f32 %v1937_v59, 0.0 }
 0x29b   : > { %v5925_v19 = vpop.f32.mrf.mxu0  ;;  %v1678_v58 = vpack.c.bf16 %v1646_v10, %v1645_v9 }
 0x29c   : > { %v1940_v15 = vadd.f32 %v5925_v19, %v7586_v61  ;;  %v2075_v0 = vmax.f32 %v1929_v44, 0.0 }
 0x29d   : > { %v1931_v23 = vpop.f32.mrf.mxu0  ;;  %5947 = vmatmul.mubr.bf16.gmra.mxu0 %v1678_v58 }
 0x29e   : > { %v1932_v48 = vadd.f32 %v7586_v61, %v1931_v23  ;;  %v2078_v38 = vmax.f32 %v1940_v15, 0.0 }
 0x2a0   : > { %v2076_v53 = vmax.f32 %v1932_v48, 0.0  ;;  %v2122_v32 = vpack.c.bf16 %v2078_v38, %v2077_v42 }
 0x2a2   : > { %v2121_v39 = vpack.c.bf16 %v2076_v53, %v2075_v0 }
 0x2a4   : > { %6002 = vmatprep.mubr.bf16.mxu1 %v2121_v39 }
 0x2a5   : > { %6003 = vmatmul.mubr.bf16.gmra.mxu1 %v2122_v32 }
 0x2ba   : > { %v5928_v47 = vpop.f32.mrf.mxu0 }
 0x2bb   : > { %v1953_v56 = vadd.f32 %v5928_v47, %v7586_v61 }
 0x2bc   : > { %v1944_v54 = vpop.f32.mrf.mxu0 }
 0x2bd   : > { %v1945_v28 = vadd.f32 %v7586_v61, %v1944_v54  ;;  %v2081_v3 = vmax.f32 %v1953_v56, 0.0 }
 0x2be   : > { %v5929_v27 = vpop.f32.mrf.mxu0 }
 0x2bf   : > { %v1956_v35 = vadd.f32 %v5929_v27, %v7586_v61  ;;  %v2079_v31 = vmax.f32 %v1945_v28, 0.0 }
 0x2c0   : > { %v1947_v37 = vpop.f32.mrf.mxu0 }
 0x2c1   : > { %v1948_v6 = vadd.f32 %v7586_v61, %v1947_v37  ;;  %v2082_v49 = vmax.f32 %v1956_v35, 0.0 }
 0x2c3   : > { %v2080_v33 = vmax.f32 %v1948_v6, 0.0  ;;  %v2124_v17 = vpack.c.bf16 %v2082_v49, %v2081_v3 }
 0x2c5   : > { %v2123_v4 = vpack.c.bf16 %v2080_v33, %v2079_v31 }
 0x2c7   : > { %6006 = vmatprep.mubr.bf16.mxu1 %v2123_v4 }
 0x2c8   : > { %6007 = vmatmul.mubr.bf16.gmra.mxu1 %v2124_v17 }
 0x2cb   : > { %v5968_v43 = vpop.f32.mrf.mxu1 }
 0x2cc   : > { %v2251_v16 = vadd.f32 %v5968_v43, %v7764_v60 }
 0x2cd   : > { %v2242_v63 = vpop.f32.mrf.mxu1 }
 0x2ce   : > { %v2243_v26 = vadd.f32 %v7764_v60, %v2242_v63  ;;  %v2499_v36 = vmax.f32 %v2251_v16, 0.0 }
 0x2cf   : > { %v5969_v14 = vpop.f32.mrf.mxu1 }
 0x2d0   : > { %v2254_v52 = vadd.f32 %v5969_v14, %v7764_v60  ;;  %v2497_v62 = vmax.f32 %v2243_v26, 0.0 }
 0x2d1   : > { %v2245_v24 = vpop.f32.mrf.mxu1 }
 0x2d2   : > { %v2246_v13 = vadd.f32 %v7764_v60, %v2245_v24  ;;  %v2500_v25 = vmax.f32 %v2254_v52, 0.0 }
 0x2d3   : > { %v5972_v18 = vpop.f32.mrf.mxu1 }
 0x2d4   : > { %v2498_v20 = vmax.f32 %v2246_v13, 0.0  ;;  %v2562_v2 = vpack.c.bf16 %v2500_v25, %v2499_v36  ;;  %v2267_v11 = vadd.f32 %v5972_v18, %v7764_v60 }
 0x2d5   : > { %v2258_v8 = vpop.f32.mrf.mxu1 }
 0x2d6   : > { %v2561_v21 = vpack.c.bf16 %v2498_v20, %v2497_v62  ;;  %v2259_v51 = vadd.f32 %v7764_v60, %v2258_v8  ;;  %v2503_v57 = vmax.f32 %v2267_v11, 0.0 }
 0x2d7   : > { %v5973_v12 = vpop.f32.mrf.mxu1 }
 0x2d8   : > { %v2270_v22 = vadd.f32 %v5973_v12, %v7764_v60  ;;  %6046 = vmatprep.mubr.bf16.mxu0 %v2561_v21  ;;  %v2501_v50 = vmax.f32 %v2259_v51, 0.0 }
 0x2d9   : > { %v5932_v29 = vpop.f32.mrf.mxu0  ;;  %v2261_v5 = vpop.f32.mrf.mxu1  ;;  %6047 = vmatmul.mubr.bf16.vlgmr.msra.gmra.mxu0 %v2562_v2  ;;  %v6598_v2 = vld [vmem:[%s8526_s3 + $0xf8] sm:$0xff]  }
 0x2da   : > { %v2262_v7 = vadd.f32 %v7764_v60, %v2261_v5  ;;  %v2504_v40 = vmax.f32 %v2270_v22, 0.0  ;;  %v1969_v9 = vadd.f32 %v5932_v29, %v7586_v61  ;;  %6110 = vmatprep.subr.bf16.mxu1 %v6598_v2 }
 0x2db   : > { %v1960_v30 = vpop.f32.mrf.mxu0  ;;  %v5976_v45 = vpop.f32.mrf.mxu1  ;;  %6111 = vmatpush3.bf16.msra.mxu1 %v6598_v2 }
 0x2dc   : > { %v2502_v1 = vmax.f32 %v2262_v7, 0.0  ;;  %v1961_v46 = vadd.f32 %v7586_v61, %v1960_v30  ;;  %v2564_v58 = vpack.c.bf16 %v2504_v40, %v2503_v57  ;;  %v2283_v0 = vadd.f32 %v5976_v45, %v7764_v60 }
 0x2dd   : > { %v5933_v34 = vpop.f32.mrf.mxu0  ;;  %v2274_v10 = vpop.f32.mrf.mxu1  ;;  %v2085_v39 = vmax.f32 %v1969_v9, 0.0 }
 0x2de   : > { %v1972_v41 = vadd.f32 %v5933_v34, %v7586_v61  ;;  %v2563_v19 = vpack.c.bf16 %v2502_v1, %v2501_v50  ;;  %v2275_v23 = vadd.f32 %v7764_v60, %v2274_v10  ;;  %v2083_v38 = vmax.f32 %v1961_v46, 0.0 }
 0x2df   : > { %v1963_v55 = vpop.f32.mrf.mxu0  ;;  %v5977_v15 = vpop.f32.mrf.mxu1  ;;  %v2507_v56 = vmax.f32 %v2283_v0, 0.0 }
 0x2e0   : > { %v1964_v44 = vadd.f32 %v7586_v61, %v1963_v55  ;;  %v2086_v59 = vmax.f32 %v1972_v41, 0.0  ;;  %v2286_v48 = vadd.f32 %v5977_v15, %v7764_v60  ;;  %6050 = vmatprep.mubr.bf16.mxu0 %v2563_v19  ;;  %v2505_v28 = vmax.f32 %v2275_v23, 0.0 }
 0x2e1   : > { %v2277_v42 = vpop.f32.mrf.mxu1  ;;  %6051 = vmatmul.mubr.bf16.gmra.mxu0 %v2564_v58 }
 0x2e2   : > { %v2084_v53 = vmax.f32 %v1964_v44, 0.0  ;;  %v2278_v32 = vadd.f32 %v7764_v60, %v2277_v42  ;;  %v2508_v47 = vmax.f32 %v2286_v48, 0.0  ;;  %v2126_v61 = vpack.c.bf16 %v2086_v59, %v2085_v39  ;;  %v7800_v59 = vld [vmem:[%s8527_s4] ss:$0 sm:$0xff] }
 0x2e3   : > { %v5980_v54 = vpop.f32.mrf.mxu1 }
 0x2e4   : > { %v2125_v27 = vpack.c.bf16 %v2084_v53, %v2083_v38  ;;  %v2506_v35 = vmax.f32 %v2278_v32, 0.0  ;;  %v2566_v49 = vpack.c.bf16 %v2508_v47, %v2507_v56  ;;  %v2299_v4 = vadd.f32 %v5980_v54, %v7764_v60 }
 0x2e5   : > { %v2290_v37 = vpop.f32.mrf.mxu1 }
 0x2e6   : > { %6010 = vmatprep.mubr.bf16.mxu1 %v2125_v27  ;;  %v2565_v6 = vpack.c.bf16 %v2506_v35, %v2505_v28  ;;  %v2291_v33 = vadd.f32 %v7764_v60, %v2290_v37  ;;  %v2511_v16 = vmax.f32 %v2299_v4, 0.0 }
 0x2e7   : > { %6011 = vmatmul.mubr.bf16.gmra.mxu1 %v2126_v61  ;;  %v5981_v31 = vpop.f32.mrf.mxu1 }
 0x2e8   : > { %v2302_v3 = vadd.f32 %v5981_v31, %v7764_v60  ;;  %6054 = vmatprep.mubr.bf16.mxu0 %v2565_v6  ;;  %v2509_v26 = vmax.f32 %v2291_v33, 0.0  ;;  %v6599_v31 = vld [vmem:[%s8526_s3 + $0xf0] sm:$0xff]  }
 0x2e9   : > { %v2293_v17 = vpop.f32.mrf.mxu1  ;;  %6055 = vmatmul.mubr.bf16.gmra.mxu0 %v2566_v49  ;;  %6112 = vmatprep.subr.bf16.mxu1 %v6599_v31 }
 0x2ea   : > { %v2294_v43 = vadd.f32 %v7764_v60, %v2293_v17  ;;  %v2512_v63 = vmax.f32 %v2302_v3, 0.0  ;;  %6113 = vmatpush3.bf16.msra.mxu1 %v6599_v31 }
 0x2eb   : > { %v5984_v14 = vpop.f32.mrf.mxu1 }
 0x2ec   : > { %v2510_v52 = vmax.f32 %v2294_v43, 0.0  ;;  %v2568_v25 = vpack.c.bf16 %v2512_v63, %v2511_v16  ;;  %v2315_v36 = vadd.f32 %v5984_v14, %v7764_v60  ;;  %v6600_v63 = vld [vmem:[%s8526_s3 + $0xe8] sm:$0xff]   ;;  %v6602_v16 = vld [vmem:[%s8526_s3 + $0xd8] sm:$0xff]  }
 0x2ed   : > { %v2306_v24 = vpop.f32.mrf.mxu1  ;;  %6114 = vmatprep.subr.bf16.mxu1 %v6600_v63 }
 0x2ee   : > { %v2567_v13 = vpack.c.bf16 %v2510_v52, %v2509_v26  ;;  %v2307_v62 = vadd.f32 %v7764_v60, %v2306_v24  ;;  %v2515_v11 = vmax.f32 %v2315_v36, 0.0  ;;  %6115 = vmatpush3.bf16.msra.mxu1 %v6600_v63  ;;  %v6601_v52 = vld [vmem:[%s8526_s3 + $0xe0] sm:$0xff]   ;;  %v6603_v24 = vld [vmem:[%s8526_s3 + $0xd0] sm:$0xff]  }
 0x2ef   : > { %v5985_v18 = vpop.f32.mrf.mxu1  ;;  %6116 = vmatprep.subr.bf16.mxu1 %v6601_v52 }
 0x2f0   : > { %v2318_v20 = vadd.f32 %v5985_v18, %v7764_v60  ;;  %6058 = vmatprep.mubr.bf16.mxu0 %v2567_v13  ;;  %v2513_v22 = vmax.f32 %v2307_v62, 0.0  ;;  %v6604_v18 = vld [vmem:[%s8526_s3 + $0xc8] sm:$0xff]  }
 0x2f1   : > { %v2309_v8 = vpop.f32.mrf.mxu1  ;;  %6059 = vmatmul.mubr.bf16.gmra.mxu0 %v2568_v25 }
 0x2f2   : > { %v2310_v21 = vadd.f32 %v7764_v60, %v2309_v8  ;;  %v2516_v12 = vmax.f32 %v2318_v20, 0.0  ;;  %6117 = vmatpush3.bf16.msra.mxu1 %v6601_v52 }
 0x2f3   : > { %v5988_v51 = vpop.f32.mrf.mxu1  ;;  %6118 = vmatprep.subr.bf16.mxu1 %v6602_v16 }
 0x2f4   : > { %v2514_v29 = vmax.f32 %v2310_v21, 0.0  ;;  %v2570_v30 = vpack.c.bf16 %v2516_v12, %v2515_v11  ;;  %v2331_v1 = vadd.f32 %v5988_v51, %v7764_v60  ;;  %v6605_v12 = vld [vmem:[%s8526_s3 + $0xc0] sm:$0xff]  }
 0x2f5   : > { %v2322_v5 = vpop.f32.mrf.mxu1 }
 0x2f6   : > { %v2569_v7 = vpack.c.bf16 %v2514_v29, %v2513_v22  ;;  %v2323_v45 = vadd.f32 %v7764_v60, %v2322_v5  ;;  %v2519_v55 = vmax.f32 %v2331_v1, 0.0  ;;  %6119 = vmatpush3.bf16.msra.mxu1 %v6602_v16 }
 0x2f7   : > { %v5989_v40 = vpop.f32.mrf.mxu1  ;;  %6120 = vmatprep.subr.bf16.mxu1 %v6603_v24 }
 0x2f8   : > { %v2334_v50 = vadd.f32 %v5989_v40, %v7764_v60  ;;  %6062 = vmatprep.mubr.bf16.mxu0 %v2569_v7  ;;  %v2517_v10 = vmax.f32 %v2323_v45, 0.0 }
 0x2f9   : > { %v2325_v34 = vpop.f32.mrf.mxu1  ;;  %6063 = vmatmul.mubr.bf16.gmra.mxu0 %v2570_v30 }
 0x2fa   : > { %v2326_v57 = vadd.f32 %v7764_v60, %v2325_v34  ;;  %v2520_v46 = vmax.f32 %v2334_v50, 0.0  ;;  %6121 = vmatpush3.bf16.msra.mxu1 %v6603_v24 }
 0x2fb   : > { %6122 = vmatprep.subr.bf16.mxu1 %v6604_v18 }
 0x2fc   : > { %v5936_v41 = vpop.f32.mrf.mxu0  ;;  %v2518_v9 = vmax.f32 %v2326_v57, 0.0  ;;  %v2572_v44 = vpack.c.bf16 %v2520_v46, %v2519_v55 }
 0x2fd   : > { %v1985_v38 = vadd.f32 %v7800_v59, %v5936_v41 }
 0x2fe   : > { %v1976_v19 = vpop.f32.mrf.mxu0  ;;  %v2571_v58 = vpack.c.bf16 %v2518_v9, %v2517_v10  ;;  %6123 = vmatpush3.bf16.msra.mxu1 %v6604_v18 }
 0x2ff   : > { %v1977_v23 = vadd.f32 %v7800_v59, %v1976_v19  ;;  %v2089_v54 = vmax.f32 %v1985_v38, 0.0  ;;  %6124 = vmatprep.subr.bf16.mxu1 %v6605_v12 }
 0x300   : > { %v5937_v15 = vpop.f32.mrf.mxu0  ;;  %6066 = vmatprep.mubr.bf16.mxu0 %v2571_v58 }
 0x301   : > { %v1988_v48 = vadd.f32 %v7800_v59, %v5937_v15  ;;  %6067 = vmatmul.mubr.bf16.gmra.mxu0 %v2572_v44  ;;  %v2087_v32 = vmax.f32 %v1977_v23, 0.0 }
 0x302   : > { %v1979_v0 = vpop.f32.mrf.mxu0  ;;  %6125 = vmatpush3.bf16.msra.mxu1 %v6605_v12 }
 0x303   : > { %v1980_v53 = vadd.f32 %v7800_v59, %v1979_v0  ;;  %v2090_v42 = vmax.f32 %v1988_v48, 0.0 }
 0x304   : > { %v5992_v39 = vpop.f32.mrf.mxu1 }
 0x305   : > { %v2088_v47 = vmax.f32 %v1980_v53, 0.0  ;;  %v2128_v28 = vpack.c.bf16 %v2090_v42, %v2089_v54  ;;  %v2347_v6 = vadd.f32 %v5992_v39, %v7764_v60 }
 0x306   : > { %v2338_v27 = vpop.f32.mrf.mxu1 }
 0x307   : > { %v2127_v61 = vpack.c.bf16 %v2088_v47, %v2087_v32  ;;  %v2339_v56 = vadd.f32 %v7764_v60, %v2338_v27  ;;  %v2523_v43 = vmax.f32 %v2347_v6, 0.0 }
 0x308   : > { %v5993_v35 = vpop.f32.mrf.mxu1 }
 0x309   : > { %v2350_v37 = vadd.f32 %v5993_v35, %v7764_v60  ;;  %6014 = vmatprep.mubr.bf16.mxu1 %v2127_v61  ;;  %v2521_v4 = vmax.f32 %v2339_v56, 0.0 }
 0x30a   : > { %v2341_v49 = vpop.f32.mrf.mxu1  ;;  %6015 = vmatmul.mubr.bf16.gmra.mxu1 %v2128_v28 }
 0x30b   : > { %v2342_v33 = vadd.f32 %v7764_v60, %v2341_v49  ;;  %v2524_v3 = vmax.f32 %v2350_v37, 0.0 }
 0x30d   : > { %v2522_v17 = vmax.f32 %v2342_v33, 0.0  ;;  %v2574_v26 = vpack.c.bf16 %v2524_v3, %v2523_v43 }
 0x30f   : > { %v2573_v14 = vpack.c.bf16 %v2522_v17, %v2521_v4 }
 0x311   : > { %6070 = vmatprep.mubr.bf16.mxu0 %v2573_v14 }
 0x312   : > { %6071 = vmatmul.mubr.bf16.gmra.mxu0 %v2574_v26 }
 0x31b   : > { %v5940_v13 = vpop.f32.mrf.mxu0 }
 0x31c   : > { %v2001_v8 = vadd.f32 %v7800_v59, %v5940_v13 }
 0x31d   : > { %v1992_v25 = vpop.f32.mrf.mxu0 }
 0x31e   : > { %v1993_v20 = vadd.f32 %v7800_v59, %v1992_v25  ;;  %v2093_v5 = vmax.f32 %v2001_v8, 0.0 }
 0x31f   : > { %v5941_v62 = vpop.f32.mrf.mxu0 }
 0x320   : > { %v2004_v36 = vadd.f32 %v7800_v59, %v5941_v62  ;;  %v2091_v29 = vmax.f32 %v1993_v20, 0.0 }
 0x321   : > { %v1995_v21 = vpop.f32.mrf.mxu0 }
 0x322   : > { %v1996_v2 = vadd.f32 %v7800_v59, %v1995_v21  ;;  %v2094_v51 = vmax.f32 %v2004_v36, 0.0 }
 0x323   : > { %v5996_v22 = vpop.f32.mrf.mxu1 }
 0x324   : > { %v2092_v11 = vmax.f32 %v1996_v2, 0.0  ;;  %v2130_v40 = vpack.c.bf16 %v2094_v51, %v2093_v5  ;;  %v2363_v34 = vadd.f32 %v5996_v22, %v7764_v60 }
 0x325   : > { %v2354_v7 = vpop.f32.mrf.mxu1 }
 0x326   : > { %v2129_v30 = vpack.c.bf16 %v2092_v11, %v2091_v29  ;;  %v2355_v50 = vadd.f32 %v7764_v60, %v2354_v7  ;;  %v2527_v55 = vmax.f32 %v2363_v34, 0.0 }
 0x327   : > { %v5997_v45 = vpop.f32.mrf.mxu1 }
 0x328   : > { %v2366_v1 = vadd.f32 %v5997_v45, %v7764_v60  ;;  %6018 = vmatprep.mubr.bf16.mxu1 %v2129_v30  ;;  %v2525_v10 = vmax.f32 %v2355_v50, 0.0 }
 0x329   : > { %v2357_v57 = vpop.f32.mrf.mxu1  ;;  %6019 = vmatmul.mubr.bf16.gmra.mxu1 %v2130_v40 }
 0x32a   : > { %v2358_v46 = vadd.f32 %v7764_v60, %v2357_v57  ;;  %v2528_v41 = vmax.f32 %v2366_v1, 0.0 }
 0x32c   : > { %v2526_v9 = vmax.f32 %v2358_v46, 0.0  ;;  %v2576_v58 = vpack.c.bf16 %v2528_v41, %v2527_v55 }
 0x32e   : > { %v2575_v19 = vpack.c.bf16 %v2526_v9, %v2525_v10 }
 0x330   : > { %6074 = vmatprep.mubr.bf16.mxu0 %v2575_v19 }
 0x331   : > { %6075 = vmatmul.mubr.bf16.gmra.mxu0 %v2576_v58 }
 0x33e   : > { %v5944_v44 = vpop.f32.mrf.mxu0 }
 0x33f   : > { %v2017_v0 = vadd.f32 %v7800_v59, %v5944_v44 }
 0x340   : > { %v2008_v15 = vpop.f32.mrf.mxu0 }
 0x341   : > { %v2009_v48 = vadd.f32 %v7800_v59, %v2008_v15  ;;  %v2097_v27 = vmax.f32 %v2017_v0, 0.0 }
 0x342   : > { %v5945_v23 = vpop.f32.mrf.mxu0 }
 0x343   : > { %v2020_v38 = vadd.f32 %v7800_v59, %v5945_v23  ;;  %v2095_v47 = vmax.f32 %v2009_v48, 0.0 }
 0x344   : > { %v2011_v53 = vpop.f32.mrf.mxu0 }
 0x345   : > { %v2012_v42 = vadd.f32 %v7800_v59, %v2011_v53  ;;  %v2098_v39 = vmax.f32 %v2020_v38, 0.0 }
 0x346   : > { %v6000_v32 = vpop.f32.mrf.mxu1 }
 0x347   : > { %v2096_v54 = vmax.f32 %v2012_v42, 0.0  ;;  %v2132_v35 = vpack.c.bf16 %v2098_v39, %v2097_v27  ;;  %v2379_v49 = vadd.f32 %v6000_v32, %v7764_v60  ;;  %v7862_v32 = vld [vmem:[%s8527_s4 + $0x2] ss:$0 sm:$0xff] }
 0x348   : > { %v2370_v61 = vpop.f32.mrf.mxu1 }
 0x349   : > { %v2131_v28 = vpack.c.bf16 %v2096_v54, %v2095_v47  ;;  %v2371_v37 = vadd.f32 %v7764_v60, %v2370_v61  ;;  %v2531_v43 = vmax.f32 %v2379_v49, 0.0 }
 0x34a   : > { %v6001_v56 = vpop.f32.mrf.mxu1 }
 0x34b   : > { %v2382_v6 = vadd.f32 %v6001_v56, %v7764_v60  ;;  %6022 = vmatprep.mubr.bf16.mxu1 %v2131_v28  ;;  %v2529_v4 = vmax.f32 %v2371_v37, 0.0 }
 0x34c   : > { %v2373_v31 = vpop.f32.mrf.mxu1  ;;  %6023 = vmatmul.mubr.bf16.gmra.mxu1 %v2132_v35 }
 0x34d   : > { %v2374_v33 = vadd.f32 %v7764_v60, %v2373_v31  ;;  %v2532_v3 = vmax.f32 %v2382_v6, 0.0 }
 0x34f   : > { %v2530_v17 = vmax.f32 %v2374_v33, 0.0  ;;  %v2578_v14 = vpack.c.bf16 %v2532_v3, %v2531_v43 }
 0x351   : > { %v2577_v63 = vpack.c.bf16 %v2530_v17, %v2529_v4 }
 0x353   : > { %6078 = vmatprep.mubr.bf16.mxu0 %v2577_v63 }
 0x354   : > { %6079 = vmatmul.mubr.bf16.gmra.mxu0 %v2578_v14 }
 0x35d   : > { %v5948_v26 = vpop.f32.mrf.mxu0 }
 0x35e   : > { %v2033_v25 = vadd.f32 %v7800_v59, %v5948_v26 }
 0x35f   : > { %v2024_v52 = vpop.f32.mrf.mxu0 }
 0x360   : > { %v2025_v24 = vadd.f32 %v7800_v59, %v2024_v52  ;;  %v2101_v2 = vmax.f32 %v2033_v25, 0.0 }
 0x361   : > { %v5949_v16 = vpop.f32.mrf.mxu0 }
 0x362   : > { %v2036_v13 = vadd.f32 %v7800_v59, %v5949_v16  ;;  %v2099_v8 = vmax.f32 %v2025_v24, 0.0 }
 0x363   : > { %v2027_v18 = vpop.f32.mrf.mxu0 }
 0x364   : > { %v2028_v62 = vadd.f32 %v7800_v59, %v2027_v18  ;;  %v2102_v20 = vmax.f32 %v2036_v13, 0.0 }
 0x365   : > { %v6004_v36 = vpop.f32.mrf.mxu1 }
 0x366   : > { %v2100_v21 = vmax.f32 %v2028_v62, 0.0  ;;  %v2134_v22 = vpack.c.bf16 %v2102_v20, %v2101_v2  ;;  %v2395_v7 = vadd.f32 %v6004_v36, %v7764_v60 }
 0x367   : > { %v2386_v12 = vpop.f32.mrf.mxu1 }
 0x368   : > { %v2133_v51 = vpack.c.bf16 %v2100_v21, %v2099_v8  ;;  %v2387_v11 = vadd.f32 %v7764_v60, %v2386_v12  ;;  %v2535_v1 = vmax.f32 %v2395_v7, 0.0 }
 0x369   : > { %v6005_v29 = vpop.f32.mrf.mxu1 }
 0x36a   : > { %v2398_v5 = vadd.f32 %v6005_v29, %v7764_v60  ;;  %6026 = vmatprep.mubr.bf16.mxu1 %v2133_v51  ;;  %v2533_v45 = vmax.f32 %v2387_v11, 0.0 }
 0x36b   : > { %v2389_v30 = vpop.f32.mrf.mxu1  ;;  %6027 = vmatmul.mubr.bf16.gmra.mxu1 %v2134_v22 }
 0x36c   : > { %v2390_v59 = vadd.f32 %v7764_v60, %v2389_v30  ;;  %v2536_v40 = vmax.f32 %v2398_v5, 0.0 }
 0x36e   : > { %v2534_v50 = vmax.f32 %v2390_v59, 0.0  ;;  %v2580_v57 = vpack.c.bf16 %v2536_v40, %v2535_v1 }
 0x370   : > { %v2579_v34 = vpack.c.bf16 %v2534_v50, %v2533_v45 }
 0x372   : > { %6082 = vmatprep.mubr.bf16.mxu0 %v2579_v34 }
 0x373   : > { %6083 = vmatmul.mubr.bf16.gmra.mxu0 %v2580_v57 }
 0x388   : > { %v6008_v46 = vpop.f32.mrf.mxu1 }
 0x389   : > { %v2411_v19 = vadd.f32 %v6008_v46, %v7764_v60 }
 0x38a   : > { %v2402_v41 = vpop.f32.mrf.mxu1 }
 0x38b   : > { %v2403_v9 = vadd.f32 %v7764_v60, %v2402_v41  ;;  %v2539_v38 = vmax.f32 %v2411_v19, 0.0 }
 0x38c   : > { %v6009_v10 = vpop.f32.mrf.mxu1 }
 0x38d   : > { %v2414_v55 = vadd.f32 %v6009_v10, %v7764_v60  ;;  %v2537_v23 = vmax.f32 %v2403_v9, 0.0 }
 0x38e   : > { %v2405_v58 = vpop.f32.mrf.mxu1 }
 0x38f   : > { %v2406_v44 = vadd.f32 %v7764_v60, %v2405_v58  ;;  %v2540_v15 = vmax.f32 %v2414_v55, 0.0 }
 0x391   : > { %v2538_v48 = vmax.f32 %v2406_v44, 0.0  ;;  %v2582_v53 = vpack.c.bf16 %v2540_v15, %v2539_v38 }
 0x393   : > { %v2581_v0 = vpack.c.bf16 %v2538_v48, %v2537_v23 }
 0x395   : > { %6086 = vmatprep.mubr.bf16.mxu0 %v2581_v0 }
 0x396   : > { %6087 = vmatmul.mubr.bf16.gmra.mxu0 %v2582_v53 }
 0x399   : > { %v6048_v42 = vpop.f32.mrf.mxu0 }
 0x39a   : > { %v2709_v61 = vadd.f32 %v6048_v42, %v7862_v32 }
 0x39b   : > { %v2700_v39 = vpop.f32.mrf.mxu0 }
 0x39c   : > { %v2701_v54 = vadd.f32 %v7862_v32, %v2700_v39  ;;  %v2957_v31 = vmax.f32 %v2709_v61, 0.0 }
 0x39d   : > { %v6049_v47 = vpop.f32.mrf.mxu0 }
 0x39e   : > { %v2712_v27 = vadd.f32 %v6049_v47, %v7862_v32  ;;  %v2955_v6 = vmax.f32 %v2701_v54, 0.0 }
 0x39f   : > { %v2703_v28 = vpop.f32.mrf.mxu0 }
 0x3a0   : > { %v2704_v35 = vadd.f32 %v7862_v32, %v2703_v28  ;;  %v2958_v56 = vmax.f32 %v2712_v27, 0.0 }
 0x3a1   : > { %v6052_v37 = vpop.f32.mrf.mxu0 }
 0x3a2   : > { %v2956_v49 = vmax.f32 %v2704_v35, 0.0  ;;  %v3020_v4 = vpack.c.bf16 %v2958_v56, %v2957_v31  ;;  %v2725_v26 = vadd.f32 %v6052_v37, %v7862_v32 }
 0x3a3   : > { %v2716_v33 = vpop.f32.mrf.mxu0 }
 0x3a4   : > { %v3019_v3 = vpack.c.bf16 %v2956_v49, %v2955_v6  ;;  %v2717_v43 = vadd.f32 %v7862_v32, %v2716_v33  ;;  %v2961_v36 = vmax.f32 %v2725_v26, 0.0 }
 0x3a5   : > { %v6053_v17 = vpop.f32.mrf.mxu0 }
 0x3a6   : > { %v2728_v63 = vadd.f32 %v6053_v17, %v7862_v32  ;;  %6126 = vmatprep.mubr.bf16.mxu1 %v3019_v3  ;;  %v2959_v18 = vmax.f32 %v2717_v43, 0.0  ;;  %v6606_v17 = vld [vmem:[%s8526_s3 + $0x138] sm:$0xff]  }
 0x3a7   : > { %v6012_v14 = vpop.f32.mrf.mxu1  ;;  %v2719_v52 = vpop.f32.mrf.mxu0  ;;  %6127 = vmatmul.mubr.bf16.vlgmr.msra.gmra.mxu1 %v3020_v4  ;;  %6190 = vmatprep.subr.bf16.mxu0 %v6606_v17 }
 0x3a8   : > { %v2720_v16 = vadd.f32 %v7862_v32, %v2719_v52  ;;  %v2962_v13 = vmax.f32 %v2728_v63, 0.0  ;;  %v2427_v12 = vadd.f32 %v6012_v14, %v7764_v60  ;;  %6191 = vmatpush3.bf16.msra.mxu0 %v6606_v17 }
 0x3a9   : > { %v2418_v24 = vpop.f32.mrf.mxu1  ;;  %v6056_v25 = vpop.f32.mrf.mxu0 }
 0x3aa   : > { %v2960_v62 = vmax.f32 %v2720_v16, 0.0  ;;  %v2419_v8 = vadd.f32 %v7764_v60, %v2418_v24  ;;  %v3022_v29 = vpack.c.bf16 %v2962_v13, %v2961_v36  ;;  %v2741_v45 = vadd.f32 %v6056_v25, %v7862_v32 }
 0x3ab   : > { %v6013_v20 = vpop.f32.mrf.mxu1  ;;  %v2732_v2 = vpop.f32.mrf.mxu0  ;;  %v2543_v34 = vmax.f32 %v2427_v12, 0.0 }
 0x3ac   : > { %v2430_v21 = vadd.f32 %v6013_v20, %v7764_v60  ;;  %v3021_v22 = vpack.c.bf16 %v2960_v62, %v2959_v18  ;;  %v2733_v30 = vadd.f32 %v7862_v32, %v2732_v2  ;;  %v2541_v40 = vmax.f32 %v2419_v8, 0.0 }
 0x3ad   : > { %v2421_v51 = vpop.f32.mrf.mxu1  ;;  %v6057_v5 = vpop.f32.mrf.mxu0  ;;  %v2965_v58 = vmax.f32 %v2741_v45, 0.0 }
 0x3ae   : > { %v2422_v11 = vadd.f32 %v7764_v60, %v2421_v51  ;;  %v2544_v7 = vmax.f32 %v2430_v21, 0.0  ;;  %v2744_v59 = vadd.f32 %v6057_v5, %v7862_v32  ;;  %6130 = vmatprep.mubr.bf16.mxu1 %v3021_v22  ;;  %v2963_v55 = vmax.f32 %v2733_v30, 0.0 }
 0x3af   : > { %v2735_v1 = vpop.f32.mrf.mxu0  ;;  %6131 = vmatmul.mubr.bf16.gmra.mxu1 %v3022_v29 }
 0x3b0   : > { %v2542_v50 = vmax.f32 %v2422_v11, 0.0  ;;  %v2736_v57 = vadd.f32 %v7862_v32, %v2735_v1  ;;  %v2966_v46 = vmax.f32 %v2744_v59, 0.0  ;;  %v2584_v9 = vpack.c.bf16 %v2544_v7, %v2543_v34 }
 0x3b1   : > { %v6060_v41 = vpop.f32.mrf.mxu0 }
 0x3b2   : > { %v2583_v10 = vpack.c.bf16 %v2542_v50, %v2541_v40  ;;  %v2964_v19 = vmax.f32 %v2736_v57, 0.0  ;;  %v3024_v23 = vpack.c.bf16 %v2966_v46, %v2965_v58  ;;  %v2757_v53 = vadd.f32 %v6060_v41, %v7862_v32 }
 0x3b3   : > { %v2748_v44 = vpop.f32.mrf.mxu0 }
 0x3b4   : > { %6090 = vmatprep.mubr.bf16.mxu0 %v2583_v10  ;;  %v3023_v15 = vpack.c.bf16 %v2964_v19, %v2963_v55  ;;  %v2749_v38 = vadd.f32 %v7862_v32, %v2748_v44  ;;  %v2969_v28 = vmax.f32 %v2757_v53, 0.0 }
 0x3b5   : > { %6091 = vmatmul.mubr.bf16.gmra.mxu0 %v2584_v9  ;;  %v6061_v48 = vpop.f32.mrf.mxu0 }
 0x3b6   : > { %v2760_v0 = vadd.f32 %v6061_v48, %v7862_v32  ;;  %6134 = vmatprep.mubr.bf16.mxu1 %v3023_v15  ;;  %v2967_v27 = vmax.f32 %v2749_v38, 0.0  ;;  %v6607_v48 = vld [vmem:[%s8526_s3 + $0x130] sm:$0xff]  }
 0x3b7   : > { %v2751_v42 = vpop.f32.mrf.mxu0  ;;  %6135 = vmatmul.mubr.bf16.gmra.mxu1 %v3024_v23  ;;  %6192 = vmatprep.subr.bf16.mxu0 %v6607_v48 }
 0x3b8   : > { %v2752_v39 = vadd.f32 %v7862_v32, %v2751_v42  ;;  %v2970_v47 = vmax.f32 %v2760_v0, 0.0  ;;  %6193 = vmatpush3.bf16.msra.mxu0 %v6607_v48 }
 0x3b9   : > { %v6064_v54 = vpop.f32.mrf.mxu0 }
 0x3ba   : > { %v2968_v61 = vmax.f32 %v2752_v39, 0.0  ;;  %v3026_v37 = vpack.c.bf16 %v2970_v47, %v2969_v28  ;;  %v2773_v33 = vadd.f32 %v6064_v54, %v7862_v32  ;;  %v6608_v47 = vld [vmem:[%s8526_s3 + $0x128] sm:$0xff]   ;;  %v6610_v28 = vld [vmem:[%s8526_s3 + $0x118] sm:$0xff]  }
 0x3bb   : > { %v2764_v35 = vpop.f32.mrf.mxu0  ;;  %6194 = vmatprep.subr.bf16.mxu0 %v6608_v47 }
 0x3bc   : > { %v3025_v56 = vpack.c.bf16 %v2968_v61, %v2967_v27  ;;  %v2765_v49 = vadd.f32 %v7862_v32, %v2764_v35  ;;  %v2973_v52 = vmax.f32 %v2773_v33, 0.0  ;;  %6195 = vmatpush3.bf16.msra.mxu0 %v6608_v47  ;;  %v6609_v61 = vld [vmem:[%s8526_s3 + $0x120] sm:$0xff]   ;;  %v6611_v35 = vld [vmem:[%s8526_s3 + $0x110] sm:$0xff]  }
 0x3bd   : > { %v6065_v6 = vpop.f32.mrf.mxu0  ;;  %6196 = vmatprep.subr.bf16.mxu0 %v6609_v61 }
 0x3be   : > { %v2776_v31 = vadd.f32 %v6065_v6, %v7862_v32  ;;  %6138 = vmatprep.mubr.bf16.mxu1 %v3025_v56  ;;  %v2971_v14 = vmax.f32 %v2765_v49, 0.0  ;;  %v6612_v6 = vld [vmem:[%s8526_s3 + $0x108] sm:$0xff]  }
 0x3bf   : > { %v2767_v3 = vpop.f32.mrf.mxu0  ;;  %6139 = vmatmul.mubr.bf16.gmra.mxu1 %v3026_v37 }
 0x3c0   : > { %v2768_v4 = vadd.f32 %v7862_v32, %v2767_v3  ;;  %v2974_v43 = vmax.f32 %v2776_v31, 0.0  ;;  %6197 = vmatpush3.bf16.msra.mxu0 %v6609_v61 }
 0x3c1   : > { %v6068_v63 = vpop.f32.mrf.mxu0  ;;  %6198 = vmatprep.subr.bf16.mxu0 %v6610_v28 }
 0x3c2   : > { %v2972_v26 = vmax.f32 %v2768_v4, 0.0  ;;  %v3028_v13 = vpack.c.bf16 %v2974_v43, %v2973_v52  ;;  %v2789_v20 = vadd.f32 %v6068_v63, %v7862_v32  ;;  %v6613_v43 = vld [vmem:[%s8526_s3 + $0x100] sm:$0xff]  }
 0x3c3   : > { %v2780_v16 = vpop.f32.mrf.mxu0 }
 0x3c4   : > { %v3027_v24 = vpack.c.bf16 %v2972_v26, %v2971_v14  ;;  %v2781_v18 = vadd.f32 %v7862_v32, %v2780_v16  ;;  %v2977_v22 = vmax.f32 %v2789_v20, 0.0  ;;  %6199 = vmatpush3.bf16.msra.mxu0 %v6610_v28  ;;  %v6650_v28 = vld [vmem:[%s8527_s4 + $0x1] ss:$0 sm:$0xff] }
 0x3c5   : > { %v6069_v25 = vpop.f32.mrf.mxu0  ;;  %6200 = vmatprep.subr.bf16.mxu0 %v6611_v35 }
 0x3c6   : > { %v2792_v62 = vadd.f32 %v6069_v25, %v7862_v32  ;;  %6142 = vmatprep.mubr.bf16.mxu1 %v3027_v24  ;;  %v2975_v12 = vmax.f32 %v2781_v18, 0.0 }
 0x3c7   : > { %v2783_v36 = vpop.f32.mrf.mxu0  ;;  %6143 = vmatmul.mubr.bf16.gmra.mxu1 %v3028_v13 }
 0x3c8   : > { %v2784_v8 = vadd.f32 %v7862_v32, %v2783_v36  ;;  %v2978_v21 = vmax.f32 %v2792_v62, 0.0  ;;  %6201 = vmatpush3.bf16.msra.mxu0 %v6611_v35 }
 0x3c9   : > { %6202 = vmatprep.subr.bf16.mxu0 %v6612_v6 }
 0x3ca   : > { %v6016_v2 = vpop.f32.mrf.mxu1  ;;  %v2976_v51 = vmax.f32 %v2784_v8, 0.0  ;;  %v3030_v5 = vpack.c.bf16 %v2978_v21, %v2977_v22 }
 0x3cb   : > { %v2443_v40 = vadd.f32 %v6016_v2, %v7764_v60 }
 0x3cc   : > { %v2434_v29 = vpop.f32.mrf.mxu1  ;;  %v3029_v11 = vpack.c.bf16 %v2976_v51, %v2975_v12  ;;  %6203 = vmatpush3.bf16.msra.mxu0 %v6612_v6 }
 0x3cd   : > { %v2435_v30 = vadd.f32 %v7764_v60, %v2434_v29  ;;  %v2547_v41 = vmax.f32 %v2443_v40, 0.0  ;;  %6204 = vmatprep.subr.bf16.mxu0 %v6613_v43 }
 0x3ce   : > { %v6017_v7 = vpop.f32.mrf.mxu1  ;;  %6146 = vmatprep.mubr.bf16.mxu1 %v3029_v11 }
 0x3cf   : > { %v2446_v59 = vadd.f32 %v6017_v7, %v7764_v60  ;;  %6147 = vmatmul.mubr.bf16.gmra.mxu1 %v3030_v5  ;;  %v2545_v57 = vmax.f32 %v2435_v30, 0.0 }
 0x3d0   : > { %v2437_v45 = vpop.f32.mrf.mxu1  ;;  %6205 = vmatpush3.bf16.msra.mxu0 %v6613_v43 }
 0x3d1   : > { %v2438_v50 = vadd.f32 %v7764_v60, %v2437_v45  ;;  %v2548_v1 = vmax.f32 %v2446_v59, 0.0 }
 0x3d2   : > { %v6072_v34 = vpop.f32.mrf.mxu0 }
 0x3d3   : > { %v2546_v46 = vmax.f32 %v2438_v50, 0.0  ;;  %v2586_v55 = vpack.c.bf16 %v2548_v1, %v2547_v41  ;;  %v2805_v15 = vadd.f32 %v6072_v34, %v7862_v32 }
 0x3d4   : > { %v2796_v10 = vpop.f32.mrf.mxu0 }
 0x3d5   : > { %v2585_v9 = vpack.c.bf16 %v2546_v46, %v2545_v57  ;;  %v2797_v58 = vadd.f32 %v7862_v32, %v2796_v10  ;;  %v2981_v39 = vmax.f32 %v2805_v15, 0.0 }
 0x3d6   : > { %v6073_v19 = vpop.f32.mrf.mxu0 }
 0x3d7   : > { %v2808_v44 = vadd.f32 %v6073_v19, %v7862_v32  ;;  %6094 = vmatprep.mubr.bf16.mxu0 %v2585_v9  ;;  %v2979_v53 = vmax.f32 %v2797_v58, 0.0 }
 0x3d8   : > { %v2799_v23 = vpop.f32.mrf.mxu0  ;;  %6095 = vmatmul.mubr.bf16.gmra.mxu0 %v2586_v55 }
 0x3d9   : > { %v2800_v38 = vadd.f32 %v7862_v32, %v2799_v23  ;;  %v2982_v0 = vmax.f32 %v2808_v44, 0.0 }
 0x3db   : > { %v2980_v42 = vmax.f32 %v2800_v38, 0.0  ;;  %v3032_v27 = vpack.c.bf16 %v2982_v0, %v2981_v39 }
 0x3dd   : > { %v3031_v54 = vpack.c.bf16 %v2980_v42, %v2979_v53 }
 0x3df   : > { %6150 = vmatprep.mubr.bf16.mxu1 %v3031_v54 }
 0x3e0   : > { %6151 = vmatmul.mubr.bf16.gmra.mxu1 %v3032_v27 }
 0x3e9   : > { %v6020_v56 = vpop.f32.mrf.mxu1 }
 0x3ea   : > { %v2459_v3 = vadd.f32 %v6020_v56, %v7764_v60 }
 0x3eb   : > { %v2450_v37 = vpop.f32.mrf.mxu1 }
 0x3ec   : > { %v2451_v31 = vadd.f32 %v7764_v60, %v2450_v37  ;;  %v2551_v16 = vmax.f32 %v2459_v3, 0.0 }
 0x3ed   : > { %v6021_v49 = vpop.f32.mrf.mxu1 }
 0x3ee   : > { %v2462_v33 = vadd.f32 %v6021_v49, %v7764_v60  ;;  %v2549_v26 = vmax.f32 %v2451_v31, 0.0 }
 0x3ef   : > { %v2453_v4 = vpop.f32.mrf.mxu1 }
 0x3f0   : > { %v2454_v17 = vadd.f32 %v7764_v60, %v2453_v4  ;;  %v2552_v63 = vmax.f32 %v2462_v33, 0.0 }
 0x3f1   : > { %v6076_v14 = vpop.f32.mrf.mxu0 }
 0x3f2   : > { %v2550_v52 = vmax.f32 %v2454_v17, 0.0  ;;  %v2588_v25 = vpack.c.bf16 %v2552_v63, %v2551_v16  ;;  %v2821_v36 = vadd.f32 %v6076_v14, %v7862_v32 }
 0x3f3   : > { %v2812_v24 = vpop.f32.mrf.mxu0 }
 0x3f4   : > { %v2587_v13 = vpack.c.bf16 %v2550_v52, %v2549_v26  ;;  %v2813_v62 = vadd.f32 %v7862_v32, %v2812_v24  ;;  %v2985_v22 = vmax.f32 %v2821_v36, 0.0 }
 0x3f5   : > { %v6077_v18 = vpop.f32.mrf.mxu0 }
 0x3f6   : > { %v2824_v20 = vadd.f32 %v6077_v18, %v7862_v32  ;;  %6098 = vmatprep.mubr.bf16.mxu0 %v2587_v13  ;;  %v2983_v12 = vmax.f32 %v2813_v62, 0.0 }
 0x3f7   : > { %v2815_v8 = vpop.f32.mrf.mxu0  ;;  %6099 = vmatmul.mubr.bf16.gmra.mxu0 %v2588_v25 }
 0x3f8   : > { %v2816_v21 = vadd.f32 %v7862_v32, %v2815_v8  ;;  %v2986_v2 = vmax.f32 %v2824_v20, 0.0 }
 0x3fa   : > { %v2984_v51 = vmax.f32 %v2816_v21, 0.0  ;;  %v3034_v11 = vpack.c.bf16 %v2986_v2, %v2985_v22 }
 0x3fc   : > { %v3033_v29 = vpack.c.bf16 %v2984_v51, %v2983_v12 }
 0x3fe   : > { %6154 = vmatprep.mubr.bf16.mxu1 %v3033_v29 }
 0x3ff   : > { %6155 = vmatmul.mubr.bf16.gmra.mxu1 %v3034_v11 }
 0x40c   : > { %v6024_v5 = vpop.f32.mrf.mxu1 }
 0x40d   : > { %v2475_v45 = vadd.f32 %v6024_v5, %v7764_v60 }
 0x40e   : > { %v2466_v7 = vpop.f32.mrf.mxu1 }
 0x40f   : > { %v2467_v59 = vadd.f32 %v7764_v60, %v2466_v7  ;;  %v2555_v10 = vmax.f32 %v2475_v45, 0.0 }
 0x410   : > { %v6025_v30 = vpop.f32.mrf.mxu1 }
 0x411   : > { %v2478_v40 = vadd.f32 %v6025_v30, %v7764_v60  ;;  %v2553_v46 = vmax.f32 %v2467_v59, 0.0 }
 0x412   : > { %v2469_v50 = vpop.f32.mrf.mxu1 }
 0x413   : > { %v2470_v1 = vadd.f32 %v7764_v60, %v2469_v50  ;;  %v2556_v34 = vmax.f32 %v2478_v40, 0.0 }
 0x414   : > { %v6080_v57 = vpop.f32.mrf.mxu0 }
 0x415   : > { %v2554_v41 = vmax.f32 %v2470_v1, 0.0  ;;  %v2590_v19 = vpack.c.bf16 %v2556_v34, %v2555_v10  ;;  %v2837_v23 = vadd.f32 %v6080_v57, %v7862_v32 }
 0x416   : > { %v2828_v9 = vpop.f32.mrf.mxu0 }
 0x417   : > { %v2589_v55 = vpack.c.bf16 %v2554_v41, %v2553_v46  ;;  %v2829_v44 = vadd.f32 %v7862_v32, %v2828_v9  ;;  %v2989_v42 = vmax.f32 %v2837_v23, 0.0  ;;  %v7954_v46 = vld [vmem:[%s8527_s4 + $0x3] ss:$0 sm:$0xff] }
 0x418   : > { %v6081_v58 = vpop.f32.mrf.mxu0 }
 0x419   : > { %v2840_v15 = vadd.f32 %v6081_v58, %v7862_v32  ;;  %6102 = vmatprep.mubr.bf16.mxu0 %v2589_v55  ;;  %v2987_v0 = vmax.f32 %v2829_v44, 0.0 }
 0x41a   : > { %v2831_v48 = vpop.f32.mrf.mxu0  ;;  %6103 = vmatmul.mubr.bf16.gmra.mxu0 %v2590_v19 }
 0x41b   : > { %v2832_v60 = vadd.f32 %v7862_v32, %v2831_v48  ;;  %v2990_v38 = vmax.f32 %v2840_v15, 0.0 }
 0x41d   : > { %v2988_v53 = vmax.f32 %v2832_v60, 0.0  ;;  %v3036_v47 = vpack.c.bf16 %v2990_v38, %v2989_v42 }
 0x41f   : > { %v3035_v39 = vpack.c.bf16 %v2988_v53, %v2987_v0 }
 0x421   : > { %6158 = vmatprep.mubr.bf16.mxu1 %v3035_v39 }
 0x422   : > { %6159 = vmatmul.mubr.bf16.gmra.mxu1 %v3036_v47 }
 0x42b   : > { %v6028_v54 = vpop.f32.mrf.mxu1 }
 0x42c   : > { %v2491_v37 = vadd.f32 %v6650_v28, %v6028_v54 }
 0x42d   : > { %v2482_v27 = vpop.f32.mrf.mxu1 }
 0x42e   : > { %v2483_v35 = vadd.f32 %v6650_v28, %v2482_v27  ;;  %v2559_v17 = vmax.f32 %v2491_v37, 0.0 }
 0x42f   : > { %v6029_v61 = vpop.f32.mrf.mxu1 }
 0x430   : > { %v2494_v56 = vadd.f32 %v6650_v28, %v6029_v61  ;;  %v2557_v3 = vmax.f32 %v2483_v35, 0.0 }
 0x431   : > { %v2485_v6 = vpop.f32.mrf.mxu1 }
 0x432   : > { %v2486_v49 = vadd.f32 %v6650_v28, %v2485_v6  ;;  %v2560_v31 = vmax.f32 %v2494_v56, 0.0 }
 0x433   : > { %v6084_v33 = vpop.f32.mrf.mxu0 }
 0x434   : > { %v2558_v4 = vmax.f32 %v2486_v49, 0.0  ;;  %v2592_v14 = vpack.c.bf16 %v2560_v31, %v2559_v17  ;;  %v2853_v24 = vadd.f32 %v6084_v33, %v7862_v32 }
 0x435   : > { %v2844_v43 = vpop.f32.mrf.mxu0 }
 0x436   : > { %v2591_v63 = vpack.c.bf16 %v2558_v4, %v2557_v3  ;;  %v2845_v52 = vadd.f32 %v7862_v32, %v2844_v43  ;;  %v2993_v36 = vmax.f32 %v2853_v24, 0.0 }
 0x437   : > { %v6085_v26 = vpop.f32.mrf.mxu0 }
 0x438   : > { %v2856_v16 = vadd.f32 %v6085_v26, %v7862_v32  ;;  %6106 = vmatprep.mubr.bf16.mxu0 %v2591_v63  ;;  %v2991_v62 = vmax.f32 %v2845_v52, 0.0 }
 0x439   : > { %v2847_v13 = vpop.f32.mrf.mxu0  ;;  %6107 = vmatmul.mubr.bf16.gmra.mxu0 %v2592_v14 }
 0x43a   : > { %v2848_v25 = vadd.f32 %v7862_v32, %v2847_v13  ;;  %v2994_v18 = vmax.f32 %v2856_v16, 0.0 }
 0x43c   : > { %v2992_v20 = vmax.f32 %v2848_v25, 0.0  ;;  %v3038_v21 = vpack.c.bf16 %v2994_v18, %v2993_v36 }
 0x43e   : > { %v3037_v8 = vpack.c.bf16 %v2992_v20, %v2991_v62 }
 0x440   : > { %6162 = vmatprep.mubr.bf16.mxu1 %v3037_v8 }
 0x441   : > { %6163 = vmatmul.mubr.bf16.gmra.mxu1 %v3038_v21 }
 0x456   : > { %v6088_v2 = vpop.f32.mrf.mxu0 }
 0x457   : > { %v2869_v11 = vadd.f32 %v6088_v2, %v7862_v32 }
 0x458   : > { %v2860_v12 = vpop.f32.mrf.mxu0 }
 0x459   : > { %v2861_v22 = vadd.f32 %v7862_v32, %v2860_v12  ;;  %v2997_v45 = vmax.f32 %v2869_v11, 0.0 }
 0x45a   : > { %v6089_v51 = vpop.f32.mrf.mxu0 }
 0x45b   : > { %v2872_v29 = vadd.f32 %v6089_v51, %v7862_v32  ;;  %v2995_v59 = vmax.f32 %v2861_v22, 0.0 }
 0x45c   : > { %v2863_v5 = vpop.f32.mrf.mxu0 }
 0x45d   : > { %v2864_v7 = vadd.f32 %v7862_v32, %v2863_v5  ;;  %v2998_v30 = vmax.f32 %v2872_v29, 0.0 }
 0x45f   : > { %v2996_v40 = vmax.f32 %v2864_v7, 0.0  ;;  %v3040_v1 = vpack.c.bf16 %v2998_v30, %v2997_v45 }
 0x461   : > { %v3039_v50 = vpack.c.bf16 %v2996_v40, %v2995_v59 }
 0x463   : > { %6166 = vmatprep.mubr.bf16.mxu1 %v3039_v50 }
 0x464   : > { %6167 = vmatmul.mubr.bf16.gmra.mxu1 %v3040_v1 }
 0x467   : > { %v6128_v34 = vpop.f32.mrf.mxu1 }
 0x468   : > { %v3167_v55 = vadd.f32 %v6128_v34, %v7954_v46 }
 0x469   : > { %v3158_v57 = vpop.f32.mrf.mxu1 }
 0x46a   : > { %v3159_v10 = vadd.f32 %v7954_v46, %v3158_v57  ;;  %v3415_v60 = vmax.f32 %v3167_v55, 0.0 }
 0x46b   : > { %v6129_v41 = vpop.f32.mrf.mxu1 }
 0x46c   : > { %v3170_v9 = vadd.f32 %v6129_v41, %v7954_v46  ;;  %v3413_v23 = vmax.f32 %v3159_v10, 0.0 }
 0x46d   : > { %v3161_v19 = vpop.f32.mrf.mxu1 }
 0x46e   : > { %v3162_v58 = vadd.f32 %v7954_v46, %v3161_v19  ;;  %v3416_v44 = vmax.f32 %v3170_v9, 0.0 }
 0x46f   : > { %v6132_v15 = vpop.f32.mrf.mxu1 }
 0x470   : > { %v3414_v48 = vmax.f32 %v3162_v58, 0.0  ;;  %v3478_v53 = vpack.c.bf16 %v3416_v44, %v3415_v60  ;;  %v3183_v27 = vadd.f32 %v6132_v15, %v7954_v46 }
 0x471   : > { %v3174_v38 = vpop.f32.mrf.mxu1 }
 0x472   : > { %v3477_v0 = vpack.c.bf16 %v3414_v48, %v3413_v23  ;;  %v3175_v39 = vadd.f32 %v7954_v46, %v3174_v38  ;;  %v3419_v33 = vmax.f32 %v3183_v27, 0.0 }
 0x473   : > { %v6133_v42 = vpop.f32.mrf.mxu1 }
 0x474   : > { %v3186_v47 = vadd.f32 %v6133_v42, %v7954_v46  ;;  %6206 = vmatprep.mubr.bf16.mxu0 %v3477_v0  ;;  %v3417_v6 = vmax.f32 %v3175_v39, 0.0  ;;  %v6614_v42 = vld [vmem:[%s8526_s3 + $0x178] sm:$0xff]  }
 0x475   : > { %v6092_v54 = vpop.f32.mrf.mxu0  ;;  %v3177_v61 = vpop.f32.mrf.mxu1  ;;  %6207 = vmatmul.mubr.bf16.vlgmr.msra.gmra.mxu0 %v3478_v53  ;;  %6270 = vmatprep.subr.bf16.mxu1 %v6614_v42 }
 0x476   : > { %v3178_v28 = vadd.f32 %v7954_v46, %v3177_v61  ;;  %v3420_v56 = vmax.f32 %v3186_v47, 0.0  ;;  %v2885_v43 = vadd.f32 %v6092_v54, %v7862_v32  ;;  %6271 = vmatpush3.bf16.msra.mxu1 %v6614_v42 }
 0x477   : > { %v2876_v35 = vpop.f32.mrf.mxu0  ;;  %v6136_v37 = vpop.f32.mrf.mxu1 }
 0x478   : > { %v3418_v49 = vmax.f32 %v3178_v28, 0.0  ;;  %v2877_v3 = vadd.f32 %v7862_v32, %v2876_v35  ;;  %v3480_v26 = vpack.c.bf16 %v3420_v56, %v3419_v33  ;;  %v3199_v62 = vadd.f32 %v6136_v37, %v7954_v46 }
 0x479   : > { %v6093_v31 = vpop.f32.mrf.mxu0  ;;  %v3190_v17 = vpop.f32.mrf.mxu1  ;;  %v3001_v8 = vmax.f32 %v2885_v43, 0.0 }
 0x47a   : > { %v2888_v4 = vadd.f32 %v6093_v31, %v7862_v32  ;;  %v3479_v14 = vpack.c.bf16 %v3418_v49, %v3417_v6  ;;  %v3191_v13 = vadd.f32 %v7954_v46, %v3190_v17  ;;  %v2999_v18 = vmax.f32 %v2877_v3, 0.0 }
 0x47b   : > { %v2879_v63 = vpop.f32.mrf.mxu0  ;;  %v6137_v16 = vpop.f32.mrf.mxu1  ;;  %v3423_v5 = vmax.f32 %v3199_v62, 0.0 }
 0x47c   : > { %v2880_v52 = vadd.f32 %v7862_v32, %v2879_v63  ;;  %v3002_v24 = vmax.f32 %v2888_v4, 0.0  ;;  %v3202_v25 = vadd.f32 %v6137_v16, %v7954_v46  ;;  %6210 = vmatprep.mubr.bf16.mxu0 %v3479_v14  ;;  %v3421_v29 = vmax.f32 %v3191_v13, 0.0 }
 0x47d   : > { %v3193_v36 = vpop.f32.mrf.mxu1  ;;  %6211 = vmatmul.mubr.bf16.gmra.mxu0 %v3480_v26 }
 0x47e   : > { %v3000_v20 = vmax.f32 %v2880_v52, 0.0  ;;  %v3194_v21 = vadd.f32 %v7954_v46, %v3193_v36  ;;  %v3424_v2 = vmax.f32 %v3202_v25, 0.0  ;;  %v3042_v22 = vpack.c.bf16 %v3002_v24, %v3001_v8 }
 0x47f   : > { %v6140_v12 = vpop.f32.mrf.mxu1 }
 0x480   : > { %v3041_v51 = vpack.c.bf16 %v3000_v20, %v2999_v18  ;;  %v3422_v11 = vmax.f32 %v3194_v21, 0.0  ;;  %v3482_v59 = vpack.c.bf16 %v3424_v2, %v3423_v5  ;;  %v3215_v1 = vadd.f32 %v6140_v12, %v7954_v46 }
 0x481   : > { %v3206_v7 = vpop.f32.mrf.mxu1 }
 0x482   : > { %6170 = vmatprep.mubr.bf16.mxu1 %v3041_v51  ;;  %v3481_v30 = vpack.c.bf16 %v3422_v11, %v3421_v29  ;;  %v3207_v45 = vadd.f32 %v7954_v46, %v3206_v7  ;;  %v3427_v19 = vmax.f32 %v3215_v1, 0.0 }
 0x483   : > { %6171 = vmatmul.mubr.bf16.gmra.mxu1 %v3042_v22  ;;  %v6141_v40 = vpop.f32.mrf.mxu1 }
 0x484   : > { %v3218_v50 = vadd.f32 %v6141_v40, %v7954_v46  ;;  %6214 = vmatprep.mubr.bf16.mxu0 %v3481_v30  ;;  %v3425_v9 = vmax.f32 %v3207_v45, 0.0  ;;  %v6615_v40 = vld [vmem:[%s8526_s3 + $0x170] sm:$0xff]  }
 0x485   : > { %v3209_v34 = vpop.f32.mrf.mxu1  ;;  %6215 = vmatmul.mubr.bf16.gmra.mxu0 %v3482_v59  ;;  %6272 = vmatprep.subr.bf16.mxu1 %v6615_v40 }
 0x486   : > { %v3210_v57 = vadd.f32 %v7954_v46, %v3209_v34  ;;  %v3428_v41 = vmax.f32 %v3218_v50, 0.0  ;;  %6273 = vmatpush3.bf16.msra.mxu1 %v6615_v40 }
 0x487   : > { %v6144_v10 = vpop.f32.mrf.mxu1 }
 0x488   : > { %v3426_v55 = vmax.f32 %v3210_v57, 0.0  ;;  %v3484_v15 = vpack.c.bf16 %v3428_v41, %v3427_v19  ;;  %v3231_v38 = vadd.f32 %v6144_v10, %v7954_v46  ;;  %v6616_v41 = vld [vmem:[%s8526_s3 + $0x168] sm:$0xff]   ;;  %v6618_v19 = vld [vmem:[%s8526_s3 + $0x158] sm:$0xff]  }
 0x489   : > { %v3222_v58 = vpop.f32.mrf.mxu1  ;;  %6274 = vmatprep.subr.bf16.mxu1 %v6616_v41 }
 0x48a   : > { %v3483_v44 = vpack.c.bf16 %v3426_v55, %v3425_v9  ;;  %v3223_v48 = vadd.f32 %v7954_v46, %v3222_v58  ;;  %v3431_v61 = vmax.f32 %v3231_v38, 0.0  ;;  %6275 = vmatpush3.bf16.msra.mxu1 %v6616_v41  ;;  %v6617_v55 = vld [vmem:[%s8526_s3 + $0x160] sm:$0xff]   ;;  %v6619_v58 = vld [vmem:[%s8526_s3 + $0x150] sm:$0xff]  }
 0x48b   : > { %v6145_v23 = vpop.f32.mrf.mxu1  ;;  %6276 = vmatprep.subr.bf16.mxu1 %v6617_v55 }
 0x48c   : > { %v3234_v60 = vadd.f32 %v6145_v23, %v7954_v46  ;;  %6218 = vmatprep.mubr.bf16.mxu0 %v3483_v44  ;;  %v3429_v54 = vmax.f32 %v3223_v48, 0.0  ;;  %v6620_v23 = vld [vmem:[%s8526_s3 + $0x148] sm:$0xff]  }
 0x48d   : > { %v3225_v0 = vpop.f32.mrf.mxu1  ;;  %6219 = vmatmul.mubr.bf16.gmra.mxu0 %v3484_v15 }
 0x48e   : > { %v3226_v53 = vadd.f32 %v7954_v46, %v3225_v0  ;;  %v3432_v39 = vmax.f32 %v3234_v60, 0.0  ;;  %6277 = vmatpush3.bf16.msra.mxu1 %v6617_v55 }
 0x48f   : > { %v6148_v47 = vpop.f32.mrf.mxu1  ;;  %6278 = vmatprep.subr.bf16.mxu1 %v6618_v19 }
 0x490   : > { %v3430_v27 = vmax.f32 %v3226_v53, 0.0  ;;  %v3486_v56 = vpack.c.bf16 %v3432_v39, %v3431_v61  ;;  %v3247_v31 = vadd.f32 %v6148_v47, %v7954_v46  ;;  %v6621_v39 = vld [vmem:[%s8526_s3 + $0x140] sm:$0xff]  }
 0x491   : > { %v3238_v28 = vpop.f32.mrf.mxu1 }
 0x492   : > { %v3485_v35 = vpack.c.bf16 %v3430_v27, %v3429_v54  ;;  %v3239_v6 = vadd.f32 %v7954_v46, %v3238_v28  ;;  %v3435_v14 = vmax.f32 %v3247_v31, 0.0  ;;  %6279 = vmatpush3.bf16.msra.mxu1 %v6618_v19  ;;  %v6651_v19 = vld [vmem:[%s8527_s4 + $0x2] ss:$0 sm:$0xff] }
 0x493   : > { %v6149_v37 = vpop.f32.mrf.mxu1  ;;  %6280 = vmatprep.subr.bf16.mxu1 %v6619_v58 }
 0x494   : > { %v3250_v49 = vadd.f32 %v6149_v37, %v7954_v46  ;;  %6222 = vmatprep.mubr.bf16.mxu0 %v3485_v35  ;;  %v3433_v43 = vmax.f32 %v3239_v6, 0.0 }
 0x495   : > { %v3241_v33 = vpop.f32.mrf.mxu1  ;;  %6223 = vmatmul.mubr.bf16.gmra.mxu0 %v3486_v56 }
 0x496   : > { %v3242_v3 = vadd.f32 %v7954_v46, %v3241_v33  ;;  %v3436_v4 = vmax.f32 %v3250_v49, 0.0  ;;  %6281 = vmatpush3.bf16.msra.mxu1 %v6619_v58 }
 0x497   : > { %6282 = vmatprep.subr.bf16.mxu1 %v6620_v23 }
 0x498   : > { %v6096_v17 = vpop.f32.mrf.mxu0  ;;  %v3434_v63 = vmax.f32 %v3242_v3, 0.0  ;;  %v3488_v16 = vpack.c.bf16 %v3436_v4, %v3435_v14 }
 0x499   : > { %v2901_v18 = vadd.f32 %v6096_v17, %v7862_v32 }
 0x49a   : > { %v2892_v26 = vpop.f32.mrf.mxu0  ;;  %v3487_v52 = vpack.c.bf16 %v3434_v63, %v3433_v43  ;;  %6283 = vmatpush3.bf16.msra.mxu1 %v6620_v23 }
 0x49b   : > { %v2893_v13 = vadd.f32 %v7862_v32, %v2892_v26  ;;  %v3005_v12 = vmax.f32 %v2901_v18, 0.0  ;;  %6284 = vmatprep.subr.bf16.mxu1 %v6621_v39 }
 0x49c   : > { %v6097_v24 = vpop.f32.mrf.mxu0  ;;  %6226 = vmatprep.mubr.bf16.mxu0 %v3487_v52 }
 0x49d   : > { %v2904_v25 = vadd.f32 %v6097_v24, %v7862_v32  ;;  %6227 = vmatmul.mubr.bf16.gmra.mxu0 %v3488_v16  ;;  %v3003_v21 = vmax.f32 %v2893_v13, 0.0 }
 0x49e   : > { %v2895_v62 = vpop.f32.mrf.mxu0  ;;  %6285 = vmatpush3.bf16.msra.mxu1 %v6621_v39 }
 0x49f   : > { %v2896_v20 = vadd.f32 %v7862_v32, %v2895_v62  ;;  %v3006_v36 = vmax.f32 %v2904_v25, 0.0 }
 0x4a0   : > { %v6152_v8 = vpop.f32.mrf.mxu1 }
 0x4a1   : > { %v3004_v2 = vmax.f32 %v2896_v20, 0.0  ;;  %v3044_v29 = vpack.c.bf16 %v3006_v36, %v3005_v12  ;;  %v3263_v30 = vadd.f32 %v6152_v8, %v7954_v46 }
 0x4a2   : > { %v3254_v51 = vpop.f32.mrf.mxu1 }
 0x4a3   : > { %v3043_v22 = vpack.c.bf16 %v3004_v2, %v3003_v21  ;;  %v3255_v5 = vadd.f32 %v7954_v46, %v3254_v51  ;;  %v3439_v57 = vmax.f32 %v3263_v30, 0.0 }
 0x4a4   : > { %v6153_v11 = vpop.f32.mrf.mxu1 }
 0x4a5   : > { %v3266_v7 = vadd.f32 %v6153_v11, %v7954_v46  ;;  %6174 = vmatprep.mubr.bf16.mxu1 %v3043_v22  ;;  %v3437_v1 = vmax.f32 %v3255_v5, 0.0 }
 0x4a6   : > { %v3257_v59 = vpop.f32.mrf.mxu1  ;;  %6175 = vmatmul.mubr.bf16.gmra.mxu1 %v3044_v29 }
 0x4a7   : > { %v3258_v45 = vadd.f32 %v7954_v46, %v3257_v59  ;;  %v3440_v50 = vmax.f32 %v3266_v7, 0.0 }
 0x4a9   : > { %v3438_v34 = vmax.f32 %v3258_v45, 0.0  ;;  %v3490_v9 = vpack.c.bf16 %v3440_v50, %v3439_v57 }
 0x4ab   : > { %v3489_v10 = vpack.c.bf16 %v3438_v34, %v3437_v1 }
 0x4ad   : > { %6230 = vmatprep.mubr.bf16.mxu0 %v3489_v10 }
 0x4ae   : > { %6231 = vmatmul.mubr.bf16.gmra.mxu0 %v3490_v9 }
 0x4b7   : > { %v6100_v44 = vpop.f32.mrf.mxu0 }
 0x4b8   : > { %v2917_v0 = vadd.f32 %v6100_v44, %v7862_v32 }
 0x4b9   : > { %v2908_v15 = vpop.f32.mrf.mxu0 }
 0x4ba   : > { %v2909_v60 = vadd.f32 %v7862_v32, %v2908_v15  ;;  %v3009_v28 = vmax.f32 %v2917_v0, 0.0 }
 0x4bb   : > { %v6101_v48 = vpop.f32.mrf.mxu0 }
 0x4bc   : > { %v2920_v38 = vadd.f32 %v6101_v48, %v7862_v32  ;;  %v3007_v27 = vmax.f32 %v2909_v60, 0.0 }
 0x4bd   : > { %v2911_v53 = vpop.f32.mrf.mxu0 }
 0x4be   : > { %v2912_v42 = vadd.f32 %v7862_v32, %v2911_v53  ;;  %v3010_v47 = vmax.f32 %v2920_v38, 0.0 }
 0x4bf   : > { %v6156_v54 = vpop.f32.mrf.mxu1 }
 0x4c0   : > { %v3008_v61 = vmax.f32 %v2912_v42, 0.0  ;;  %v3046_v37 = vpack.c.bf16 %v3010_v47, %v3009_v28  ;;  %v3279_v33 = vadd.f32 %v6156_v54, %v7954_v46 }
 0x4c1   : > { %v3270_v35 = vpop.f32.mrf.mxu1 }
 0x4c2   : > { %v3045_v56 = vpack.c.bf16 %v3008_v61, %v3007_v27  ;;  %v3271_v49 = vadd.f32 %v7954_v46, %v3270_v35  ;;  %v3443_v14 = vmax.f32 %v3279_v33, 0.0 }
 0x4c3   : > { %v6157_v6 = vpop.f32.mrf.mxu1 }
 0x4c4   : > { %v3282_v31 = vadd.f32 %v6157_v6, %v7954_v46  ;;  %6178 = vmatprep.mubr.bf16.mxu1 %v3045_v56  ;;  %v3441_v43 = vmax.f32 %v3271_v49, 0.0 }
 0x4c5   : > { %v3273_v3 = vpop.f32.mrf.mxu1  ;;  %6179 = vmatmul.mubr.bf16.gmra.mxu1 %v3046_v37 }
 0x4c6   : > { %v3274_v4 = vadd.f32 %v7954_v46, %v3273_v3  ;;  %v3444_v17 = vmax.f32 %v3282_v31, 0.0 }
 0x4c8   : > { %v3442_v63 = vmax.f32 %v3274_v4, 0.0  ;;  %v3492_v52 = vpack.c.bf16 %v3444_v17, %v3443_v14 }
 0x4ca   : > { %v3491_v26 = vpack.c.bf16 %v3442_v63, %v3441_v43 }
 0x4cc   : > { %6234 = vmatprep.mubr.bf16.mxu0 %v3491_v26 }
 0x4cd   : > { %6235 = vmatmul.mubr.bf16.gmra.mxu0 %v3492_v52 }
 0x4da   : > { %v6104_v16 = vpop.f32.mrf.mxu0 }
 0x4db   : > { %v2933_v62 = vadd.f32 %v6104_v16, %v7862_v32 }
 0x4dc   : > { %v2924_v24 = vpop.f32.mrf.mxu0 }
 0x4dd   : > { %v2925_v25 = vadd.f32 %v7862_v32, %v2924_v24  ;;  %v3013_v51 = vmax.f32 %v2933_v62, 0.0 }
 0x4de   : > { %v6105_v13 = vpop.f32.mrf.mxu0 }
 0x4df   : > { %v2936_v18 = vadd.f32 %v6105_v13, %v7862_v32  ;;  %v3011_v2 = vmax.f32 %v2925_v25, 0.0 }
 0x4e0   : > { %v2927_v20 = vpop.f32.mrf.mxu0 }
 0x4e1   : > { %v2928_v36 = vadd.f32 %v7862_v32, %v2927_v20  ;;  %v3014_v8 = vmax.f32 %v2936_v18, 0.0 }
 0x4e2   : > { %v6160_v21 = vpop.f32.mrf.mxu1 }
 0x4e3   : > { %v3012_v12 = vmax.f32 %v2928_v36, 0.0  ;;  %v3048_v11 = vpack.c.bf16 %v3014_v8, %v3013_v51  ;;  %v3295_v59 = vadd.f32 %v6160_v21, %v7954_v46 }
 0x4e4   : > { %v3286_v22 = vpop.f32.mrf.mxu1 }
 0x4e5   : > { %v3047_v29 = vpack.c.bf16 %v3012_v12, %v3011_v2  ;;  %v3287_v7 = vadd.f32 %v7954_v46, %v3286_v22  ;;  %v3447_v34 = vmax.f32 %v3295_v59, 0.0  ;;  %v8046_v2 = vld [vmem:[%s8527_s4 + $0x4] ss:$0 sm:$0xff] }
 0x4e6   : > { %v6161_v5 = vpop.f32.mrf.mxu1 }
 0x4e7   : > { %v3298_v30 = vadd.f32 %v6161_v5, %v7954_v46  ;;  %6182 = vmatprep.mubr.bf16.mxu1 %v3047_v29  ;;  %v3445_v50 = vmax.f32 %v3287_v7, 0.0 }
 0x4e8   : > { %v3289_v40 = vpop.f32.mrf.mxu1  ;;  %6183 = vmatmul.mubr.bf16.gmra.mxu1 %v3048_v11 }
 0x4e9   : > { %v3290_v32 = vadd.f32 %v7954_v46, %v3289_v40  ;;  %v3448_v45 = vmax.f32 %v3298_v30, 0.0 }
 0x4eb   : > { %v3446_v1 = vmax.f32 %v3290_v32, 0.0  ;;  %v3494_v41 = vpack.c.bf16 %v3448_v45, %v3447_v34 }
 0x4ed   : > { %v3493_v57 = vpack.c.bf16 %v3446_v1, %v3445_v50 }
 0x4ef   : > { %6238 = vmatprep.mubr.bf16.mxu0 %v3493_v57 }
 0x4f0   : > { %6239 = vmatmul.mubr.bf16.gmra.mxu0 %v3494_v41 }
 0x4f9   : > { %v6108_v10 = vpop.f32.mrf.mxu0 }
 0x4fa   : > { %v2949_v15 = vadd.f32 %v6651_v19, %v6108_v10 }
 0x4fb   : > { %v2940_v9 = vpop.f32.mrf.mxu0 }
 0x4fc   : > { %v2941_v58 = vadd.f32 %v6651_v19, %v2940_v9  ;;  %v3017_v42 = vmax.f32 %v2949_v15, 0.0 }
 0x4fd   : > { %v6109_v55 = vpop.f32.mrf.mxu0 }
 0x4fe   : > { %v2952_v44 = vadd.f32 %v6651_v19, %v6109_v55  ;;  %v3015_v0 = vmax.f32 %v2941_v58, 0.0 }
 0x4ff   : > { %v2943_v23 = vpop.f32.mrf.mxu0 }
 0x500   : > { %v2944_v48 = vadd.f32 %v6651_v19, %v2943_v23  ;;  %v3018_v60 = vmax.f32 %v2952_v44, 0.0 }
 0x501   : > { %v6164_v38 = vpop.f32.mrf.mxu1 }
 0x502   : > { %v3016_v53 = vmax.f32 %v2944_v48, 0.0  ;;  %v3050_v54 = vpack.c.bf16 %v3018_v60, %v3017_v42  ;;  %v3311_v35 = vadd.f32 %v6164_v38, %v7954_v46 }
 0x503   : > { %v3302_v39 = vpop.f32.mrf.mxu1 }
 0x504   : > { %v3049_v47 = vpack.c.bf16 %v3016_v53, %v3015_v0  ;;  %v3303_v61 = vadd.f32 %v7954_v46, %v3302_v39  ;;  %v3451_v33 = vmax.f32 %v3311_v35, 0.0 }
 0x505   : > { %v6165_v27 = vpop.f32.mrf.mxu1 }
 0x506   : > { %v3314_v28 = vadd.f32 %v6165_v27, %v7954_v46  ;;  %6186 = vmatprep.mubr.bf16.mxu1 %v3049_v47  ;;  %v3449_v49 = vmax.f32 %v3303_v61, 0.0 }
 0x507   : > { %v3305_v56 = vpop.f32.mrf.mxu1  ;;  %6187 = vmatmul.mubr.bf16.gmra.mxu1 %v3050_v54 }
 0x508   : > { %v3306_v37 = vadd.f32 %v7954_v46, %v3305_v56  ;;  %v3452_v6 = vmax.f32 %v3314_v28, 0.0 }
 0x50a   : > { %v3450_v31 = vmax.f32 %v3306_v37, 0.0  ;;  %v3496_v4 = vpack.c.bf16 %v3452_v6, %v3451_v33 }
 0x50c   : > { %v3495_v3 = vpack.c.bf16 %v3450_v31, %v3449_v49 }
 0x50e   : > { %6242 = vmatprep.mubr.bf16.mxu0 %v3495_v3 }
 0x50f   : > { %6243 = vmatmul.mubr.bf16.gmra.mxu0 %v3496_v4 }
 0x524   : > { %v6168_v17 = vpop.f32.mrf.mxu1 }
 0x525   : > { %v3327_v52 = vadd.f32 %v6168_v17, %v7954_v46 }
 0x526   : > { %v3318_v43 = vpop.f32.mrf.mxu1 }
 0x527   : > { %v3319_v14 = vadd.f32 %v7954_v46, %v3318_v43  ;;  %v3455_v62 = vmax.f32 %v3327_v52, 0.0 }
 0x528   : > { %v6169_v63 = vpop.f32.mrf.mxu1 }
 0x529   : > { %v3330_v26 = vadd.f32 %v6169_v63, %v7954_v46  ;;  %v3453_v25 = vmax.f32 %v3319_v14, 0.0 }
 0x52a   : > { %v3321_v16 = vpop.f32.mrf.mxu1 }
 0x52b   : > { %v3322_v24 = vadd.f32 %v7954_v46, %v3321_v16  ;;  %v3456_v13 = vmax.f32 %v3330_v26, 0.0 }
 0x52d   : > { %v3454_v18 = vmax.f32 %v3322_v24, 0.0  ;;  %v3498_v36 = vpack.c.bf16 %v3456_v13, %v3455_v62 }
 0x52f   : > { %v3497_v20 = vpack.c.bf16 %v3454_v18, %v3453_v25 }
 0x531   : > { %6246 = vmatprep.mubr.bf16.mxu0 %v3497_v20 }
 0x532   : > { %6247 = vmatmul.mubr.bf16.gmra.mxu0 %v3498_v36 }
 0x535   : > { %v6208_v8 = vpop.f32.mrf.mxu0 }
 0x536   : > { %v3625_v29 = vadd.f32 %v6208_v8, %v8046_v2 }
 0x537   : > { %v3616_v21 = vpop.f32.mrf.mxu0 }
 0x538   : > { %v3617_v51 = vadd.f32 %v8046_v2, %v3616_v21  ;;  %v3873_v32 = vmax.f32 %v3625_v29, 0.0 }
 0x539   : > { %v6209_v12 = vpop.f32.mrf.mxu0 }
 0x53a   : > { %v3628_v22 = vadd.f32 %v6209_v12, %v8046_v2  ;;  %v3871_v59 = vmax.f32 %v3617_v51, 0.0 }
 0x53b   : > { %v3619_v11 = vpop.f32.mrf.mxu0 }
 0x53c   : > { %v3620_v5 = vadd.f32 %v8046_v2, %v3619_v11  ;;  %v3874_v7 = vmax.f32 %v3628_v22, 0.0 }
 0x53d   : > { %v6212_v30 = vpop.f32.mrf.mxu0 }
 0x53e   : > { %v3872_v40 = vmax.f32 %v3620_v5, 0.0  ;;  %v3936_v1 = vpack.c.bf16 %v3874_v7, %v3873_v32  ;;  %v3641_v9 = vadd.f32 %v6212_v30, %v8046_v2 }
 0x53f   : > { %v3632_v45 = vpop.f32.mrf.mxu0 }
 0x540   : > { %v3935_v50 = vpack.c.bf16 %v3872_v40, %v3871_v59  ;;  %v3633_v57 = vadd.f32 %v8046_v2, %v3632_v45  ;;  %v3877_v38 = vmax.f32 %v3641_v9, 0.0 }
 0x541   : > { %v6213_v34 = vpop.f32.mrf.mxu0 }
 0x542   : > { %v3644_v41 = vadd.f32 %v6213_v34, %v8046_v2  ;;  %6286 = vmatprep.mubr.bf16.mxu1 %v3935_v50  ;;  %v3875_v23 = vmax.f32 %v3633_v57, 0.0  ;;  %v6622_v34 = vld [vmem:[%s8526_s3 + $0x1b8] sm:$0xff]  }
 0x543   : > { %v6172_v10 = vpop.f32.mrf.mxu1  ;;  %v3635_v55 = vpop.f32.mrf.mxu0  ;;  %6287 = vmatmul.mubr.bf16.vlgmr.msra.gmra.mxu1 %v3936_v1  ;;  %6350 = vmatprep.subr.bf16.mxu0 %v6622_v34 }
 0x544   : > { %v3636_v19 = vadd.f32 %v8046_v2, %v3635_v55  ;;  %v3878_v44 = vmax.f32 %v3644_v41, 0.0  ;;  %v3343_v39 = vadd.f32 %v6172_v10, %v7954_v46  ;;  %6351 = vmatpush3.bf16.msra.mxu0 %v6622_v34 }
 0x545   : > { %v3334_v58 = vpop.f32.mrf.mxu1  ;;  %v6216_v15 = vpop.f32.mrf.mxu0 }
 0x546   : > { %v3876_v48 = vmax.f32 %v3636_v19, 0.0  ;;  %v3335_v0 = vadd.f32 %v7954_v46, %v3334_v58  ;;  %v3938_v27 = vpack.c.bf16 %v3878_v44, %v3877_v38  ;;  %v3657_v49 = vadd.f32 %v6216_v15, %v8046_v2 }
 0x547   : > { %v6173_v60 = vpop.f32.mrf.mxu1  ;;  %v3648_v42 = vpop.f32.mrf.mxu0  ;;  %v3459_v3 = vmax.f32 %v3343_v39, 0.0 }
 0x548   : > { %v3346_v53 = vadd.f32 %v6173_v60, %v7954_v46  ;;  %v3937_v54 = vpack.c.bf16 %v3876_v48, %v3875_v23  ;;  %v3649_v56 = vadd.f32 %v8046_v2, %v3648_v42  ;;  %v3457_v6 = vmax.f32 %v3335_v0, 0.0 }
 0x549   : > { %v3337_v47 = vpop.f32.mrf.mxu1  ;;  %v6217_v28 = vpop.f32.mrf.mxu0  ;;  %v3881_v16 = vmax.f32 %v3657_v49, 0.0 }
 0x54a   : > { %v3338_v61 = vadd.f32 %v7954_v46, %v3337_v47  ;;  %v3460_v35 = vmax.f32 %v3346_v53, 0.0  ;;  %v3660_v37 = vadd.f32 %v6217_v28, %v8046_v2  ;;  %6290 = vmatprep.mubr.bf16.mxu1 %v3937_v54  ;;  %v3879_v26 = vmax.f32 %v3649_v56, 0.0 }
 0x54b   : > { %v3651_v33 = vpop.f32.mrf.mxu0  ;;  %6291 = vmatmul.mubr.bf16.gmra.mxu1 %v3938_v27 }
 0x54c   : > { %v3458_v31 = vmax.f32 %v3338_v61, 0.0  ;;  %v3652_v4 = vadd.f32 %v8046_v2, %v3651_v33  ;;  %v3882_v17 = vmax.f32 %v3660_v37, 0.0  ;;  %v3500_v14 = vpack.c.bf16 %v3460_v35, %v3459_v3 }
 0x54d   : > { %v6220_v43 = vpop.f32.mrf.mxu0 }
 0x54e   : > { %v3499_v63 = vpack.c.bf16 %v3458_v31, %v3457_v6  ;;  %v3880_v52 = vmax.f32 %v3652_v4, 0.0  ;;  %v3940_v25 = vpack.c.bf16 %v3882_v17, %v3881_v16  ;;  %v3673_v36 = vadd.f32 %v6220_v43, %v8046_v2 }
 0x54f   : > { %v3664_v24 = vpop.f32.mrf.mxu0 }
 0x550   : > { %6250 = vmatprep.mubr.bf16.mxu0 %v3499_v63  ;;  %v3939_v13 = vpack.c.bf16 %v3880_v52, %v3879_v26  ;;  %v3665_v62 = vadd.f32 %v8046_v2, %v3664_v24  ;;  %v3885_v11 = vmax.f32 %v3673_v36, 0.0 }
 0x551   : > { %6251 = vmatmul.mubr.bf16.gmra.mxu0 %v3500_v14  ;;  %v6221_v18 = vpop.f32.mrf.mxu0 }
 0x552   : > { %v3676_v20 = vadd.f32 %v6221_v18, %v8046_v2  ;;  %6294 = vmatprep.mubr.bf16.mxu1 %v3939_v13  ;;  %v3883_v22 = vmax.f32 %v3665_v62, 0.0  ;;  %v6623_v18 = vld [vmem:[%s8526_s3 + $0x1b0] sm:$0xff]  }
 0x553   : > { %v3667_v8 = vpop.f32.mrf.mxu0  ;;  %6295 = vmatmul.mubr.bf16.gmra.mxu1 %v3940_v25  ;;  %6352 = vmatprep.subr.bf16.mxu0 %v6623_v18 }
 0x554   : > { %v3668_v21 = vadd.f32 %v8046_v2, %v3667_v8  ;;  %v3886_v12 = vmax.f32 %v3676_v20, 0.0  ;;  %6353 = vmatpush3.bf16.msra.mxu0 %v6623_v18 }
 0x555   : > { %v6224_v51 = vpop.f32.mrf.mxu0 }
 0x556   : > { %v3884_v29 = vmax.f32 %v3668_v21, 0.0  ;;  %v3942_v30 = vpack.c.bf16 %v3886_v12, %v3885_v11  ;;  %v3689_v45 = vadd.f32 %v6224_v51, %v8046_v2  ;;  %v6624_v12 = vld [vmem:[%s8526_s3 + $0x1a8] sm:$0xff]   ;;  %v6626_v11 = vld [vmem:[%s8526_s3 + $0x198] sm:$0xff]  }
 0x557   : > { %v3680_v5 = vpop.f32.mrf.mxu0  ;;  %6354 = vmatprep.subr.bf16.mxu0 %v6624_v12 }
 0x558   : > { %v3941_v7 = vpack.c.bf16 %v3884_v29, %v3883_v22  ;;  %v3681_v40 = vadd.f32 %v8046_v2, %v3680_v5  ;;  %v3889_v55 = vmax.f32 %v3689_v45, 0.0  ;;  %6355 = vmatpush3.bf16.msra.mxu0 %v6624_v12  ;;  %v6625_v29 = vld [vmem:[%s8526_s3 + $0x1a0] sm:$0xff]   ;;  %v6627_v5 = vld [vmem:[%s8526_s3 + $0x190] sm:$0xff]  }
 0x559   : > { %v6225_v59 = vpop.f32.mrf.mxu0  ;;  %6356 = vmatprep.subr.bf16.mxu0 %v6625_v29 }
 0x55a   : > { %v3692_v32 = vadd.f32 %v6225_v59, %v8046_v2  ;;  %6298 = vmatprep.mubr.bf16.mxu1 %v3941_v7  ;;  %v3887_v10 = vmax.f32 %v3681_v40, 0.0  ;;  %v6628_v59 = vld [vmem:[%s8526_s3 + $0x188] sm:$0xff]  }
 0x55b   : > { %v3683_v50 = vpop.f32.mrf.mxu0  ;;  %6299 = vmatmul.mubr.bf16.gmra.mxu1 %v3942_v30 }
 0x55c   : > { %v3684_v1 = vadd.f32 %v8046_v2, %v3683_v50  ;;  %v3890_v57 = vmax.f32 %v3692_v32, 0.0  ;;  %6357 = vmatpush3.bf16.msra.mxu0 %v6625_v29 }
 0x55d   : > { %v6228_v41 = vpop.f32.mrf.mxu0  ;;  %6358 = vmatprep.subr.bf16.mxu0 %v6626_v11 }
 0x55e   : > { %v3888_v9 = vmax.f32 %v3684_v1, 0.0  ;;  %v3944_v44 = vpack.c.bf16 %v3890_v57, %v3889_v55  ;;  %v3705_v60 = vadd.f32 %v6228_v41, %v8046_v2  ;;  %v6629_v57 = vld [vmem:[%s8526_s3 + $0x180] sm:$0xff]  }
 0x55f   : > { %v3696_v19 = vpop.f32.mrf.mxu0 }
 0x560   : > { %v3943_v58 = vpack.c.bf16 %v3888_v9, %v3887_v10  ;;  %v3697_v23 = vadd.f32 %v8046_v2, %v3696_v19  ;;  %v3893_v54 = vmax.f32 %v3705_v60, 0.0  ;;  %6359 = vmatpush3.bf16.msra.mxu0 %v6626_v11  ;;  %v6652_v11 = vld [vmem:[%s8527_s4 + $0x3] ss:$0 sm:$0xff] }
 0x561   : > { %v6229_v15 = vpop.f32.mrf.mxu0  ;;  %6360 = vmatprep.subr.bf16.mxu0 %v6627_v5 }
 0x562   : > { %v3708_v48 = vadd.f32 %v6229_v15, %v8046_v2  ;;  %6302 = vmatprep.mubr.bf16.mxu1 %v3943_v58  ;;  %v3891_v39 = vmax.f32 %v3697_v23, 0.0 }
 0x563   : > { %v3699_v38 = vpop.f32.mrf.mxu0  ;;  %6303 = vmatmul.mubr.bf16.gmra.mxu1 %v3944_v44 }
 0x564   : > { %v3700_v0 = vadd.f32 %v8046_v2, %v3699_v38  ;;  %v3894_v53 = vmax.f32 %v3708_v48, 0.0  ;;  %6361 = vmatpush3.bf16.msra.mxu0 %v6627_v5 }
 0x565   : > { %6362 = vmatprep.subr.bf16.mxu0 %v6628_v59 }
 0x566   : > { %v6176_v42 = vpop.f32.mrf.mxu1  ;;  %v3892_v47 = vmax.f32 %v3700_v0, 0.0  ;;  %v3946_v28 = vpack.c.bf16 %v3894_v53, %v3893_v54 }
 0x567   : > { %v3359_v6 = vadd.f32 %v6176_v42, %v7954_v46 }
 0x568   : > { %v3350_v27 = vpop.f32.mrf.mxu1  ;;  %v3945_v61 = vpack.c.bf16 %v3892_v47, %v3891_v39  ;;  %6363 = vmatpush3.bf16.msra.mxu0 %v6628_v59 }
 0x569   : > { %v3351_v56 = vadd.f32 %v7954_v46, %v3350_v27  ;;  %v3463_v43 = vmax.f32 %v3359_v6, 0.0  ;;  %6364 = vmatprep.subr.bf16.mxu0 %v6629_v57 }
 0x56a   : > { %v6177_v35 = vpop.f32.mrf.mxu1  ;;  %6306 = vmatprep.mubr.bf16.mxu1 %v3945_v61 }
 0x56b   : > { %v3362_v37 = vadd.f32 %v6177_v35, %v7954_v46  ;;  %6307 = vmatmul.mubr.bf16.gmra.mxu1 %v3946_v28  ;;  %v3461_v4 = vmax.f32 %v3351_v56, 0.0 }
 0x56c   : > { %v3353_v49 = vpop.f32.mrf.mxu1  ;;  %6365 = vmatpush3.bf16.msra.mxu0 %v6629_v57 }
 0x56d   : > { %v3354_v31 = vadd.f32 %v7954_v46, %v3353_v49  ;;  %v3464_v33 = vmax.f32 %v3362_v37, 0.0 }
 0x56e   : > { %v6232_v3 = vpop.f32.mrf.mxu0 }
 0x56f   : > { %v3462_v17 = vmax.f32 %v3354_v31, 0.0  ;;  %v3502_v26 = vpack.c.bf16 %v3464_v33, %v3463_v43  ;;  %v3721_v13 = vadd.f32 %v6232_v3, %v8046_v2 }
 0x570   : > { %v3712_v63 = vpop.f32.mrf.mxu0 }
 0x571   : > { %v3501_v14 = vpack.c.bf16 %v3462_v17, %v3461_v4  ;;  %v3713_v16 = vadd.f32 %v8046_v2, %v3712_v63  ;;  %v3897_v21 = vmax.f32 %v3721_v13, 0.0 }
 0x572   : > { %v6233_v52 = vpop.f32.mrf.mxu0 }
 0x573   : > { %v3724_v24 = vadd.f32 %v6233_v52, %v8046_v2  ;;  %6254 = vmatprep.mubr.bf16.mxu0 %v3501_v14  ;;  %v3895_v36 = vmax.f32 %v3713_v16, 0.0 }
 0x574   : > { %v3715_v25 = vpop.f32.mrf.mxu0  ;;  %6255 = vmatmul.mubr.bf16.gmra.mxu0 %v3502_v26 }
 0x575   : > { %v3716_v62 = vadd.f32 %v8046_v2, %v3715_v25  ;;  %v3898_v20 = vmax.f32 %v3724_v24, 0.0 }
 0x577   : > { %v3896_v8 = vmax.f32 %v3716_v62, 0.0  ;;  %v3948_v22 = vpack.c.bf16 %v3898_v20, %v3897_v21 }
 0x579   : > { %v3947_v51 = vpack.c.bf16 %v3896_v8, %v3895_v36 }
 0x57b   : > { %6310 = vmatprep.mubr.bf16.mxu1 %v3947_v51 }
 0x57c   : > { %6311 = vmatmul.mubr.bf16.gmra.mxu1 %v3948_v22 }
 0x585   : > { %v6180_v7 = vpop.f32.mrf.mxu1 }
 0x586   : > { %v3375_v50 = vadd.f32 %v6180_v7, %v7954_v46 }
 0x587   : > { %v3366_v30 = vpop.f32.mrf.mxu1 }
 0x588   : > { %v3367_v32 = vadd.f32 %v7954_v46, %v3366_v30  ;;  %v3467_v19 = vmax.f32 %v3375_v50, 0.0 }
 0x589   : > { %v6181_v40 = vpop.f32.mrf.mxu1 }
 0x58a   : > { %v3378_v45 = vadd.f32 %v6181_v40, %v7954_v46  ;;  %v3465_v9 = vmax.f32 %v3367_v32, 0.0 }
 0x58b   : > { %v3369_v1 = vpop.f32.mrf.mxu1 }
 0x58c   : > { %v3370_v34 = vadd.f32 %v7954_v46, %v3369_v1  ;;  %v3468_v41 = vmax.f32 %v3378_v45, 0.0 }
 0x58d   : > { %v6236_v10 = vpop.f32.mrf.mxu0 }
 0x58e   : > { %v3466_v55 = vmax.f32 %v3370_v34, 0.0  ;;  %v3504_v15 = vpack.c.bf16 %v3468_v41, %v3467_v19  ;;  %v3737_v38 = vadd.f32 %v6236_v10, %v8046_v2 }
 0x58f   : > { %v3728_v58 = vpop.f32.mrf.mxu0 }
 0x590   : > { %v3503_v44 = vpack.c.bf16 %v3466_v55, %v3465_v9  ;;  %v3729_v48 = vadd.f32 %v8046_v2, %v3728_v58  ;;  %v3901_v54 = vmax.f32 %v3737_v38, 0.0 }
 0x591   : > { %v6237_v23 = vpop.f32.mrf.mxu0 }
 0x592   : > { %v3740_v60 = vadd.f32 %v6237_v23, %v8046_v2  ;;  %6258 = vmatprep.mubr.bf16.mxu0 %v3503_v44  ;;  %v3899_v39 = vmax.f32 %v3729_v48, 0.0 }
 0x593   : > { %v3731_v0 = vpop.f32.mrf.mxu0  ;;  %6259 = vmatmul.mubr.bf16.gmra.mxu0 %v3504_v15 }
 0x594   : > { %v3732_v53 = vadd.f32 %v8046_v2, %v3731_v0  ;;  %v3902_v42 = vmax.f32 %v3740_v60, 0.0 }
 0x596   : > { %v3900_v47 = vmax.f32 %v3732_v53, 0.0  ;;  %v3950_v61 = vpack.c.bf16 %v3902_v42, %v3901_v54 }
 0x598   : > { %v3949_v27 = vpack.c.bf16 %v3900_v47, %v3899_v39 }
 0x59a   : > { %6314 = vmatprep.mubr.bf16.mxu1 %v3949_v27 }
 0x59b   : > { %6315 = vmatmul.mubr.bf16.gmra.mxu1 %v3950_v61 }
 0x5a8   : > { %v6184_v28 = vpop.f32.mrf.mxu1 }
 0x5a9   : > { %v3391_v49 = vadd.f32 %v6184_v28, %v7954_v46 }
 0x5aa   : > { %v3382_v35 = vpop.f32.mrf.mxu1 }
 0x5ab   : > { %v3383_v37 = vadd.f32 %v7954_v46, %v3382_v35  ;;  %v3471_v63 = vmax.f32 %v3391_v49, 0.0 }
 0x5ac   : > { %v6185_v56 = vpop.f32.mrf.mxu1 }
 0x5ad   : > { %v3394_v6 = vadd.f32 %v6185_v56, %v7954_v46  ;;  %v3469_v17 = vmax.f32 %v3383_v37, 0.0 }
 0x5ae   : > { %v3385_v31 = vpop.f32.mrf.mxu1 }
 0x5af   : > { %v3386_v33 = vadd.f32 %v7954_v46, %v3385_v31  ;;  %v3472_v3 = vmax.f32 %v3394_v6, 0.0 }
 0x5b0   : > { %v6240_v4 = vpop.f32.mrf.mxu0 }
 0x5b1   : > { %v3470_v43 = vmax.f32 %v3386_v33, 0.0  ;;  %v3506_v52 = vpack.c.bf16 %v3472_v3, %v3471_v63  ;;  %v3753_v25 = vadd.f32 %v6240_v4, %v8046_v2 }
 0x5b2   : > { %v3744_v14 = vpop.f32.mrf.mxu0 }
 0x5b3   : > { %v3505_v26 = vpack.c.bf16 %v3470_v43, %v3469_v17  ;;  %v3745_v24 = vadd.f32 %v8046_v2, %v3744_v14  ;;  %v3905_v8 = vmax.f32 %v3753_v25, 0.0  ;;  %v8138_v17 = vld [vmem:[%s8527_s4 + $0x5] ss:$0 sm:$0xff] }
 0x5b4   : > { %v6241_v16 = vpop.f32.mrf.mxu0 }
 0x5b5   : > { %v3756_v13 = vadd.f32 %v6241_v16, %v8046_v2  ;;  %6262 = vmatprep.mubr.bf16.mxu0 %v3505_v26  ;;  %v3903_v20 = vmax.f32 %v3745_v24, 0.0 }
 0x5b6   : > { %v3747_v18 = vpop.f32.mrf.mxu0  ;;  %6263 = vmatmul.mubr.bf16.gmra.mxu0 %v3506_v52 }
 0x5b7   : > { %v3748_v46 = vadd.f32 %v8046_v2, %v3747_v18  ;;  %v3906_v62 = vmax.f32 %v3756_v13, 0.0 }
 0x5b9   : > { %v3904_v36 = vmax.f32 %v3748_v46, 0.0  ;;  %v3952_v12 = vpack.c.bf16 %v3906_v62, %v3905_v8 }
 0x5bb   : > { %v3951_v21 = vpack.c.bf16 %v3904_v36, %v3903_v20 }
 0x5bd   : > { %6318 = vmatprep.mubr.bf16.mxu1 %v3951_v21 }
 0x5be   : > { %6319 = vmatmul.mubr.bf16.gmra.mxu1 %v3952_v12 }
 0x5c7   : > { %v6188_v51 = vpop.f32.mrf.mxu1 }
 0x5c8   : > { %v3407_v30 = vadd.f32 %v6652_v11, %v6188_v51 }
 0x5c9   : > { %v3398_v22 = vpop.f32.mrf.mxu1 }
 0x5ca   : > { %v3399_v5 = vadd.f32 %v6652_v11, %v3398_v22  ;;  %v3475_v34 = vmax.f32 %v3407_v30, 0.0 }
 0x5cb   : > { %v6189_v29 = vpop.f32.mrf.mxu1 }
 0x5cc   : > { %v3410_v7 = vadd.f32 %v6652_v11, %v6189_v29  ;;  %v3473_v50 = vmax.f32 %v3399_v5, 0.0 }
 0x5cd   : > { %v3401_v59 = vpop.f32.mrf.mxu1 }
 0x5ce   : > { %v3402_v40 = vadd.f32 %v6652_v11, %v3401_v59  ;;  %v3476_v32 = vmax.f32 %v3410_v7, 0.0 }
 0x5cf   : > { %v6244_v45 = vpop.f32.mrf.mxu0 }
 0x5d0   : > { %v3474_v1 = vmax.f32 %v3402_v40, 0.0  ;;  %v3508_v10 = vpack.c.bf16 %v3476_v32, %v3475_v34  ;;  %v3769_v58 = vadd.f32 %v6244_v45, %v8046_v2 }
 0x5d1   : > { %v3760_v57 = vpop.f32.mrf.mxu0 }
 0x5d2   : > { %v3507_v41 = vpack.c.bf16 %v3474_v1, %v3473_v50  ;;  %v3761_v55 = vadd.f32 %v8046_v2, %v3760_v57  ;;  %v3909_v38 = vmax.f32 %v3769_v58, 0.0 }
 0x5d3   : > { %v6245_v9 = vpop.f32.mrf.mxu0 }
 0x5d4   : > { %v3772_v19 = vadd.f32 %v6245_v9, %v8046_v2  ;;  %6266 = vmatprep.mubr.bf16.mxu0 %v3507_v41  ;;  %v3907_v48 = vmax.f32 %v3761_v55, 0.0 }
 0x5d5   : > { %v3763_v44 = vpop.f32.mrf.mxu0  ;;  %6267 = vmatmul.mubr.bf16.gmra.mxu0 %v3508_v10 }
 0x5d6   : > { %v3764_v15 = vadd.f32 %v8046_v2, %v3763_v44  ;;  %v3910_v23 = vmax.f32 %v3772_v19, 0.0 }
 0x5d8   : > { %v3908_v60 = vmax.f32 %v3764_v15, 0.0  ;;  %v3954_v53 = vpack.c.bf16 %v3910_v23, %v3909_v38 }
 0x5da   : > { %v3953_v0 = vpack.c.bf16 %v3908_v60, %v3907_v48 }
 0x5dc   : > { %6322 = vmatprep.mubr.bf16.mxu1 %v3953_v0 }
 0x5dd   : > { %6323 = vmatmul.mubr.bf16.gmra.mxu1 %v3954_v53 }
 0x5f2   : > { %v6248_v42 = vpop.f32.mrf.mxu0 }
 0x5f3   : > { %v3785_v61 = vadd.f32 %v6248_v42, %v8046_v2 }
 0x5f4   : > { %v3776_v39 = vpop.f32.mrf.mxu0 }
 0x5f5   : > { %v3777_v54 = vadd.f32 %v8046_v2, %v3776_v39  ;;  %v3913_v49 = vmax.f32 %v3785_v61, 0.0 }
 0x5f6   : > { %v6249_v47 = vpop.f32.mrf.mxu0 }
 0x5f7   : > { %v3788_v27 = vadd.f32 %v6249_v47, %v8046_v2  ;;  %v3911_v37 = vmax.f32 %v3777_v54, 0.0 }
 0x5f8   : > { %v3779_v28 = vpop.f32.mrf.mxu0 }
 0x5f9   : > { %v3780_v35 = vadd.f32 %v8046_v2, %v3779_v28  ;;  %v3914_v56 = vmax.f32 %v3788_v27, 0.0 }
 0x5fb   : > { %v3912_v6 = vmax.f32 %v3780_v35, 0.0  ;;  %v3956_v33 = vpack.c.bf16 %v3914_v56, %v3913_v49 }
 0x5fd   : > { %v3955_v31 = vpack.c.bf16 %v3912_v6, %v3911_v37 }
 0x5ff   : > { %6326 = vmatprep.mubr.bf16.mxu1 %v3955_v31 }
 0x600   : > { %6327 = vmatmul.mubr.bf16.gmra.mxu1 %v3956_v33 }
 0x603   : > { %v6288_v3 = vpop.f32.mrf.mxu1 }
 0x604   : > { %v4083_v26 = vadd.f32 %v6288_v3, %v8138_v17 }
 0x605   : > { %v4074_v4 = vpop.f32.mrf.mxu1 }
 0x606   : > { %v4075_v63 = vadd.f32 %v8138_v17, %v4074_v4  ;;  %v4331_v46 = vmax.f32 %v4083_v26, 0.0 }
 0x607   : > { %v6289_v43 = vpop.f32.mrf.mxu1 }
 0x608   : > { %v4086_v14 = vadd.f32 %v6289_v43, %v8138_v17  ;;  %v4329_v25 = vmax.f32 %v4075_v63, 0.0 }
 0x609   : > { %v4077_v52 = vpop.f32.mrf.mxu1 }
 0x60a   : > { %v4078_v16 = vadd.f32 %v8138_v17, %v4077_v52  ;;  %v4332_v24 = vmax.f32 %v4086_v14, 0.0 }
 0x60b   : > { %v6292_v13 = vpop.f32.mrf.mxu1 }
 0x60c   : > { %v4330_v18 = vmax.f32 %v4078_v16, 0.0  ;;  %v4394_v36 = vpack.c.bf16 %v4332_v24, %v4331_v46  ;;  %v4099_v22 = vadd.f32 %v6292_v13, %v8138_v17 }
 0x60d   : > { %v4090_v62 = vpop.f32.mrf.mxu1 }
 0x60e   : > { %v4393_v20 = vpack.c.bf16 %v4330_v18, %v4329_v25  ;;  %v4091_v21 = vadd.f32 %v8138_v17, %v4090_v62  ;;  %v4335_v45 = vmax.f32 %v4099_v22, 0.0 }
 0x60f   : > { %v6293_v8 = vpop.f32.mrf.mxu1 }
 0x610   : > { %v4102_v12 = vadd.f32 %v6293_v8, %v8138_v17  ;;  %6366 = vmatprep.mubr.bf16.mxu0 %v4393_v20  ;;  %v4333_v59 = vmax.f32 %v4091_v21, 0.0  ;;  %v6630_v8 = vld [vmem:[%s8528_s5 + $0x38] sm:$0xff]  }
 0x611   : > { %v6252_v51 = vpop.f32.mrf.mxu0  ;;  %v4093_v29 = vpop.f32.mrf.mxu1  ;;  %6367 = vmatmul.mubr.bf16.vlgmr.msra.gmra.mxu0 %v4394_v36  ;;  %6430 = vmatprep.subr.bf16.mxu1 %v6630_v8 }
 0x612   : > { %v4094_v11 = vadd.f32 %v8138_v17, %v4093_v29  ;;  %v4336_v7 = vmax.f32 %v4102_v12, 0.0  ;;  %v3801_v57 = vadd.f32 %v6252_v51, %v8046_v2  ;;  %6431 = vmatpush3.bf16.msra.mxu1 %v6630_v8 }
 0x613   : > { %v3792_v5 = vpop.f32.mrf.mxu0  ;;  %v6296_v30 = vpop.f32.mrf.mxu1 }
 0x614   : > { %v4334_v40 = vmax.f32 %v4094_v11, 0.0  ;;  %v3793_v50 = vadd.f32 %v8046_v2, %v3792_v5  ;;  %v4396_v9 = vpack.c.bf16 %v4336_v7, %v4335_v45  ;;  %v4115_v48 = vadd.f32 %v6296_v30, %v8138_v17 }
 0x615   : > { %v6253_v32 = vpop.f32.mrf.mxu0  ;;  %v4106_v34 = vpop.f32.mrf.mxu1  ;;  %v3917_v0 = vmax.f32 %v3801_v57, 0.0 }
 0x616   : > { %v3804_v1 = vadd.f32 %v6253_v32, %v8046_v2  ;;  %v4395_v10 = vpack.c.bf16 %v4334_v40, %v4333_v59  ;;  %v4107_v44 = vadd.f32 %v8138_v17, %v4106_v34  ;;  %v3915_v23 = vmax.f32 %v3793_v50, 0.0 }
 0x617   : > { %v3795_v41 = vpop.f32.mrf.mxu0  ;;  %v6297_v19 = vpop.f32.mrf.mxu1  ;;  %v4339_v28 = vmax.f32 %v4115_v48, 0.0 }
 0x618   : > { %v3796_v55 = vadd.f32 %v8046_v2, %v3795_v41  ;;  %v3918_v58 = vmax.f32 %v3804_v1, 0.0  ;;  %v4118_v15 = vadd.f32 %v6297_v19, %v8138_v17  ;;  %6370 = vmatprep.mubr.bf16.mxu0 %v4395_v10  ;;  %v4337_v27 = vmax.f32 %v4107_v44, 0.0 }
 0x619   : > { %v4109_v38 = vpop.f32.mrf.mxu1  ;;  %6371 = vmatmul.mubr.bf16.gmra.mxu0 %v4396_v9 }
 0x61a   : > { %v3916_v60 = vmax.f32 %v3796_v55, 0.0  ;;  %v4110_v53 = vadd.f32 %v8138_v17, %v4109_v38  ;;  %v4340_v39 = vmax.f32 %v4118_v15, 0.0  ;;  %v3958_v54 = vpack.c.bf16 %v3918_v58, %v3917_v0 }
 0x61b   : > { %v6300_v47 = vpop.f32.mrf.mxu1 }
 0x61c   : > { %v3957_v42 = vpack.c.bf16 %v3916_v60, %v3915_v23  ;;  %v4338_v61 = vmax.f32 %v4110_v53, 0.0  ;;  %v4398_v37 = vpack.c.bf16 %v4340_v39, %v4339_v28  ;;  %v4131_v33 = vadd.f32 %v6300_v47, %v8138_v17 }
 0x61d   : > { %v4122_v35 = vpop.f32.mrf.mxu1 }
 0x61e   : > { %6330 = vmatprep.mubr.bf16.mxu1 %v3957_v42  ;;  %v4397_v56 = vpack.c.bf16 %v4338_v61, %v4337_v27  ;;  %v4123_v49 = vadd.f32 %v8138_v17, %v4122_v35  ;;  %v4343_v52 = vmax.f32 %v4131_v33, 0.0 }
 0x61f   : > { %6331 = vmatmul.mubr.bf16.gmra.mxu1 %v3958_v54  ;;  %v6301_v6 = vpop.f32.mrf.mxu1 }
 0x620   : > { %v4134_v31 = vadd.f32 %v6301_v6, %v8138_v17  ;;  %6374 = vmatprep.mubr.bf16.mxu0 %v4397_v56  ;;  %v4341_v14 = vmax.f32 %v4123_v49, 0.0  ;;  %v6631_v6 = vld [vmem:[%s8528_s5 + $0x30] sm:$0xff]  }
 0x621   : > { %v4125_v3 = vpop.f32.mrf.mxu1  ;;  %6375 = vmatmul.mubr.bf16.gmra.mxu0 %v4398_v37  ;;  %6432 = vmatprep.subr.bf16.mxu1 %v6631_v6 }
 0x622   : > { %v4126_v4 = vadd.f32 %v8138_v17, %v4125_v3  ;;  %v4344_v43 = vmax.f32 %v4134_v31, 0.0  ;;  %6433 = vmatpush3.bf16.msra.mxu1 %v6631_v6 }
 0x623   : > { %v6304_v63 = vpop.f32.mrf.mxu1 }
 0x624   : > { %v4342_v26 = vmax.f32 %v4126_v4, 0.0  ;;  %v4400_v13 = vpack.c.bf16 %v4344_v43, %v4343_v52  ;;  %v4147_v62 = vadd.f32 %v6304_v63, %v8138_v17  ;;  %v6632_v43 = vld [vmem:[%s8528_s5 + $0x28] sm:$0xff]   ;;  %v6634_v52 = vld [vmem:[%s8528_s5 + $0x18] sm:$0xff]  }
 0x625   : > { %v4138_v16 = vpop.f32.mrf.mxu1  ;;  %6434 = vmatprep.subr.bf16.mxu1 %v6632_v43 }
 0x626   : > { %v4399_v24 = vpack.c.bf16 %v4342_v26, %v4341_v14  ;;  %v4139_v18 = vadd.f32 %v8138_v17, %v4138_v16  ;;  %v4347_v29 = vmax.f32 %v4147_v62, 0.0  ;;  %6435 = vmatpush3.bf16.msra.mxu1 %v6632_v43  ;;  %v6633_v26 = vld [vmem:[%s8528_s5 + $0x20] sm:$0xff]   ;;  %v6635_v16 = vld [vmem:[%s8528_s5 + $0x10] sm:$0xff]  }
 0x627   : > { %v6305_v25 = vpop.f32.mrf.mxu1  ;;  %6436 = vmatprep.subr.bf16.mxu1 %v6633_v26 }
 0x628   : > { %v4150_v46 = vadd.f32 %v6305_v25, %v8138_v17  ;;  %6378 = vmatprep.mubr.bf16.mxu0 %v4399_v24  ;;  %v4345_v51 = vmax.f32 %v4139_v18, 0.0  ;;  %v6636_v25 = vld [vmem:[%s8528_s5 + $0x8] sm:$0xff]  }
 0x629   : > { %v4141_v20 = vpop.f32.mrf.mxu1  ;;  %6379 = vmatmul.mubr.bf16.gmra.mxu0 %v4400_v13 }
 0x62a   : > { %v4142_v36 = vadd.f32 %v8138_v17, %v4141_v20  ;;  %v4348_v21 = vmax.f32 %v4150_v46, 0.0  ;;  %6437 = vmatpush3.bf16.msra.mxu1 %v6633_v26 }
 0x62b   : > { %v6308_v12 = vpop.f32.mrf.mxu1  ;;  %6438 = vmatprep.subr.bf16.mxu1 %v6634_v52 }
 0x62c   : > { %v4346_v22 = vmax.f32 %v4142_v36, 0.0  ;;  %v4402_v7 = vpack.c.bf16 %v4348_v21, %v4347_v29  ;;  %v4163_v32 = vadd.f32 %v6308_v12, %v8138_v17  ;;  %v6637_v21 = vld [vmem:[%s8528_s5] sm:$0xff]  }
 0x62d   : > { %v4154_v11 = vpop.f32.mrf.mxu1 }
 0x62e   : > { %v4401_v5 = vpack.c.bf16 %v4346_v22, %v4345_v51  ;;  %v4155_v59 = vadd.f32 %v8138_v17, %v4154_v11  ;;  %v4351_v10 = vmax.f32 %v4163_v32, 0.0  ;;  %6439 = vmatpush3.bf16.msra.mxu1 %v6634_v52  ;;  %v6653_v52 = vld [vmem:[%s8527_s4 + $0x4] ss:$0 sm:$0xff] }
 0x62f   : > { %v6309_v30 = vpop.f32.mrf.mxu1  ;;  %6440 = vmatprep.subr.bf16.mxu1 %v6635_v16 }
 0x630   : > { %v4166_v40 = vadd.f32 %v6309_v30, %v8138_v17  ;;  %6382 = vmatprep.mubr.bf16.mxu0 %v4401_v5  ;;  %v4349_v57 = vmax.f32 %v4155_v59, 0.0 }
 0x631   : > { %v4157_v45 = vpop.f32.mrf.mxu1  ;;  %6383 = vmatmul.mubr.bf16.gmra.mxu0 %v4402_v7 }
 0x632   : > { %v4158_v50 = vadd.f32 %v8138_v17, %v4157_v45  ;;  %v4352_v1 = vmax.f32 %v4166_v40, 0.0  ;;  %6441 = vmatpush3.bf16.msra.mxu1 %v6635_v16 }
 0x633   : > { %6442 = vmatprep.subr.bf16.mxu1 %v6636_v25 }
 0x634   : > { %v6256_v34 = vpop.f32.mrf.mxu0  ;;  %v4350_v41 = vmax.f32 %v4158_v50, 0.0  ;;  %v4404_v19 = vpack.c.bf16 %v4352_v1, %v4351_v10 }
 0x635   : > { %v3817_v23 = vadd.f32 %v6256_v34, %v8046_v2 }
 0x636   : > { %v3808_v9 = vpop.f32.mrf.mxu0  ;;  %v4403_v55 = vpack.c.bf16 %v4350_v41, %v4349_v57  ;;  %6443 = vmatpush3.bf16.msra.mxu1 %v6636_v25 }
 0x637   : > { %v3809_v44 = vadd.f32 %v8046_v2, %v3808_v9  ;;  %v3921_v39 = vmax.f32 %v3817_v23, 0.0  ;;  %6444 = vmatprep.subr.bf16.mxu1 %v6637_v21 }
 0x638   : > { %v6257_v58 = vpop.f32.mrf.mxu0  ;;  %6386 = vmatprep.mubr.bf16.mxu0 %v4403_v55 }
 0x639   : > { %v3820_v15 = vadd.f32 %v6257_v58, %v8046_v2  ;;  %6387 = vmatmul.mubr.bf16.gmra.mxu0 %v4404_v19  ;;  %v3919_v53 = vmax.f32 %v3809_v44, 0.0 }
 0x63a   : > { %v3811_v48 = vpop.f32.mrf.mxu0  ;;  %6445 = vmatpush3.bf16.msra.mxu1 %v6637_v21 }
 0x63b   : > { %v3812_v60 = vadd.f32 %v8046_v2, %v3811_v48  ;;  %v3922_v38 = vmax.f32 %v3820_v15, 0.0 }
 0x63c   : > { %v6312_v0 = vpop.f32.mrf.mxu1 }
 0x63d   : > { %v3920_v42 = vmax.f32 %v3812_v60, 0.0  ;;  %v3960_v27 = vpack.c.bf16 %v3922_v38, %v3921_v39  ;;  %v4179_v56 = vadd.f32 %v6312_v0, %v8138_v17 }
 0x63e   : > { %v4170_v47 = vpop.f32.mrf.mxu1 }
 0x63f   : > { %v3959_v54 = vpack.c.bf16 %v3920_v42, %v3919_v53  ;;  %v4171_v28 = vadd.f32 %v8138_v17, %v4170_v47  ;;  %v4355_v4 = vmax.f32 %v4179_v56, 0.0 }
 0x640   : > { %v6313_v61 = vpop.f32.mrf.mxu1 }
 0x641   : > { %v4182_v35 = vadd.f32 %v6313_v61, %v8138_v17  ;;  %6334 = vmatprep.mubr.bf16.mxu1 %v3959_v54  ;;  %v4353_v33 = vmax.f32 %v4171_v28, 0.0 }
 0x642   : > { %v4173_v37 = vpop.f32.mrf.mxu1  ;;  %6335 = vmatmul.mubr.bf16.gmra.mxu1 %v3960_v27 }
 0x643   : > { %v4174_v49 = vadd.f32 %v8138_v17, %v4173_v37  ;;  %v4356_v31 = vmax.f32 %v4182_v35, 0.0 }
 0x645   : > { %v4354_v3 = vmax.f32 %v4174_v49, 0.0  ;;  %v4406_v14 = vpack.c.bf16 %v4356_v31, %v4355_v4 }
 0x647   : > { %v4405_v63 = vpack.c.bf16 %v4354_v3, %v4353_v33 }
 0x649   : > { %6390 = vmatprep.mubr.bf16.mxu0 %v4405_v63 }
 0x64a   : > { %6391 = vmatmul.mubr.bf16.gmra.mxu0 %v4406_v14 }
 0x653   : > { %v6260_v24 = vpop.f32.mrf.mxu0 }
 0x654   : > { %v3833_v20 = vadd.f32 %v6260_v24, %v8046_v2 }
 0x655   : > { %v3824_v13 = vpop.f32.mrf.mxu0 }
 0x656   : > { %v3825_v46 = vadd.f32 %v8046_v2, %v3824_v13  ;;  %v3925_v11 = vmax.f32 %v3833_v20, 0.0 }
 0x657   : > { %v6261_v18 = vpop.f32.mrf.mxu0 }
 0x658   : > { %v3836_v62 = vadd.f32 %v6261_v18, %v8046_v2  ;;  %v3923_v22 = vmax.f32 %v3825_v46, 0.0 }
 0x659   : > { %v3827_v36 = vpop.f32.mrf.mxu0 }
 0x65a   : > { %v3828_v8 = vadd.f32 %v8046_v2, %v3827_v36  ;;  %v3926_v12 = vmax.f32 %v3836_v62, 0.0 }
 0x65b   : > { %v6316_v51 = vpop.f32.mrf.mxu1 }
 0x65c   : > { %v3924_v29 = vmax.f32 %v3828_v8, 0.0  ;;  %v3962_v30 = vpack.c.bf16 %v3926_v12, %v3925_v11  ;;  %v4195_v45 = vadd.f32 %v6316_v51, %v8138_v17 }
 0x65d   : > { %v4186_v5 = vpop.f32.mrf.mxu1 }
 0x65e   : > { %v3961_v7 = vpack.c.bf16 %v3924_v29, %v3923_v22  ;;  %v4187_v40 = vadd.f32 %v8138_v17, %v4186_v5  ;;  %v4359_v10 = vmax.f32 %v4195_v45, 0.0 }
 0x65f   : > { %v6317_v59 = vpop.f32.mrf.mxu1 }
 0x660   : > { %v4198_v32 = vadd.f32 %v6317_v59, %v8138_v17  ;;  %6338 = vmatprep.mubr.bf16.mxu1 %v3961_v7  ;;  %v4357_v57 = vmax.f32 %v4187_v40, 0.0 }
 0x661   : > { %v4189_v50 = vpop.f32.mrf.mxu1  ;;  %6339 = vmatmul.mubr.bf16.gmra.mxu1 %v3962_v30 }
 0x662   : > { %v4190_v1 = vadd.f32 %v8138_v17, %v4189_v50  ;;  %v4360_v34 = vmax.f32 %v4198_v32, 0.0 }
 0x664   : > { %v4358_v41 = vmax.f32 %v4190_v1, 0.0  ;;  %v4408_v55 = vpack.c.bf16 %v4360_v34, %v4359_v10 }
 0x666   : > { %v4407_v9 = vpack.c.bf16 %v4358_v41, %v4357_v57 }
 0x668   : > { %6394 = vmatprep.mubr.bf16.mxu0 %v4407_v9 }
 0x669   : > { %6395 = vmatmul.mubr.bf16.gmra.mxu0 %v4408_v55 }
 0x676   : > { %v6264_v19 = vpop.f32.mrf.mxu0 }
 0x677   : > { %v3849_v48 = vadd.f32 %v6264_v19, %v8046_v2 }
 0x678   : > { %v3840_v58 = vpop.f32.mrf.mxu0 }
 0x679   : > { %v3841_v15 = vadd.f32 %v8046_v2, %v3840_v58  ;;  %v3929_v47 = vmax.f32 %v3849_v48, 0.0 }
 0x67a   : > { %v6265_v44 = vpop.f32.mrf.mxu0 }
 0x67b   : > { %v3852_v23 = vadd.f32 %v6265_v44, %v8046_v2  ;;  %v3927_v42 = vmax.f32 %v3841_v15, 0.0 }
 0x67c   : > { %v3843_v60 = vpop.f32.mrf.mxu0 }
 0x67d   : > { %v3844_v38 = vadd.f32 %v8046_v2, %v3843_v60  ;;  %v3930_v0 = vmax.f32 %v3852_v23, 0.0 }
 0x67e   : > { %v6320_v53 = vpop.f32.mrf.mxu1 }
 0x67f   : > { %v3928_v39 = vmax.f32 %v3844_v38, 0.0  ;;  %v3964_v61 = vpack.c.bf16 %v3930_v0, %v3929_v47  ;;  %v4211_v37 = vadd.f32 %v6320_v53, %v8138_v17 }
 0x680   : > { %v4202_v54 = vpop.f32.mrf.mxu1 }
 0x681   : > { %v3963_v27 = vpack.c.bf16 %v3928_v39, %v3927_v42  ;;  %v4203_v35 = vadd.f32 %v8138_v17, %v4202_v54  ;;  %v4363_v3 = vmax.f32 %v4211_v37, 0.0  ;;  %v8230_v42 = vld [vmem:[%s8527_s4 + $0x6] ss:$0 sm:$0xff] }
 0x682   : > { %v6321_v28 = vpop.f32.mrf.mxu1 }
 0x683   : > { %v4214_v56 = vadd.f32 %v6321_v28, %v8138_v17  ;;  %6342 = vmatprep.mubr.bf16.mxu1 %v3963_v27  ;;  %v4361_v31 = vmax.f32 %v4203_v35, 0.0 }
 0x684   : > { %v4205_v6 = vpop.f32.mrf.mxu1  ;;  %6343 = vmatmul.mubr.bf16.gmra.mxu1 %v3964_v61 }
 0x685   : > { %v4206_v2 = vadd.f32 %v8138_v17, %v4205_v6  ;;  %v4364_v49 = vmax.f32 %v4214_v56, 0.0 }
 0x687   : > { %v4362_v33 = vmax.f32 %v4206_v2, 0.0  ;;  %v4410_v43 = vpack.c.bf16 %v4364_v49, %v4363_v3 }
 0x689   : > { %v4409_v4 = vpack.c.bf16 %v4362_v33, %v4361_v31 }
 0x68b   : > { %6398 = vmatprep.mubr.bf16.mxu0 %v4409_v4 }
 0x68c   : > { %6399 = vmatmul.mubr.bf16.gmra.mxu0 %v4410_v43 }
 0x695   : > { %v6268_v63 = vpop.f32.mrf.mxu0 }
 0x696   : > { %v3865_v13 = vadd.f32 %v6653_v52, %v6268_v63 }
 0x697   : > { %v3856_v14 = vpop.f32.mrf.mxu0 }
 0x698   : > { %v3857_v16 = vadd.f32 %v6653_v52, %v3856_v14  ;;  %v3933_v8 = vmax.f32 %v3865_v13, 0.0 }
 0x699   : > { %v6269_v26 = vpop.f32.mrf.mxu0 }
 0x69a   : > { %v3868_v24 = vadd.f32 %v6653_v52, %v6269_v26  ;;  %v3931_v20 = vmax.f32 %v3857_v16, 0.0 }
 0x69b   : > { %v3859_v25 = vpop.f32.mrf.mxu0 }
 0x69c   : > { %v3860_v18 = vadd.f32 %v6653_v52, %v3859_v25  ;;  %v3934_v46 = vmax.f32 %v3868_v24, 0.0 }
 0x69d   : > { %v6324_v62 = vpop.f32.mrf.mxu1 }
 0x69e   : > { %v3932_v36 = vmax.f32 %v3860_v18, 0.0  ;;  %v3966_v51 = vpack.c.bf16 %v3934_v46, %v3933_v8  ;;  %v4227_v5 = vadd.f32 %v6324_v62, %v8138_v17 }
 0x69f   : > { %v4218_v21 = vpop.f32.mrf.mxu1 }
 0x6a0   : > { %v3965_v12 = vpack.c.bf16 %v3932_v36, %v3931_v20  ;;  %v4219_v29 = vadd.f32 %v8138_v17, %v4218_v21  ;;  %v4367_v45 = vmax.f32 %v4227_v5, 0.0 }
 0x6a1   : > { %v6325_v22 = vpop.f32.mrf.mxu1 }
 0x6a2   : > { %v4230_v11 = vadd.f32 %v6325_v22, %v8138_v17  ;;  %6346 = vmatprep.mubr.bf16.mxu1 %v3965_v12  ;;  %v4365_v40 = vmax.f32 %v4219_v29, 0.0 }
 0x6a3   : > { %v4221_v7 = vpop.f32.mrf.mxu1  ;;  %6347 = vmatmul.mubr.bf16.gmra.mxu1 %v3966_v51 }
 0x6a4   : > { %v4222_v30 = vadd.f32 %v8138_v17, %v4221_v7  ;;  %v4368_v59 = vmax.f32 %v4230_v11, 0.0 }
 0x6a6   : > { %v4366_v32 = vmax.f32 %v4222_v30, 0.0  ;;  %v4412_v1 = vpack.c.bf16 %v4368_v59, %v4367_v45 }
 0x6a8   : > { %v4411_v50 = vpack.c.bf16 %v4366_v32, %v4365_v40 }
 0x6aa   : > { %6402 = vmatprep.mubr.bf16.mxu0 %v4411_v50 }
 0x6ab   : > { %6403 = vmatmul.mubr.bf16.gmra.mxu0 %v4412_v1 }
 0x6c0   : > { %v6328_v34 = vpop.f32.mrf.mxu1 }
 0x6c1   : > { %v4243_v55 = vadd.f32 %v6328_v34, %v8138_v17 }
 0x6c2   : > { %v4234_v57 = vpop.f32.mrf.mxu1 }
 0x6c3   : > { %v4235_v10 = vadd.f32 %v8138_v17, %v4234_v57  ;;  %v4371_v48 = vmax.f32 %v4243_v55, 0.0 }
 0x6c4   : > { %v6329_v41 = vpop.f32.mrf.mxu1 }
 0x6c5   : > { %v4246_v9 = vadd.f32 %v6329_v41, %v8138_v17  ;;  %v4369_v15 = vmax.f32 %v4235_v10, 0.0 }
 0x6c6   : > { %v4237_v19 = vpop.f32.mrf.mxu1 }
 0x6c7   : > { %v4238_v58 = vadd.f32 %v8138_v17, %v4237_v19  ;;  %v4372_v44 = vmax.f32 %v4246_v9, 0.0 }
 0x6c9   : > { %v4370_v23 = vmax.f32 %v4238_v58, 0.0  ;;  %v4414_v38 = vpack.c.bf16 %v4372_v44, %v4371_v48 }
 0x6cb   : > { %v4413_v60 = vpack.c.bf16 %v4370_v23, %v4369_v15 }
 0x6cd   : > { %6406 = vmatprep.mubr.bf16.mxu0 %v4413_v60 }
 0x6ce   : > { %6407 = vmatmul.mubr.bf16.gmra.mxu0 %v4414_v38 }
 0x6d1   : > { %v6368_v0 = vpop.f32.mrf.mxu0 }
 0x6d2   : > { %v4541_v27 = vadd.f32 %v6368_v0, %v8230_v42 }
 0x6d3   : > { %v4532_v53 = vpop.f32.mrf.mxu0 }
 0x6d4   : > { %v4533_v47 = vadd.f32 %v8230_v42, %v4532_v53  ;;  %v4789_v2 = vmax.f32 %v4541_v27, 0.0 }
 0x6d5   : > { %v6369_v39 = vpop.f32.mrf.mxu0 }
 0x6d6   : > { %v4544_v54 = vadd.f32 %v6369_v39, %v8230_v42  ;;  %v4787_v37 = vmax.f32 %v4533_v47, 0.0 }
 0x6d7   : > { %v4535_v61 = vpop.f32.mrf.mxu0 }
 0x6d8   : > { %v4536_v28 = vadd.f32 %v8230_v42, %v4535_v61  ;;  %v4790_v35 = vmax.f32 %v4544_v54, 0.0 }
 0x6d9   : > { %v6372_v56 = vpop.f32.mrf.mxu0 }
 0x6da   : > { %v4788_v6 = vmax.f32 %v4536_v28, 0.0  ;;  %v4852_v33 = vpack.c.bf16 %v4790_v35, %v4789_v2  ;;  %v4557_v14 = vadd.f32 %v6372_v56, %v8230_v42 }
 0x6db   : > { %v4548_v49 = vpop.f32.mrf.mxu0 }
 0x6dc   : > { %v4851_v31 = vpack.c.bf16 %v4788_v6, %v4787_v37  ;;  %v4549_v4 = vadd.f32 %v8230_v42, %v4548_v49  ;;  %v4793_v62 = vmax.f32 %v4557_v14, 0.0 }
 0x6dd   : > { %v6373_v3 = vpop.f32.mrf.mxu0 }
 0x6de   : > { %v4560_v43 = vadd.f32 %v6373_v3, %v8230_v42  ;;  %6446 = vmatprep.mubr.bf16.mxu1 %v4851_v31  ;;  %v4791_v25 = vmax.f32 %v4549_v4, 0.0 }
 0x6df   : > { %v6332_v63 = vpop.f32.mrf.mxu1  ;;  %v4551_v26 = vpop.f32.mrf.mxu0  ;;  %6447 = vmatmul.mubr.bf16.vlgmr.msra.gmra.mxu1 %v4852_v33 }
 0x6e0   : > { %v4552_v52 = vadd.f32 %v8230_v42, %v4551_v26  ;;  %v4794_v24 = vmax.f32 %v4560_v43, 0.0  ;;  %v4259_v21 = vadd.f32 %v6332_v63, %v8138_v17 }
 0x6e1   : > { %v4250_v16 = vpop.f32.mrf.mxu1  ;;  %v6376_v13 = vpop.f32.mrf.mxu0 }
 0x6e2   : > { %v4792_v18 = vmax.f32 %v4552_v52, 0.0  ;;  %v4251_v20 = vadd.f32 %v8138_v17, %v4250_v16  ;;  %v4854_v22 = vpack.c.bf16 %v4794_v24, %v4793_v62  ;;  %v4573_v40 = vadd.f32 %v6376_v13, %v8230_v42 }
 0x6e3   : > { %v6333_v46 = vpop.f32.mrf.mxu1  ;;  %v4564_v8 = vpop.f32.mrf.mxu0  ;;  %v4375_v50 = vmax.f32 %v4259_v21, 0.0 }
 0x6e4   : > { %v4262_v36 = vadd.f32 %v6333_v46, %v8138_v17  ;;  %v4853_v12 = vpack.c.bf16 %v4792_v18, %v4791_v25  ;;  %v4565_v7 = vadd.f32 %v8230_v42, %v4564_v8  ;;  %v4373_v59 = vmax.f32 %v4251_v20, 0.0 }
 0x6e5   : > { %v4253_v51 = vpop.f32.mrf.mxu1  ;;  %v6377_v11 = vpop.f32.mrf.mxu0  ;;  %v4797_v19 = vmax.f32 %v4573_v40, 0.0 }
 0x6e6   : > { %v4254_v29 = vadd.f32 %v8138_v17, %v4253_v51  ;;  %v4376_v5 = vmax.f32 %v4262_v36, 0.0  ;;  %v4576_v30 = vadd.f32 %v6377_v11, %v8230_v42  ;;  %6450 = vmatprep.mubr.bf16.mxu1 %v4853_v12  ;;  %v4795_v9 = vmax.f32 %v4565_v7, 0.0 }
 0x6e7   : > { %v4567_v45 = vpop.f32.mrf.mxu0  ;;  %6451 = vmatmul.mubr.bf16.gmra.mxu1 %v4854_v22 }
 0x6e8   : > { %v4374_v32 = vmax.f32 %v4254_v29, 0.0  ;;  %v4568_v1 = vadd.f32 %v8230_v42, %v4567_v45  ;;  %v4798_v57 = vmax.f32 %v4576_v30, 0.0  ;;  %v4416_v10 = vpack.c.bf16 %v4376_v5, %v4375_v50 }
 0x6e9   : > { %v6380_v41 = vpop.f32.mrf.mxu0 }
 0x6ea   : > { %v4415_v34 = vpack.c.bf16 %v4374_v32, %v4373_v59  ;;  %v4796_v55 = vmax.f32 %v4568_v1, 0.0  ;;  %v4856_v15 = vpack.c.bf16 %v4798_v57, %v4797_v19  ;;  %v4589_v38 = vadd.f32 %v6380_v41, %v8230_v42 }
 0x6eb   : > { %v4580_v58 = vpop.f32.mrf.mxu0 }
 0x6ec   : > { %6410 = vmatprep.mubr.bf16.mxu0 %v4415_v34  ;;  %v4855_v44 = vpack.c.bf16 %v4796_v55, %v4795_v9  ;;  %v4581_v48 = vadd.f32 %v8230_v42, %v4580_v58  ;;  %v4801_v61 = vmax.f32 %v4589_v38, 0.0 }
 0x6ed   : > { %6411 = vmatmul.mubr.bf16.gmra.mxu0 %v4416_v10  ;;  %v6381_v23 = vpop.f32.mrf.mxu0 }
 0x6ee   : > { %v4592_v60 = vadd.f32 %v6381_v23, %v8230_v42  ;;  %6454 = vmatprep.mubr.bf16.mxu1 %v4855_v44  ;;  %v4799_v54 = vmax.f32 %v4581_v48, 0.0 }
 0x6ef   : > { %v4583_v0 = vpop.f32.mrf.mxu0  ;;  %6455 = vmatmul.mubr.bf16.gmra.mxu1 %v4856_v15 }
 0x6f0   : > { %v4584_v53 = vadd.f32 %v8230_v42, %v4583_v0  ;;  %v4802_v39 = vmax.f32 %v4592_v60, 0.0 }
 0x6f1   : > { %v6384_v47 = vpop.f32.mrf.mxu0 }
 0x6f2   : > { %v4800_v27 = vmax.f32 %v4584_v53, 0.0  ;;  %v4858_v56 = vpack.c.bf16 %v4802_v39, %v4801_v61  ;;  %v4605_v49 = vadd.f32 %v6384_v47, %v8230_v42 }
 0x6f3   : > { %v4596_v28 = vpop.f32.mrf.mxu0 }
 0x6f4   : > { %v4857_v35 = vpack.c.bf16 %v4800_v27, %v4799_v54  ;;  %v4597_v6 = vadd.f32 %v8230_v42, %v4596_v28  ;;  %v4805_v14 = vmax.f32 %v4605_v49, 0.0 }
 0x6f5   : > { %v6385_v37 = vpop.f32.mrf.mxu0 }
 0x6f6   : > { %v4608_v2 = vadd.f32 %v6385_v37, %v8230_v42  ;;  %6458 = vmatprep.mubr.bf16.mxu1 %v4857_v35  ;;  %v4803_v43 = vmax.f32 %v4597_v6, 0.0 }
 0x6f7   : > { %v4599_v31 = vpop.f32.mrf.mxu0  ;;  %6459 = vmatmul.mubr.bf16.gmra.mxu1 %v4858_v56 }
 0x6f8   : > { %v4600_v33 = vadd.f32 %v8230_v42, %v4599_v31  ;;  %v4806_v3 = vmax.f32 %v4608_v2, 0.0 }
 0x6f9   : > { %v6388_v4 = vpop.f32.mrf.mxu0 }
 0x6fa   : > { %v4804_v63 = vmax.f32 %v4600_v33, 0.0  ;;  %v4860_v16 = vpack.c.bf16 %v4806_v3, %v4805_v14  ;;  %v4621_v18 = vadd.f32 %v6388_v4, %v8230_v42 }
 0x6fb   : > { %v4612_v26 = vpop.f32.mrf.mxu0 }
 0x6fc   : > { %v4859_v52 = vpack.c.bf16 %v4804_v63, %v4803_v43  ;;  %v4613_v13 = vadd.f32 %v8230_v42, %v4612_v26  ;;  %v4809_v12 = vmax.f32 %v4621_v18, 0.0 }
 0x6fd   : > { %v6389_v24 = vpop.f32.mrf.mxu0 }
 0x6fe   : > { %v4624_v25 = vadd.f32 %v6389_v24, %v8230_v42  ;;  %6462 = vmatprep.mubr.bf16.mxu1 %v4859_v52  ;;  %v4807_v8 = vmax.f32 %v4613_v13, 0.0 }
 0x6ff   : > { %v4615_v46 = vpop.f32.mrf.mxu0  ;;  %6463 = vmatmul.mubr.bf16.gmra.mxu1 %v4860_v16 }
 0x700   : > { %v4616_v62 = vadd.f32 %v8230_v42, %v4615_v46  ;;  %v4810_v20 = vmax.f32 %v4624_v25, 0.0 }
 0x702   : > { %v6336_v36 = vpop.f32.mrf.mxu1  ;;  %v4808_v21 = vmax.f32 %v4616_v62, 0.0  ;;  %v4862_v29 = vpack.c.bf16 %v4810_v20, %v4809_v12 }
 0x703   : > { %v4275_v30 = vadd.f32 %v6336_v36, %v8138_v17 }
 0x704   : > { %v4266_v51 = vpop.f32.mrf.mxu1  ;;  %v4861_v22 = vpack.c.bf16 %v4808_v21, %v4807_v8 }
 0x705   : > { %v4267_v5 = vadd.f32 %v8138_v17, %v4266_v51  ;;  %v4379_v34 = vmax.f32 %v4275_v30, 0.0 }
 0x706   : > { %v6337_v11 = vpop.f32.mrf.mxu1  ;;  %6466 = vmatprep.mubr.bf16.mxu1 %v4861_v22 }
 0x707   : > { %v4278_v7 = vadd.f32 %v6337_v11, %v8138_v17  ;;  %6467 = vmatmul.mubr.bf16.gmra.mxu1 %v4862_v29  ;;  %v4377_v50 = vmax.f32 %v4267_v5, 0.0 }
 0x708   : > { %v4269_v59 = vpop.f32.mrf.mxu1 }
 0x709   : > { %v4270_v40 = vadd.f32 %v8138_v17, %v4269_v59  ;;  %v4380_v32 = vmax.f32 %v4278_v7, 0.0 }
 0x70a   : > { %v6392_v45 = vpop.f32.mrf.mxu0 }
 0x70b   : > { %v4378_v1 = vmax.f32 %v4270_v40, 0.0  ;;  %v4418_v10 = vpack.c.bf16 %v4380_v32, %v4379_v34  ;;  %v4637_v58 = vadd.f32 %v6392_v45, %v8230_v42 }
 0x70c   : > { %v4628_v57 = vpop.f32.mrf.mxu0 }
 0x70d   : > { %v4417_v41 = vpack.c.bf16 %v4378_v1, %v4377_v50  ;;  %v4629_v55 = vadd.f32 %v8230_v42, %v4628_v57  ;;  %v4813_v38 = vmax.f32 %v4637_v58, 0.0 }
 0x70e   : > { %v6393_v9 = vpop.f32.mrf.mxu0 }
 0x70f   : > { %v4640_v19 = vadd.f32 %v6393_v9, %v8230_v42  ;;  %6414 = vmatprep.mubr.bf16.mxu0 %v4417_v41  ;;  %v4811_v48 = vmax.f32 %v4629_v55, 0.0 }
 0x710   : > { %v4631_v44 = vpop.f32.mrf.mxu0  ;;  %6415 = vmatmul.mubr.bf16.gmra.mxu0 %v4418_v10 }
 0x711   : > { %v4632_v15 = vadd.f32 %v8230_v42, %v4631_v44  ;;  %v4814_v23 = vmax.f32 %v4640_v19, 0.0 }
 0x713   : > { %v4812_v60 = vmax.f32 %v4632_v15, 0.0  ;;  %v4864_v53 = vpack.c.bf16 %v4814_v23, %v4813_v38 }
 0x715   : > { %v4863_v0 = vpack.c.bf16 %v4812_v60, %v4811_v48 }
 0x717   : > { %6470 = vmatprep.mubr.bf16.mxu1 %v4863_v0 }
 0x718   : > { %6471 = vmatmul.mubr.bf16.gmra.mxu1 %v4864_v53 }
 0x721   : > { %v6340_v39 = vpop.f32.mrf.mxu1 }
 0x722   : > { %v4291_v28 = vadd.f32 %v6340_v39, %v8138_v17 }
 0x723   : > { %v4282_v47 = vpop.f32.mrf.mxu1 }
 0x724   : > { %v4283_v27 = vadd.f32 %v8138_v17, %v4282_v47  ;;  %v4383_v31 = vmax.f32 %v4291_v28, 0.0 }
 0x725   : > { %v6341_v54 = vpop.f32.mrf.mxu1 }
 0x726   : > { %v4294_v61 = vadd.f32 %v6341_v54, %v8138_v17  ;;  %v4381_v2 = vmax.f32 %v4283_v27, 0.0 }
 0x727   : > { %v4285_v35 = vpop.f32.mrf.mxu1 }
 0x728   : > { %v4286_v56 = vadd.f32 %v8138_v17, %v4285_v35  ;;  %v4384_v37 = vmax.f32 %v4294_v61, 0.0 }
 0x729   : > { %v6396_v6 = vpop.f32.mrf.mxu0 }
 0x72a   : > { %v4382_v49 = vmax.f32 %v4286_v56, 0.0  ;;  %v4420_v4 = vpack.c.bf16 %v4384_v37, %v4383_v31  ;;  %v4653_v26 = vadd.f32 %v6396_v6, %v8230_v42 }
 0x72b   : > { %v4644_v33 = vpop.f32.mrf.mxu0 }
 0x72c   : > { %v4419_v3 = vpack.c.bf16 %v4382_v49, %v4381_v2  ;;  %v4645_v63 = vadd.f32 %v8230_v42, %v4644_v33  ;;  %v4817_v18 = vmax.f32 %v4653_v26, 0.0 }
 0x72d   : > { %v6397_v43 = vpop.f32.mrf.mxu0 }
 0x72e   : > { %v4656_v14 = vadd.f32 %v6397_v43, %v8230_v42  ;;  %6418 = vmatprep.mubr.bf16.mxu0 %v4419_v3  ;;  %v4815_v13 = vmax.f32 %v4645_v63, 0.0 }
 0x72f   : > { %v4647_v52 = vpop.f32.mrf.mxu0  ;;  %6419 = vmatmul.mubr.bf16.gmra.mxu0 %v4420_v4 }
 0x730   : > { %v4648_v16 = vadd.f32 %v8230_v42, %v4647_v52  ;;  %v4818_v24 = vmax.f32 %v4656_v14, 0.0 }
 0x732   : > { %v4816_v25 = vmax.f32 %v4648_v16, 0.0  ;;  %v4866_v62 = vpack.c.bf16 %v4818_v24, %v4817_v18 }
 0x734   : > { %v4865_v46 = vpack.c.bf16 %v4816_v25, %v4815_v13 }
 0x736   : > { %6474 = vmatprep.mubr.bf16.mxu1 %v4865_v46 }
 0x737   : > { %6475 = vmatmul.mubr.bf16.gmra.mxu1 %v4866_v62 }
 0x744   : > { %v6344_v20 = vpop.f32.mrf.mxu1 }
 0x745   : > { %v4307_v51 = vadd.f32 %v6344_v20, %v8138_v17 }
 0x746   : > { %v4298_v36 = vpop.f32.mrf.mxu1 }
 0x747   : > { %v4299_v21 = vadd.f32 %v8138_v17, %v4298_v36  ;;  %v4387_v59 = vmax.f32 %v4307_v51, 0.0 }
 0x748   : > { %v6345_v8 = vpop.f32.mrf.mxu1 }
 0x749   : > { %v4310_v12 = vadd.f32 %v6345_v8, %v8138_v17  ;;  %v4385_v7 = vmax.f32 %v4299_v21, 0.0 }
 0x74a   : > { %v4301_v22 = vpop.f32.mrf.mxu1 }
 0x74b   : > { %v4302_v29 = vadd.f32 %v8138_v17, %v4301_v22  ;;  %v4388_v11 = vmax.f32 %v4310_v12, 0.0 }
 0x74c   : > { %v6400_v5 = vpop.f32.mrf.mxu0 }
 0x74d   : > { %v4386_v30 = vmax.f32 %v4302_v29, 0.0  ;;  %v4422_v45 = vpack.c.bf16 %v4388_v11, %v4387_v59  ;;  %v4669_v57 = vadd.f32 %v6400_v5, %v8230_v42  ;;  %v8299_v29 = vld [vmem:[%s8529_s6] ss:$0 sm:$0xff] }
 0x74e   : > { %v4660_v40 = vpop.f32.mrf.mxu0 }
 0x74f   : > { %v4421_v32 = vpack.c.bf16 %v4386_v30, %v4385_v7  ;;  %v4661_v1 = vadd.f32 %v8230_v42, %v4660_v40  ;;  %v4821_v58 = vmax.f32 %v4669_v57, 0.0 }
 0x750   : > { %v6401_v50 = vpop.f32.mrf.mxu0 }
 0x751   : > { %v4672_v34 = vadd.f32 %v6401_v50, %v8230_v42  ;;  %6422 = vmatprep.mubr.bf16.mxu0 %v4421_v32  ;;  %v4819_v55 = vmax.f32 %v4661_v1, 0.0 }
 0x752   : > { %v4663_v41 = vpop.f32.mrf.mxu0  ;;  %6423 = vmatmul.mubr.bf16.gmra.mxu0 %v4422_v45 }
 0x753   : > { %v4664_v10 = vadd.f32 %v8230_v42, %v4663_v41  ;;  %v4822_v9 = vmax.f32 %v4672_v34, 0.0 }
 0x755   : > { %v4820_v19 = vmax.f32 %v4664_v10, 0.0  ;;  %v4868_v15 = vpack.c.bf16 %v4822_v9, %v4821_v58 }
 0x757   : > { %v4867_v44 = vpack.c.bf16 %v4820_v19, %v4819_v55 }
 0x759   : > { %6478 = vmatprep.mubr.bf16.mxu1 %v4867_v44 }
 0x75a   : > { %6479 = vmatmul.mubr.bf16.gmra.mxu1 %v4868_v15 }
 0x763   : > { %v6348_v23 = vpop.f32.mrf.mxu1 }
 0x764   : > { %v4323_v53 = vadd.f32 %v6348_v23, %v8138_v17 }
 0x765   : > { %v4314_v48 = vpop.f32.mrf.mxu1 }
 0x766   : > { %v4315_v38 = vadd.f32 %v8138_v17, %v4314_v48  ;;  %v4391_v35 = vmax.f32 %v4323_v53, 0.0 }
 0x767   : > { %v6349_v60 = vpop.f32.mrf.mxu1 }
 0x768   : > { %v4326_v0 = vadd.f32 %v6349_v60, %v8138_v17  ;;  %v4389_v61 = vmax.f32 %v4315_v38, 0.0 }
 0x769   : > { %v4317_v39 = vpop.f32.mrf.mxu1 }
 0x76a   : > { %v4318_v47 = vadd.f32 %v8138_v17, %v4317_v39  ;;  %v4392_v54 = vmax.f32 %v4326_v0, 0.0 }
 0x76b   : > { %v6404_v27 = vpop.f32.mrf.mxu0 }
 0x76c   : > { %v4390_v28 = vmax.f32 %v4318_v47, 0.0  ;;  %v4424_v6 = vpack.c.bf16 %v4392_v54, %v4391_v35  ;;  %v4685_v33 = vadd.f32 %v6404_v27, %v8230_v42 }
 0x76d   : > { %v4676_v56 = vpop.f32.mrf.mxu0 }
 0x76e   : > { %v4423_v37 = vpack.c.bf16 %v4390_v28, %v4389_v61  ;;  %v4677_v49 = vadd.f32 %v8230_v42, %v4676_v56  ;;  %v4825_v14 = vmax.f32 %v4685_v33, 0.0 }
 0x76f   : > { %v6405_v2 = vpop.f32.mrf.mxu0 }
 0x770   : > { %v4688_v31 = vadd.f32 %v6405_v2, %v8230_v42  ;;  %6426 = vmatprep.mubr.bf16.mxu0 %v4423_v37  ;;  %v4823_v43 = vmax.f32 %v4677_v49, 0.0 }
 0x771   : > { %v4679_v3 = vpop.f32.mrf.mxu0  ;;  %6427 = vmatmul.mubr.bf16.gmra.mxu0 %v4424_v6 }
 0x772   : > { %v4680_v17 = vadd.f32 %v8230_v42, %v4679_v3  ;;  %v4826_v4 = vmax.f32 %v4688_v31, 0.0 }
 0x774   : > { %v4824_v63 = vmax.f32 %v4680_v17, 0.0  ;;  %v4870_v52 = vpack.c.bf16 %v4826_v4, %v4825_v14 }
 0x776   : > { %v4869_v26 = vpack.c.bf16 %v4824_v63, %v4823_v43 }
 0x778   : > { %6482 = vmatprep.mubr.bf16.mxu1 %v4869_v26 }
 0x779   : > { %6483 = vmatmul.mubr.bf16.gmra.mxu1 %v4870_v52 }
 0x78e   : > { %v6408_v16 = vpop.f32.mrf.mxu0 }
 0x78f   : > { %v4701_v46 = vadd.f32 %v6408_v16, %v8230_v42 }
 0x790   : > { %v4692_v24 = vpop.f32.mrf.mxu0 }
 0x791   : > { %v4693_v25 = vadd.f32 %v8230_v42, %v4692_v24  ;;  %v4829_v12 = vmax.f32 %v4701_v46, 0.0 }
 0x792   : > { %v6409_v13 = vpop.f32.mrf.mxu0 }
 0x793   : > { %v4704_v18 = vadd.f32 %v6409_v13, %v8230_v42  ;;  %v4827_v8 = vmax.f32 %v4693_v25, 0.0 }
 0x794   : > { %v4695_v62 = vpop.f32.mrf.mxu0 }
 0x795   : > { %v4696_v20 = vadd.f32 %v8230_v42, %v4695_v62  ;;  %v4830_v36 = vmax.f32 %v4704_v18, 0.0 }
 0x797   : > { %v4828_v21 = vmax.f32 %v4696_v20, 0.0  ;;  %v4872_v22 = vpack.c.bf16 %v4830_v36, %v4829_v12 }
 0x799   : > { %v4871_v51 = vpack.c.bf16 %v4828_v21, %v4827_v8 }
 0x79b   : > { %6486 = vmatprep.mubr.bf16.mxu1 %v4871_v51 }
 0x79c   : > { %6487 = vmatmul.mubr.bf16.gmra.mxu1 %v4872_v22 }
 0x79f   : > { %v6448_v11 = vpop.f32.mrf.mxu1 }
 0x7a0   : > { %v4997_v5 = vadd.f32 %v6448_v11, %v8299_v29 }
 0x7a1   : > { %v4988_v7 = vpop.f32.mrf.mxu1 }
 0x7a2   : > { %5246 = vst.msk [vmem:[%s8306_s11 + $0x10] sm:$0xff] %vm5243_vm0, %v4997_v5  ;;  %v4989_v30 = vadd.f32 %v8299_v29, %v4988_v7 }
 0x7a3   : > { %v6449_v59 = vpop.f32.mrf.mxu1 }
 0x7a4   : > { %5244 = vst.msk [vmem:[%s8306_s11] sm:$0xff] %vm5243_vm0, %v4989_v30  ;;  %v5000_v40 = vadd.f32 %v6449_v59, %v8299_v29 }
 0x7a5   : > { %v4991_v32 = vpop.f32.mrf.mxu1 }
 0x7a6   : > { %5247 = vst.msk [vmem:[%s8306_s11 + $0x18] sm:$0xff] %vm5243_vm0, %v5000_v40  ;;  %v4992_v45 = vadd.f32 %v8299_v29, %v4991_v32 }
 0x7a7   : > { %v6452_v50 = vpop.f32.mrf.mxu1 }
 0x7a8   : > { %5245 = vst.msk [vmem:[%s8306_s11 + $0x8] sm:$0xff] %vm5243_vm0, %v4992_v45  ;;  %v5013_v1 = vadd.f32 %v6452_v50, %v8299_v29 }
 0x7a9   : > { %v5004_v34 = vpop.f32.mrf.mxu1 }
 0x7aa   : > { %5250 = vst.msk [vmem:[%s8306_s11 + $0x30] sm:$0xff] %vm5243_vm0, %v5013_v1  ;;  %v5005_v57 = vadd.f32 %v8299_v29, %v5004_v34 }
 0x7ab   : > { %v6453_v41 = vpop.f32.mrf.mxu1 }
 0x7ac   : > { %5248 = vst.msk [vmem:[%s8306_s11 + $0x20] sm:$0xff] %vm5243_vm0, %v5005_v57  ;;  %v5016_v10 = vadd.f32 %v6453_v41, %v8299_v29 }
 0x7ad   : > { %v6412_v9 = vpop.f32.mrf.mxu0  ;;  %v5007_v55 = vpop.f32.mrf.mxu1 }
 0x7ae   : > { %5251 = vst.msk [vmem:[%s8306_s11 + $0x38] sm:$0xff] %vm5243_vm0, %v5016_v10  ;;  %v5008_v19 = vadd.f32 %v8299_v29, %v5007_v55  ;;  %v4717_v0 = vadd.f32 %v6412_v9, %v8230_v42 }
 0x7af   : > { %v4708_v58 = vpop.f32.mrf.mxu0  ;;  %v6456_v44 = vpop.f32.mrf.mxu1 }
 0x7b0   : > { %5249 = vst.msk [vmem:[%s8306_s11 + $0x28] sm:$0xff] %vm5243_vm0, %v5008_v19  ;;  %v5029_v15 = vadd.f32 %v6456_v44, %v8299_v29  ;;  %v4709_v48 = vadd.f32 %v8230_v42, %v4708_v58  ;;  %v4833_v37 = vmax.f32 %v4717_v0, 0.0 }
 0x7b1   : > { %v6413_v23 = vpop.f32.mrf.mxu0  ;;  %v5020_v38 = vpop.f32.mrf.mxu1 }
 0x7b2   : > { %v4720_v60 = vadd.f32 %v6413_v23, %v8230_v42  ;;  %5254 = vst.msk [vmem:[%s8306_s11 + $0x50] sm:$0xff] %vm5243_vm0, %v5029_v15  ;;  %v5021_v53 = vadd.f32 %v8299_v29, %v5020_v38  ;;  %v4831_v28 = vmax.f32 %v4709_v48, 0.0 }
 0x7b3   : > { %v4711_v39 = vpop.f32.mrf.mxu0  ;;  %v6457_v54 = vpop.f32.mrf.mxu1 }
 0x7b4   : > { %v4712_v47 = vadd.f32 %v8230_v42, %v4711_v39  ;;  %v4834_v27 = vmax.f32 %v4720_v60, 0.0  ;;  %5252 = vst.msk [vmem:[%s8306_s11 + $0x40] sm:$0xff] %vm5243_vm0, %v5021_v53  ;;  %v5032_v61 = vadd.f32 %v6457_v54, %v8299_v29 }
 0x7b5   : > { %v5023_v56 = vpop.f32.mrf.mxu1 }
 0x7b6   : > { %v4832_v35 = vmax.f32 %v4712_v47, 0.0  ;;  %5255 = vst.msk [vmem:[%s8306_s11 + $0x58] sm:$0xff] %vm5243_vm0, %v5032_v61  ;;  %v5024_v6 = vadd.f32 %v8299_v29, %v5023_v56  ;;  %v4874_v31 = vpack.c.bf16 %v4834_v27, %v4833_v37 }
 0x7b7   : > { %v6460_v49 = vpop.f32.mrf.mxu1 }
 0x7b8   : > { %v4873_v2 = vpack.c.bf16 %v4832_v35, %v4831_v28  ;;  %5253 = vst.msk [vmem:[%s8306_s11 + $0x48] sm:$0xff] %vm5243_vm0, %v5024_v6  ;;  %v5045_v33 = vadd.f32 %v6460_v49, %v8299_v29 }
 0x7b9   : > { %v5036_v3 = vpop.f32.mrf.mxu1 }
 0x7ba   : > { %6490 = vmatprep.mubr.bf16.mxu1 %v4873_v2  ;;  %5258 = vst.msk [vmem:[%s8306_s11 + $0x70] sm:$0xff] %vm5243_vm0, %v5045_v33  ;;  %v5037_v17 = vadd.f32 %v8299_v29, %v5036_v3 }
 0x7bb   : > { %6491 = vmatmul.mubr.bf16.gmra.mxu1 %v4874_v31  ;;  %v6461_v4 = vpop.f32.mrf.mxu1 }
 0x7bc   : > { %5256 = vst.msk [vmem:[%s8306_s11 + $0x60] sm:$0xff] %vm5243_vm0, %v5037_v17  ;;  %v5048_v43 = vadd.f32 %v6461_v4, %v8299_v29 }
 0x7bd   : > { %v5039_v63 = vpop.f32.mrf.mxu1 }
 0x7be   : > { %5259 = vst.msk [vmem:[%s8306_s11 + $0x78] sm:$0xff] %vm5243_vm0, %v5048_v43  ;;  %v5040_v14 = vadd.f32 %v8299_v29, %v5039_v63 }
 0x7bf   : > { %v6464_v26 = vpop.f32.mrf.mxu1 }
 0x7c0   : > { %5257 = vst.msk [vmem:[%s8306_s11 + $0x68] sm:$0xff] %vm5243_vm0, %v5040_v14  ;;  %v5061_v52 = vadd.f32 %v6464_v26, %v8299_v29 }
 0x7c1   : > { %v5052_v16 = vpop.f32.mrf.mxu1 }
 0x7c2   : > { %5262 = vst.msk [vmem:[%s8306_s11 + $0x90] sm:$0xff] %vm5243_vm0, %v5061_v52  ;;  %v5053_v24 = vadd.f32 %v8299_v29, %v5052_v16 }
 0x7c3   : > { %v6465_v13 = vpop.f32.mrf.mxu1 }
 0x7c4   : > { %5260 = vst.msk [vmem:[%s8306_s11 + $0x80] sm:$0xff] %vm5243_vm0, %v5053_v24  ;;  %v5064_v25 = vadd.f32 %v6465_v13, %v8299_v29 }
 0x7c5   : > { %v5055_v18 = vpop.f32.mrf.mxu1 }
 0x7c6   : > { %5263 = vst.msk [vmem:[%s8306_s11 + $0x98] sm:$0xff] %vm5243_vm0, %v5064_v25  ;;  %v5056_v46 = vadd.f32 %v8299_v29, %v5055_v18 }
 0x7c7   : > { %v6468_v62 = vpop.f32.mrf.mxu1 }
 0x7c8   : > { %5261 = vst.msk [vmem:[%s8306_s11 + $0x88] sm:$0xff] %vm5243_vm0, %v5056_v46  ;;  %v5077_v20 = vadd.f32 %v6468_v62, %v8299_v29 }
 0x7c9   : > { %v5068_v36 = vpop.f32.mrf.mxu1 }
 0x7ca   : > { %5266 = vst.msk [vmem:[%s8306_s11 + $0xb0] sm:$0xff] %vm5243_vm0, %v5077_v20  ;;  %v5069_v8 = vadd.f32 %v8299_v29, %v5068_v36 }
 0x7cb   : > { %v6469_v21 = vpop.f32.mrf.mxu1 }
 0x7cc   : > { %5264 = vst.msk [vmem:[%s8306_s11 + $0xa0] sm:$0xff] %vm5243_vm0, %v5069_v8  ;;  %v5080_v12 = vadd.f32 %v6469_v21, %v8299_v29 }
 0x7cd   : > { %v5071_v51 = vpop.f32.mrf.mxu1 }
 0x7ce   : > { %5267 = vst.msk [vmem:[%s8306_s11 + $0xb8] sm:$0xff] %vm5243_vm0, %v5080_v12  ;;  %v5072_v22 = vadd.f32 %v8299_v29, %v5071_v51 }
 0x7d0   : > { %v6416_v11 = vpop.f32.mrf.mxu0  ;;  %5265 = vst.msk [vmem:[%s8306_s11 + $0xa8] sm:$0xff] %vm5243_vm0, %v5072_v22 }
 0x7d1   : > { %v4733_v40 = vadd.f32 %v6416_v11, %v8230_v42 }
 0x7d2   : > { %v4724_v5 = vpop.f32.mrf.mxu0 }
 0x7d3   : > { %v4725_v30 = vadd.f32 %v8230_v42, %v4724_v5  ;;  %v4837_v10 = vmax.f32 %v4733_v40, 0.0 }
 0x7d4   : > { %v6417_v7 = vpop.f32.mrf.mxu0 }
 0x7d5   : > { %v4736_v59 = vadd.f32 %v6417_v7, %v8230_v42  ;;  %v4835_v34 = vmax.f32 %v4725_v30, 0.0 }
 0x7d6   : > { %v4727_v32 = vpop.f32.mrf.mxu0 }
 0x7d7   : > { %v4728_v45 = vadd.f32 %v8230_v42, %v4727_v32  ;;  %v4838_v50 = vmax.f32 %v4736_v59, 0.0 }
 0x7d8   : > { %v6472_v1 = vpop.f32.mrf.mxu1 }
 0x7d9   : > { %v4836_v57 = vmax.f32 %v4728_v45, 0.0  ;;  %v5093_v41 = vadd.f32 %v6472_v1, %v8299_v29  ;;  %v4876_v58 = vpack.c.bf16 %v4838_v50, %v4837_v10 }
 0x7da   : > { %v5084_v9 = vpop.f32.mrf.mxu1 }
 0x7db   : > { %v4875_v55 = vpack.c.bf16 %v4836_v57, %v4835_v34  ;;  %5270 = vst.msk [vmem:[%s8306_s11 + $0xd0] sm:$0xff] %vm5243_vm0, %v5093_v41  ;;  %v5085_v19 = vadd.f32 %v8299_v29, %v5084_v9 }
 0x7dc   : > { %v6473_v44 = vpop.f32.mrf.mxu1 }
 0x7dd   : > { %5268 = vst.msk [vmem:[%s8306_s11 + $0xc0] sm:$0xff] %vm5243_vm0, %v5085_v19  ;;  %v5096_v15 = vadd.f32 %v6473_v44, %v8299_v29  ;;  %6494 = vmatprep.mubr.bf16.mxu1 %v4875_v55 }
 0x7de   : > { %v5087_v23 = vpop.f32.mrf.mxu1  ;;  %6495 = vmatmul.mubr.bf16.gmra.mxu1 %v4876_v58 }
 0x7df   : > { %5271 = vst.msk [vmem:[%s8306_s11 + $0xd8] sm:$0xff] %vm5243_vm0, %v5096_v15  ;;  %v5088_v48 = vadd.f32 %v8299_v29, %v5087_v23 }
 0x7e1   : > { %5269 = vst.msk [vmem:[%s8306_s11 + $0xc8] sm:$0xff] %vm5243_vm0, %v5088_v48 }
 0x7ef   : > { %v6420_v60 = vpop.f32.mrf.mxu0 }
 0x7f0   : > { %v4749_v47 = vadd.f32 %v6420_v60, %v8230_v42 }
 0x7f1   : > { %v4740_v38 = vpop.f32.mrf.mxu0 }
 0x7f2   : > { %v4741_v53 = vadd.f32 %v8230_v42, %v4740_v38  ;;  %v4841_v6 = vmax.f32 %v4749_v47, 0.0 }
 0x7f3   : > { %v6421_v0 = vpop.f32.mrf.mxu0 }
 0x7f4   : > { %v4752_v39 = vadd.f32 %v6421_v0, %v8230_v42  ;;  %v4839_v35 = vmax.f32 %v4741_v53, 0.0 }
 0x7f5   : > { %v4743_v54 = vpop.f32.mrf.mxu0 }
 0x7f6   : > { %v4744_v27 = vadd.f32 %v8230_v42, %v4743_v54  ;;  %v4842_v61 = vmax.f32 %v4752_v39, 0.0 }
 0x7f7   : > { %v6476_v28 = vpop.f32.mrf.mxu1 }
 0x7f8   : > { %v4840_v56 = vmax.f32 %v4744_v27, 0.0  ;;  %v5109_v37 = vadd.f32 %v6476_v28, %v8299_v29  ;;  %v4878_v33 = vpack.c.bf16 %v4842_v61, %v4841_v6 }
 0x7f9   : > { %v5100_v2 = vpop.f32.mrf.mxu1 }
 0x7fa   : > { %v4877_v49 = vpack.c.bf16 %v4840_v56, %v4839_v35  ;;  %5274 = vst.msk [vmem:[%s8306_s11 + $0xf0] sm:$0xff] %vm5243_vm0, %v5109_v37  ;;  %v5101_v31 = vadd.f32 %v8299_v29, %v5100_v2 }
 0x7fb   : > { %v6477_v3 = vpop.f32.mrf.mxu1 }
 0x7fc   : > { %5272 = vst.msk [vmem:[%s8306_s11 + $0xe0] sm:$0xff] %vm5243_vm0, %v5101_v31  ;;  %v5112_v17 = vadd.f32 %v6477_v3, %v8299_v29  ;;  %6498 = vmatprep.mubr.bf16.mxu1 %v4877_v49 }
 0x7fd   : > { %v5103_v4 = vpop.f32.mrf.mxu1  ;;  %6499 = vmatmul.mubr.bf16.gmra.mxu1 %v4878_v33 }
 0x7fe   : > { %5275 = vst.msk [vmem:[%s8306_s11 + $0xf8] sm:$0xff] %vm5243_vm0, %v5112_v17  ;;  %v5104_v43 = vadd.f32 %v8299_v29, %v5103_v4 }
 0x800   : > { %5273 = vst.msk [vmem:[%s8306_s11 + $0xe8] sm:$0xff] %vm5243_vm0, %v5104_v43 }
 0x812   : > { %v6424_v63 = vpop.f32.mrf.mxu0 }
 0x813   : > { %v4765_v24 = vadd.f32 %v6424_v63, %v8230_v42 }
 0x814   : > { %v4756_v14 = vpop.f32.mrf.mxu0 }
 0x815   : > { %v4757_v52 = vadd.f32 %v8230_v42, %v4756_v14  ;;  %v4845_v8 = vmax.f32 %v4765_v24, 0.0 }
 0x816   : > { %v6425_v26 = vpop.f32.mrf.mxu0 }
 0x817   : > { %v4768_v16 = vadd.f32 %v6425_v26, %v8230_v42  ;;  %v4843_v62 = vmax.f32 %v4757_v52, 0.0 }
 0x818   : > { %v4759_v13 = vpop.f32.mrf.mxu0 }
 0x819   : > { %v4760_v25 = vadd.f32 %v8230_v42, %v4759_v13  ;;  %v4846_v18 = vmax.f32 %v4768_v16, 0.0 }
 0x81a   : > { %v6480_v46 = vpop.f32.mrf.mxu1 }
 0x81b   : > { %v4844_v20 = vmax.f32 %v4760_v25, 0.0  ;;  %v5125_v36 = vadd.f32 %v6480_v46, %v8299_v29  ;;  %v4880_v22 = vpack.c.bf16 %v4846_v18, %v4845_v8 }
 0x81c   : > { %v5116_v21 = vpop.f32.mrf.mxu1 }
 0x81d   : > { %v4879_v12 = vpack.c.bf16 %v4844_v20, %v4843_v62  ;;  %5278 = vst.msk [vmem:[%s8306_s11 + $0x110] sm:$0xff] %vm5243_vm0, %v5125_v36  ;;  %v5117_v51 = vadd.f32 %v8299_v29, %v5116_v21 }
 0x81e   : > { %v6481_v11 = vpop.f32.mrf.mxu1 }
 0x81f   : > { %5276 = vst.msk [vmem:[%s8306_s11 + $0x100] sm:$0xff] %vm5243_vm0, %v5117_v51  ;;  %v5128_v5 = vadd.f32 %v6481_v11, %v8299_v29  ;;  %6502 = vmatprep.mubr.bf16.mxu1 %v4879_v12 }
 0x820   : > { %v5119_v7 = vpop.f32.mrf.mxu1  ;;  %6503 = vmatmul.mubr.bf16.gmra.mxu1 %v4880_v22 }
 0x821   : > { %5279 = vst.msk [vmem:[%s8306_s11 + $0x118] sm:$0xff] %vm5243_vm0, %v5128_v5  ;;  %v5120_v30 = vadd.f32 %v8299_v29, %v5119_v7 }
 0x823   : > { %5277 = vst.msk [vmem:[%s8306_s11 + $0x108] sm:$0xff] %vm5243_vm0, %v5120_v30 }
 0x831   : > { %v6428_v59 = vpop.f32.mrf.mxu0 }
 0x832   : > { %v4781_v1 = vadd.f32 %v6428_v59, %v8230_v42 }
 0x833   : > { %v4772_v40 = vpop.f32.mrf.mxu0 }
 0x834   : > { %v4773_v45 = vadd.f32 %v8230_v42, %v4772_v40  ;;  %v4849_v58 = vmax.f32 %v4781_v1, 0.0 }
 0x835   : > { %v6429_v32 = vpop.f32.mrf.mxu0 }
 0x836   : > { %v4784_v50 = vadd.f32 %v6429_v32, %v8230_v42  ;;  %v4847_v9 = vmax.f32 %v4773_v45, 0.0 }
 0x837   : > { %v4775_v34 = vpop.f32.mrf.mxu0 }
 0x838   : > { %v4776_v57 = vadd.f32 %v8230_v42, %v4775_v34  ;;  %v4850_v41 = vmax.f32 %v4784_v50, 0.0 }
 0x839   : > { %v6484_v10 = vpop.f32.mrf.mxu1 }
 0x83a   : > { %v4848_v55 = vmax.f32 %v4776_v57, 0.0  ;;  %v5141_v19 = vadd.f32 %v6484_v10, %v8299_v29  ;;  %v4882_v48 = vpack.c.bf16 %v4850_v41, %v4849_v58 }
 0x83b   : > { %v5132_v44 = vpop.f32.mrf.mxu1 }
 0x83c   : > { %v4881_v15 = vpack.c.bf16 %v4848_v55, %v4847_v9  ;;  %5282 = vst.msk [vmem:[%s8306_s11 + $0x130] sm:$0xff] %vm5243_vm0, %v5141_v19  ;;  %v5133_v23 = vadd.f32 %v8299_v29, %v5132_v44 }
 0x83d   : > { %v6485_v60 = vpop.f32.mrf.mxu1 }
 0x83e   : > { %5280 = vst.msk [vmem:[%s8306_s11 + $0x120] sm:$0xff] %vm5243_vm0, %v5133_v23  ;;  %v5144_v42 = vadd.f32 %v6485_v60, %v8299_v29  ;;  %6506 = vmatprep.mubr.bf16.mxu1 %v4881_v15 }
 0x83f   : > { %v5135_v38 = vpop.f32.mrf.mxu1  ;;  %6507 = vmatmul.mubr.bf16.gmra.mxu1 %v4882_v48 }
 0x840   : > { %5283 = vst.msk [vmem:[%s8306_s11 + $0x138] sm:$0xff] %vm5243_vm0, %v5144_v42  ;;  %v5136_v0 = vadd.f32 %v8299_v29, %v5135_v38 }
 0x842   : > { %5281 = vst.msk [vmem:[%s8306_s11 + $0x128] sm:$0xff] %vm5243_vm0, %v5136_v0 }
 0x85c   : > { %v6488_v53 = vpop.f32.mrf.mxu1 }
 0x85d   : > { %v5157_v39 = vadd.f32 %v6488_v53, %v8299_v29 }
 0x85e   : > { %v5148_v47 = vpop.f32.mrf.mxu1 }
 0x85f   : > { %5286 = vst.msk [vmem:[%s8306_s11 + $0x150] sm:$0xff] %vm5243_vm0, %v5157_v39  ;;  %v5149_v54 = vadd.f32 %v8299_v29, %v5148_v47 }
 0x860   : > { %v6489_v27 = vpop.f32.mrf.mxu1 }
 0x861   : > { %5284 = vst.msk [vmem:[%s8306_s11 + $0x140] sm:$0xff] %vm5243_vm0, %v5149_v54  ;;  %v5160_v61 = vadd.f32 %v6489_v27, %v8299_v29 }
 0x862   : > { %v5151_v28 = vpop.f32.mrf.mxu1 }
 0x863   : > { %5287 = vst.msk [vmem:[%s8306_s11 + $0x158] sm:$0xff] %vm5243_vm0, %v5160_v61  ;;  %v5152_v35 = vadd.f32 %v8299_v29, %v5151_v28 }
 0x865   : > { %5285 = vst.msk [vmem:[%s8306_s11 + $0x148] sm:$0xff] %vm5243_vm0, %v5152_v35 }
 0x87b   : > { %v6492_v56 = vpop.f32.mrf.mxu1 }
 0x87c   : > { %v5173_v37 = vadd.f32 %v6492_v56, %v8299_v29 }
 0x87d   : > { %v5164_v6 = vpop.f32.mrf.mxu1 }
 0x87e   : > { %5290 = vst.msk [vmem:[%s8306_s11 + $0x170] sm:$0xff] %vm5243_vm0, %v5173_v37  ;;  %v5165_v2 = vadd.f32 %v8299_v29, %v5164_v6 }
 0x87f   : > { %v6493_v49 = vpop.f32.mrf.mxu1 }
 0x880   : > { %5288 = vst.msk [vmem:[%s8306_s11 + $0x160] sm:$0xff] %vm5243_vm0, %v5165_v2  ;;  %v5176_v31 = vadd.f32 %v6493_v49, %v8299_v29 }
 0x881   : > { %v5167_v33 = vpop.f32.mrf.mxu1 }
 0x882   : > { %5291 = vst.msk [vmem:[%s8306_s11 + $0x178] sm:$0xff] %vm5243_vm0, %v5176_v31  ;;  %v5168_v3 = vadd.f32 %v8299_v29, %v5167_v33 }
 0x884   : > { %5289 = vst.msk [vmem:[%s8306_s11 + $0x168] sm:$0xff] %vm5243_vm0, %v5168_v3 }
 0x89e   : > { %v6496_v17 = vpop.f32.mrf.mxu1 }
 0x89f   : > { %v5189_v4 = vadd.f32 %v6496_v17, %v8299_v29 }
 0x8a0   : > { %v5180_v43 = vpop.f32.mrf.mxu1 }
 0x8a1   : > { %5294 = vst.msk [vmem:[%s8306_s11 + $0x190] sm:$0xff] %vm5243_vm0, %v5189_v4  ;;  %v5181_v63 = vadd.f32 %v8299_v29, %v5180_v43 }
 0x8a2   : > { %v6497_v14 = vpop.f32.mrf.mxu1 }
 0x8a3   : > { %5292 = vst.msk [vmem:[%s8306_s11 + $0x180] sm:$0xff] %vm5243_vm0, %v5181_v63  ;;  %v5192_v26 = vadd.f32 %v6497_v14, %v8299_v29 }
 0x8a4   : > { %v5183_v52 = vpop.f32.mrf.mxu1 }
 0x8a5   : > { %5295 = vst.msk [vmem:[%s8306_s11 + $0x198] sm:$0xff] %vm5243_vm0, %v5192_v26  ;;  %v5184_v16 = vadd.f32 %v8299_v29, %v5183_v52 }
 0x8a7   : > { %5293 = vst.msk [vmem:[%s8306_s11 + $0x188] sm:$0xff] %vm5243_vm0, %v5184_v16 }
 0x8bd   : > { %v6500_v24 = vpop.f32.mrf.mxu1 }
 0x8be   : > { %v5205_v13 = vadd.f32 %v6500_v24, %v8299_v29 }
 0x8bf   : > { %v5196_v25 = vpop.f32.mrf.mxu1 }
 0x8c0   : > { %5298 = vst.msk [vmem:[%s8306_s11 + $0x1b0] sm:$0xff] %vm5243_vm0, %v5205_v13  ;;  %v5197_v18 = vadd.f32 %v8299_v29, %v5196_v25 }
 0x8c1   : > { %v6501_v46 = vpop.f32.mrf.mxu1 }
 0x8c2   : > { %5296 = vst.msk [vmem:[%s8306_s11 + $0x1a0] sm:$0xff] %vm5243_vm0, %v5197_v18  ;;  %v5208_v62 = vadd.f32 %v6501_v46, %v8299_v29 }
 0x8c3   : > { %v5199_v20 = vpop.f32.mrf.mxu1 }
 0x8c4   : > { %5299 = vst.msk [vmem:[%s8306_s11 + $0x1b8] sm:$0xff] %vm5243_vm0, %v5208_v62  ;;  %v5200_v36 = vadd.f32 %v8299_v29, %v5199_v20 }
 0x8c6   : > { %5297 = vst.msk [vmem:[%s8306_s11 + $0x1a8] sm:$0xff] %vm5243_vm0, %v5200_v36 }
 0x8e0   : > { %v6504_v8 = vpop.f32.mrf.mxu1 }
 0x8e1   : > { %v5221_v21 = vadd.f32 %v6504_v8, %v8299_v29 }
 0x8e2   : > { %v5212_v12 = vpop.f32.mrf.mxu1 }
 0x8e3   : > { %5302 = vst.msk [vmem:[%s8306_s11 + $0x1d0] sm:$0xff] %vm5243_vm0, %v5221_v21  ;;  %v5213_v51 = vadd.f32 %v8299_v29, %v5212_v12 }
 0x8e4   : > { %v6505_v22 = vpop.f32.mrf.mxu1 }
 0x8e5   : > { %5300 = vst.msk [vmem:[%s8306_s11 + $0x1c0] sm:$0xff] %vm5243_vm0, %v5213_v51  ;;  %v5224_v11 = vadd.f32 %v6505_v22, %v8299_v29 }
 0x8e6   : > { %v5215_v5 = vpop.f32.mrf.mxu1 }
 0x8e7   : > { %5303 = vst.msk [vmem:[%s8306_s11 + $0x1d8] sm:$0xff] %vm5243_vm0, %v5224_v11  ;;  %v5216_v7 = vadd.f32 %v8299_v29, %v5215_v5 }
 0x8e9   : > { %5301 = vst.msk [vmem:[%s8306_s11 + $0x1c8] sm:$0xff] %vm5243_vm0, %v5216_v7 }
 0x8ff   : > { %v6508_v30 = vpop.f32.mrf.mxu1 }
 0x900   : > { %v5237_v59 = vadd.f32 %v6508_v30, %v8299_v29 }
 0x901   : > { %v5228_v40 = vpop.f32.mrf.mxu1 }
 0x902   : > { %5306 = vst.msk [vmem:[%s8306_s11 + $0x1f0] sm:$0xff] %vm5243_vm0, %v5237_v59  ;;  %v5229_v32 = vadd.f32 %v8299_v29, %v5228_v40 }
 0x903   : > { %v6509_v45 = vpop.f32.mrf.mxu1 }
 0x904   : > { %5304 = vst.msk [vmem:[%s8306_s11 + $0x1e0] sm:$0xff] %vm5243_vm0, %v5229_v32  ;;  %v5240_v50 = vadd.f32 %v6509_v45, %v8299_v29 }
 0x905   : > { %v5231_v1 = vpop.f32.mrf.mxu1 }
 0x906   : > { %5307 = vst.msk [vmem:[%s8306_s11 + $0x1f8] sm:$0xff] %vm5243_vm0, %v5240_v50  ;;  %v5232_v34 = vadd.f32 %v8299_v29, %v5231_v1 }
 0x908   : > { %5305 = vst.msk [vmem:[%s8306_s11 + $0x1e8] sm:$0xff] %vm5243_vm0, %v5232_v34 }
 0x909 PF: > { %s17_s24 = sadd.s32 1, %s6660_s24  }
 0x90a   : > { %p14_p4 = scmp.ge.s32.totalorder %s17_s24, 7  }
 0x90c   :  { %16 = sbr.rel (!%p14_p4) target bundleno = 1 (0x1), region = 90 }

</bundles_post_ra>
